<compile_context>
chip_gen: v6e
topology: v6e:2x2x1
jax: 0.10.0
libtpu: 0.0.40
codegen_flags: <defaults>
</compile_context>

<pallas_src>
import jax
import jax.numpy as jnp
from jax import lax
from jax.experimental import pallas as pl
from jax.experimental.pallas import tpu as pltpu

VMEM_SPEC = pl.BlockSpec(memory_space=pltpu.MemorySpace.VMEM)


def _round_up(n, m):
    return ((n + m - 1) // m) * m


def _block_diag(a, b):
    """[[a, 0], [0, b]] for 2-D arrays (host-side weight prep)."""
    z_tr = jnp.zeros((a.shape[0], b.shape[1]), a.dtype)
    z_bl = jnp.zeros((b.shape[0], a.shape[1]), a.dtype)
    return jnp.concatenate(
        [jnp.concatenate([a, z_tr], axis=1),
         jnp.concatenate([z_bl, b], axis=1)], axis=0)


# ----------------------------------------------------------------------------
# Fused DST forward kernel (single program, whole problem in VMEM).
# PyTorch LSTM gate order (i, f, g, o) within each 4H gate block.
# ----------------------------------------------------------------------------
def _dst_fused_kernel(
    # inputs
    x_sent_ref,      # (T_s*Ms, E)       time-major sentence embeddings, fold=(utt, batch)
    sent_wih_ref,    # (E, 8*SH)         [W_ih_fwd | W_ih_bwd]
    sent_whh_ref,    # (2*SH, 8*SH)      block-diag(W_hh_fwd, W_hh_bwd)
    sent_b_ref,      # (1, 8*SH)
    x_da_ref,        # (T_da*Bp, DA_E)   time-major dialogue-act embeddings
    hier_wih_ref,    # (2*SH, 4*HH)
    hier_b_ref,      # (1, 4*HH)
    da_wih_ref,      # (DA_E, 4*DH)
    da_b_ref,        # (1, 4*DH)
    hd_whh_ref,      # (HH+DH, 4*HH+4*DH) block-diag(W_hh_hier, W_hh_da)
    cand_ref,        # (Bp, E)           candidate embeddings
    w1_ref,          # (2*SH+HH+DH+E, FF_Hp)  fc1 weights (lane-padded)
    b1_ref,          # (1, FF_Hp)
    w2_ref,          # (FF_Hp, Sp)       slot projection (lane-padded, no bias)
    # output
    out_ref,         # (Bp, Sp)
    # scratch
    gx_sent,         # (T_s*Ms, 8*SH)
    h_fb,            # (Ms, 2*SH)   [h_fwd | h_bwd]
    c_fb,            # (Ms, 2*SH)
    gx_hier,         # (Ms, 4*HH)
    gx_da,           # (T_da*Bp, 4*DH)
    h_hd,            # (Bp, HH+DH)  [h_hier | h_da]
    c_hd,            # (Bp, HH+DH)
):
    # Static dims derived from scratch / ref shapes.
    Ms, two_sh = h_fb.shape
    SH = two_sh // 2
    G = 4 * SH
    T_s = x_sent_ref.shape[0] // Ms
    Bp = h_hd.shape[0]
    N_UTTS = Ms // Bp
    HH = gx_hier.shape[1] // 4
    DH = gx_da.shape[1] // 4
    T_da = gx_da.shape[0] // Bp
    T_hd = max(N_UTTS, T_da)
    E = cand_ref.shape[1]
    GH, GD = 4 * HH, 4 * DH

    def cell(gates, c_prev, H):
        # Lane-dense transcendentals on the full 4H tile; split afterwards.
        sig = jax.nn.sigmoid(gates)
        tg = jnp.tanh(gates)
        i = sig[:, 0 * H:1 * H]
        f = sig[:, 1 * H:2 * H]
        g = tg[:, 2 * H:3 * H]
        o = sig[:, 3 * H:4 * H]
        c_new = f * c_prev + i * g
        return o * jnp.tanh(c_new), c_new

    # ---------------- Stage 1: sentence BiLSTM over all utterances -----------
    # Hoisted input projection for BOTH directions and ALL timesteps (one MXU op).
    gx_sent[...] = (jnp.dot(x_sent_ref[...], sent_wih_ref[...],
                            preferred_element_type=jnp.float32) + sent_b_ref[...])

    sent_whh = sent_whh_ref[...]          # hoisted invariant load
    h_fb[...] = jnp.zeros_like(h_fb)
    c_fb[...] = jnp.zeros_like(c_fb)

    def sent_step(t, carry):
        off_f = pl.multiple_of(t * Ms, Ms)
        off_b = pl.multiple_of((T_s - 1 - t) * Ms, Ms)
        h_prev = h_fb[...]
        c_prev = c_fb[...]
        # One block-diagonal matmul produces fwd AND bwd gates (256 lanes).
        gates_all = jnp.dot(h_prev, sent_whh, preferred_element_type=jnp.float32)
        gates_f = gates_all[:, 0:G] + gx_sent[pl.ds(off_f, Ms), pl.ds(0, G)]
        gates_b = gates_all[:, G:2 * G] + gx_sent[pl.ds(off_b, Ms), pl.ds(G, G)]
        h_f, c_f = cell(gates_f, c_prev[:, 0:SH], SH)
        h_b, c_b = cell(gates_b, c_prev[:, SH:2 * SH], SH)
        h_fb[...] = jnp.concatenate([h_f, h_b], axis=1)
        c_fb[...] = jnp.concatenate([c_f, c_b], axis=1)
        return carry

    lax.fori_loop(0, T_s, sent_step, 0, unroll=True)
    # h_fb now holds, for every (utterance u, batch b) row u*Bp + b, the concat
    # of fwd-last and bwd-last hidden == encoded_past_utterances (time-major).

    # ------- Stage 2: hierarchical LSTM + dialogue-acts LSTM (interleaved) ---
    enc = h_fb[...]                                          # (Ms, 2*SH) in VMEM
    gx_hier[...] = (jnp.dot(enc, hier_wih_ref[...],
                            preferred_element_type=jnp.float32) + hier_b_ref[...])
    gx_da[...] = (jnp.dot(x_da_ref[...], da_wih_ref[...],
                          preferred_element_type=jnp.float32) + da_b_ref[...])

    hd_whh = hd_whh_ref[...]
    h_hd[...] = jnp.zeros_like(h_hd)
    c_hd[...] = jnp.zeros_like(c_hd)

    def hd_step(t, carry):
        t_h = jnp.minimum(t, N_UTTS - 1)
        t_d = jnp.minimum(t, T_da - 1)
        off_h = pl.multiple_of(t_h * Bp, Bp)
        off_d = pl.multiple_of(t_d * Bp, Bp)
        h_prev = h_hd[...]
        c_prev = c_hd[...]
        # One block-diagonal matmul produces gates for BOTH chains (256 lanes).
        gates_all = jnp.dot(h_prev, hd_whh, preferred_element_type=jnp.float32)
        gates_h = gates_all[:, 0:GH] + gx_hier[pl.ds(off_h, Bp), :]
        gates_d = gates_all[:, GH:GH + GD] + gx_da[pl.ds(off_d, Bp), :]
        h_h, c_h = cell(gates_h, c_prev[:, 0:HH], HH)
        h_d, c_d = cell(gates_d, c_prev[:, HH:HH + DH], DH)
        # Freeze a chain once its sequence is exhausted (scalar predicate).
        live_h = t < N_UTTS
        live_d = t < T_da
        h_h = jnp.where(live_h, h_h, h_prev[:, 0:HH])
        c_h = jnp.where(live_h, c_h, c_prev[:, 0:HH])
        h_d = jnp.where(live_d, h_d, h_prev[:, HH:HH + DH])
        c_d = jnp.where(live_d, c_d, c_prev[:, HH:HH + DH])
        h_hd[...] = jnp.concatenate([h_h, h_d], axis=1)
        c_hd[...] = jnp.concatenate([c_h, c_d], axis=1)
        return carry

    lax.fori_loop(0, T_hd, hd_step, 0, unroll=True)

    # ---------------- Stage 3: ClassificationNet -----------------------------
    # context = [utterance_enc | hier_enc | da_enc | cand_emb]; instead of a
    # lane concat, split W1 by rows and sum three matmuls.
    utt_last = h_fb[(N_UTTS - 1) * Bp:N_UTTS * Bp, :]        # (Bp, 2*SH)
    hd = h_hd[...]                                           # (Bp, HH+DH)
    cand = cand_ref[...]                                     # (Bp, E)
    CTX0 = 2 * SH
    CTX1 = CTX0 + HH + DH
    hid = (jnp.dot(utt_last, w1_ref[0:CTX0, :], preferred_element_type=jnp.float32)
           + jnp.dot(hd, w1_ref[CTX0:CTX1, :], preferred_element_type=jnp.float32)
           + jnp.dot(cand, w1_ref[CTX1:CTX1 + E, :], preferred_element_type=jnp.float32)
           + b1_ref[...])
    hid = jnp.maximum(hid, 0.0)
    # TODO(synk): nn.Dropout is stochastic at train time; treated as inference-mode identity.
    out_ref[...] = jnp.dot(hid, w2_ref[...], preferred_element_type=jnp.float32)


# ----------------------------------------------------------------------------
# Host wrapper: embedding gathers + layout, then ONE pallas_call.
# ----------------------------------------------------------------------------
def dst_forward(params, utt_idxs, da_idxs, cand_idxs):
    utt_emb = params["utt_emb"]
    da_emb_tbl = params["da_emb_tbl"]
    B, N_UTTS, UTT_LEN = utt_idxs.shape
    DA_LEN = da_idxs.shape[2]
    E = utt_emb.shape[1]
    DA_E = da_emb_tbl.shape[1]
    SH = params["sent_whh_blk"].shape[0] // 2
    HH = params["hier_wih"].shape[1] // 4
    DH = params["da_wih"].shape[1] // 4
    FF_H = params["w1_t"].shape[1]
    S = params["w2_t"].shape[1]

    Bp = _round_up(B, 8)
    Ms = N_UTTS * Bp                      # BiLSTM folded batch, order (utt, batch)
    FF_Hp = _round_up(FF_H, 128)          # lane-dense FFN hidden
    Sp = _round_up(S, 128)                # lane-dense output, unmasked stores

    # --- embedding gathers + time-major layout (small fused XLA gathers) ---
    embs = utt_emb[utt_idxs]                                 # (B, U, L, E)
    embs = jnp.transpose(embs, (2, 1, 0, 3))                 # (L, U, B, E)
    embs = jnp.pad(embs, ((0, 0), (0, 0), (0, Bp - B), (0, 0)))
    x_sent = embs.reshape(UTT_LEN * Ms, E)

    da_e = da_emb_tbl[da_idxs[:, 0, :]]                      # (B, DA_LEN, DA_E)
    da_e = jnp.transpose(da_e, (1, 0, 2))                    # (DA_LEN, B, DA_E)
    da_e = jnp.pad(da_e, ((0, 0), (0, Bp - B), (0, 0)))
    x_da = da_e.reshape(DA_LEN * Bp, DA_E)

    cand = utt_emb[cand_idxs]                                # (B, E)
    cand = jnp.pad(cand, ((0, Bp - B), (0, 0)))

    # --- lane-dense padding of FFN weights (zero cols/rows -> exact result) ---
    w1p = jnp.pad(params["w1_t"], ((0, 0), (0, FF_Hp - FF_H)))
    b1p = jnp.pad(params["b1"], ((0, 0), (0, FF_Hp - FF_H)))
    w2p = jnp.pad(params["w2_t"], ((0, FF_Hp - FF_H), (0, Sp - S)))

    out = pl.pallas_call(
        _dst_fused_kernel,
        out_shape=jax.ShapeDtypeStruct((Bp, Sp), jnp.float32),
        in_specs=[VMEM_SPEC] * 14,
        out_specs=VMEM_SPEC,
        scratch_shapes=[
            pltpu.VMEM((UTT_LEN * Ms, 8 * SH), jnp.float32),   # gx_sent
            pltpu.VMEM((Ms, 2 * SH), jnp.float32),             # h_fb
            pltpu.VMEM((Ms, 2 * SH), jnp.float32),             # c_fb
            pltpu.VMEM((Ms, 4 * HH), jnp.float32),              # gx_hier
            pltpu.VMEM((DA_LEN * Bp, 4 * DH), jnp.float32),     # gx_da
            pltpu.VMEM((Bp, HH + DH), jnp.float32),             # h_hd
            pltpu.VMEM((Bp, HH + DH), jnp.float32),             # c_hd
        ],
    )(x_sent, params["sent_wih"], params["sent_whh_blk"], params["sent_b"],
      x_da, params["hier_wih"], params["hier_b"],
      params["da_wih"], params["da_b"], params["hd_whh_blk"],
      cand, w1p, b1p, w2p)
    return out[:B, :S]


# ----------------------------------------------------------------------------
# Deterministic parameter init (PyTorch-style uniform ranges)
# ----------------------------------------------------------------------------
def init_lstm(key, in_dim, hidden):
    k1, k2, k3 = jax.random.split(key, 3)
    s = 1.0 / (hidden ** 0.5)
    w_ih_t = jax.random.uniform(k1, (in_dim, 4 * hidden), jnp.float32, -s, s)
    w_hh_t = jax.random.uniform(k2, (hidden, 4 * hidden), jnp.float32, -s, s)
    bias = jax.random.uniform(k3, (1, 4 * hidden), jnp.float32, -s, s)  # b_ih + b_hh folded
    return w_ih_t, w_hh_t, bias


if __name__ == "__main__":
    # Model hyper-params (small, consistent with DST.__init__)
    EMBED = 32          # embed_dim
    SH = 32             # sentence_hidden_dim
    HH = 32             # hierarchial_hidden_dim
    DA_E = 16           # da_embed_size
    DH = 32             # da_hidden_dim
    FF_H = 64           # ff_hidden_dim
    NUM_SLOTS = 8
    BATCH = 2           # number of (turn, candidate) pairs
    N_UTTS = 3          # past utterances per turn
    UTT_LEN = 6         # tokens per utterance
    DA_LEN = 5          # dialogue-act sequence length
    UTT_VOCAB = 50
    DA_VOCAB = 20
    CTX_DIM = 2 * SH + HH + DH + EMBED   # context_cand_dim

    key = jax.random.PRNGKey(0)
    keys = jax.random.split(key, 12)

    # Embedding tables (stand-ins for Embeddings(embed_dim, vocab))
    utt_emb = jax.random.normal(keys[0], (UTT_VOCAB, EMBED), jnp.float32)
    da_emb_tbl = jax.random.normal(keys[1], (DA_VOCAB, DA_E), jnp.float32)

    # LSTM parameters
    sent_fwd = init_lstm(keys[2], EMBED, SH)       # SentenceBiLSTM forward dir
    sent_bwd = init_lstm(keys[3], EMBED, SH)       # SentenceBiLSTM backward dir
    hier_lstm = init_lstm(keys[4], 2 * SH, HH)     # HierarchicalLSTM
    da_lstm = init_lstm(keys[5], DA_E, DH)         # DialogueActsLSTM

    # ClassificationNet parameters
    s1 = 1.0 / (CTX_DIM ** 0.5)
    s2 = 1.0 / (FF_H ** 0.5)
    w1_t = jax.random.uniform(keys[6], (CTX_DIM, FF_H), jnp.float32, -s1, s1)
    b1 = jax.random.uniform(keys[7], (1, FF_H), jnp.float32, -s1, s1)
    w2_t = jax.random.uniform(keys[8], (FF_H, NUM_SLOTS), jnp.float32, -s2, s2)

    params = {
        "utt_emb": utt_emb,
        "da_emb_tbl": da_emb_tbl,
        # SentenceBiLSTM: input weights / biases of both directions concatenated
        # along the gate (lane) axis; recurrent weights block-diagonalized so
        # fwd+bwd gates come from one 256-lane matmul per step.
        "sent_wih": jnp.concatenate([sent_fwd[0], sent_bwd[0]], axis=1),   # (E, 8*SH)
        "sent_whh_blk": _block_diag(sent_fwd[1], sent_bwd[1]),             # (2*SH, 8*SH)
        "sent_b": jnp.concatenate([sent_fwd[2], sent_bwd[2]], axis=1),     # (1, 8*SH)
        # Hierarchical + DialogueActs LSTMs: input weights kept separate (they
        # project different inputs), recurrent weights block-diagonalized so the
        # two independent chains share one 256-lane matmul per step.
        "hier_wih": hier_lstm[0],                                          # (2*SH, 4*HH)
        "hier_b": hier_lstm[2],                                            # (1, 4*HH)
        "da_wih": da_lstm[0],                                              # (DA_E, 4*DH)
        "da_b": da_lstm[2],                                                # (1, 4*DH)
        "hd_whh_blk": _block_diag(hier_lstm[1], da_lstm[1]),               # (HH+DH, 4*(HH+DH))
        # ClassificationNet
        "w1_t": w1_t,
        "b1": b1,
        "w2_t": w2_t,
    }

    # Synthetic token-index inputs (replace Vocab.to_idxs_tensor / JSON vocabs)
    utt_idxs = jax.random.randint(keys[9], (BATCH, N_UTTS, UTT_LEN), 0, UTT_VOCAB)
    da_idxs = jax.random.randint(keys[10], (BATCH, 1, DA_LEN), 0, DA_VOCAB)
    cand_idxs = jax.random.randint(keys[11], (BATCH,), 0, UTT_VOCAB)

    out = jax.jit(dst_forward)(params, utt_idxs, da_idxs, cand_idxs)
    out = jax.block_until_ready(out)                        # (B, NUM_SLOTS)

    assert out.shape == (BATCH, NUM_SLOTS)
    assert bool(jnp.all(jnp.isfinite(out)))
    print("KERNEL_OK")
</pallas_src>

<mosaic_0001>
module attributes {stable_mosaic.version = 11 : i64} {
  func.func @_dst_fused_kernel(%arg0: memref<144x32xf32, #tpu.memory_space<vmem>>, %arg1: memref<32x256xf32, #tpu.memory_space<vmem>>, %arg2: memref<64x256xf32, #tpu.memory_space<vmem>>, %arg3: memref<1x256xf32, #tpu.memory_space<vmem>>, %arg4: memref<40x16xf32, #tpu.memory_space<vmem>>, %arg5: memref<64x128xf32, #tpu.memory_space<vmem>>, %arg6: memref<1x128xf32, #tpu.memory_space<vmem>>, %arg7: memref<16x128xf32, #tpu.memory_space<vmem>>, %arg8: memref<1x128xf32, #tpu.memory_space<vmem>>, %arg9: memref<64x256xf32, #tpu.memory_space<vmem>>, %arg10: memref<8x32xf32, #tpu.memory_space<vmem>>, %arg11: memref<160x128xf32, #tpu.memory_space<vmem>>, %arg12: memref<1x128xf32, #tpu.memory_space<vmem>>, %arg13: memref<128x128xf32, #tpu.memory_space<vmem>>, %arg14: memref<8x128xf32, #tpu.memory_space<vmem>>, %arg15: memref<144x256xf32, #tpu.memory_space<vmem>>, %arg16: memref<24x64xf32, #tpu.memory_space<vmem>>, %arg17: memref<24x64xf32, #tpu.memory_space<vmem>>, %arg18: memref<24x128xf32, #tpu.memory_space<vmem>>, %arg19: memref<40x128xf32, #tpu.memory_space<vmem>>, %arg20: memref<8x64xf32, #tpu.memory_space<vmem>>, %arg21: memref<8x64xf32, #tpu.memory_space<vmem>>) attributes {dimension_semantics = [], scalar_prefetch = 0 : i64, scratch_operands = 7 : i64, tpu.core_type = #tpu.core_type<tc>} {
    %c0 = arith.constant 0 : index
    %c0_0 = arith.constant 0 : index
    %0 = vector.load %arg0[%c0, %c0_0] : memref<144x32xf32, #tpu.memory_space<vmem>>, vector<144x32xf32>
    %c0_1 = arith.constant 0 : index
    %c0_2 = arith.constant 0 : index
    %1 = vector.load %arg1[%c0_1, %c0_2] : memref<32x256xf32, #tpu.memory_space<vmem>>, vector<32x256xf32>
    %cst = arith.constant dense<0.000000e+00> : vector<144x256xf32>
    %2 = tpu.matmul %0, %1, %cst {dimension_numbers = #tpu.dot_dimension_numbers<[1], [0], [0], [1], [0, 0, 1, 1], [], []>} : vector<144x32xf32>, vector<32x256xf32>, vector<144x256xf32> -> vector<144x256xf32>
    %c0_3 = arith.constant 0 : index
    %c0_4 = arith.constant 0 : index
    %3 = vector.load %arg3[%c0_3, %c0_4] : memref<1x256xf32, #tpu.memory_space<vmem>>, vector<1x256xf32>
    %4 = vector.broadcast %3 : vector<1x256xf32> to vector<144x256xf32>
    %5 = arith.addf %2, %4 : vector<144x256xf32>
    %c0_5 = arith.constant 0 : index
    %c0_6 = arith.constant 0 : index
    %6 = vector.load %arg15[%c0_5, %c0_6] : memref<144x256xf32, #tpu.memory_space<vmem>>, vector<144x256xf32>
    tpu.vector_store %arg15[%c0_5, %c0_6], %5 {strides = array<i32>} : memref<144x256xf32, #tpu.memory_space<vmem>>, vector<144x256xf32>,
    %c0_7 = arith.constant 0 : index
    %c0_8 = arith.constant 0 : index
    %7 = vector.load %arg2[%c0_7, %c0_8] : memref<64x256xf32, #tpu.memory_space<vmem>>, vector<64x256xf32>
    %cst_9 = arith.constant 0.000000e+00 : f32
    %8 = vector.broadcast %cst_9 : f32 to vector<24x64xf32>
    %c0_10 = arith.constant 0 : index
    %c0_11 = arith.constant 0 : index
    %9 = vector.load %arg16[%c0_10, %c0_11] : memref<24x64xf32, #tpu.memory_space<vmem>>, vector<24x64xf32>
    tpu.vector_store %arg16[%c0_10, %c0_11], %8 {strides = array<i32>} : memref<24x64xf32, #tpu.memory_space<vmem>>, vector<24x64xf32>,
    %cst_12 = arith.constant 0.000000e+00 : f32
    %10 = vector.broadcast %cst_12 : f32 to vector<24x64xf32>
    %c0_13 = arith.constant 0 : index
    %c0_14 = arith.constant 0 : index
    %11 = vector.load %arg17[%c0_13, %c0_14] : memref<24x64xf32, #tpu.memory_space<vmem>>, vector<24x64xf32>
    tpu.vector_store %arg17[%c0_13, %c0_14], %10 {strides = array<i32>} : memref<24x64xf32, #tpu.memory_space<vmem>>, vector<24x64xf32>,
    %c0_i32 = arith.constant 0 : i32
    %c24_i32 = arith.constant 24 : i32
    %12 = arith.muli %c0_i32, %c24_i32 : i32
    %13 = tpu.assume_multiple %12, 24 : i32
    %c5_i32 = arith.constant 5 : i32
    %14 = arith.subi %c5_i32, %c0_i32 : i32
    %c24_i32_15 = arith.constant 24 : i32
    %15 = arith.muli %14, %c24_i32_15 : i32
    %16 = tpu.assume_multiple %15, 24 : i32
    %c0_16 = arith.constant 0 : index
    %c0_17 = arith.constant 0 : index
    %17 = vector.load %arg16[%c0_16, %c0_17] : memref<24x64xf32, #tpu.memory_space<vmem>>, vector<24x64xf32>
    %c0_18 = arith.constant 0 : index
    %c0_19 = arith.constant 0 : index
    %18 = vector.load %arg17[%c0_18, %c0_19] : memref<24x64xf32, #tpu.memory_space<vmem>>, vector<24x64xf32>
    %cst_20 = arith.constant dense<0.000000e+00> : vector<24x256xf32>
    %19 = tpu.matmul %17, %7, %cst_20 {dimension_numbers = #tpu.dot_dimension_numbers<[1], [0], [0], [1], [0, 0, 1, 1], [], []>} : vector<24x64xf32>, vector<64x256xf32>, vector<24x256xf32> -> vector<24x256xf32>
    %20 = vector.extract_strided_slice %19 {offsets = [0, 0], sizes = [24, 128], strides = [1, 1]} : vector<24x256xf32> to vector<24x128xf32>
    %21 = arith.index_cast %13 : i32 to index
    %c0_21 = arith.constant 0 : index
    %22 = vector.load %arg15[%21, %c0_21] : memref<144x256xf32, #tpu.memory_space<vmem>>, vector<24x128xf32>
    %23 = arith.addf %20, %22 : vector<24x128xf32>
    %24 = vector.extract_strided_slice %19 {offsets = [0, 128], sizes = [24, 128], strides = [1, 1]} : vector<24x256xf32> to vector<24x128xf32>
    %25 = arith.index_cast %16 : i32 to index
    %c128 = arith.constant 128 : index
    %26 = vector.load %arg15[%25, %c128] : memref<144x256xf32, #tpu.memory_space<vmem>>, vector<24x128xf32>
    %27 = arith.addf %24, %26 : vector<24x128xf32>
    %28 = vector.extract_strided_slice %18 {offsets = [0, 0], sizes = [24, 32], strides = [1, 1]} : vector<24x64xf32> to vector<24x32xf32>
    %29 = arith.negf %23 : vector<24x128xf32>
    %30 = math.exp %29 : vector<24x128xf32>
    %cst_22 = arith.constant 1.000000e+00 : f32
    %31 = vector.broadcast %cst_22 : f32 to vector<24x128xf32>
    %32 = arith.addf %31, %30 : vector<24x128xf32>
    %33 = arith.divf %31, %32 : vector<24x128xf32>
    %34 = math.tanh %23 : vector<24x128xf32>
    %35 = vector.extract_strided_slice %33 {offsets = [0, 0], sizes = [24, 32], strides = [1, 1]} : vector<24x128xf32> to vector<24x32xf32>
    %36 = vector.extract_strided_slice %33 {offsets = [0, 32], sizes = [24, 32], strides = [1, 1]} : vector<24x128xf32> to vector<24x32xf32>
    %37 = vector.extract_strided_slice %34 {offsets = [0, 64], sizes = [24, 32], strides = [1, 1]} : vector<24x128xf32> to vector<24x32xf32>
    %38 = vector.extract_strided_slice %33 {offsets = [0, 96], sizes = [24, 32], strides = [1, 1]} : vector<24x128xf32> to vector<24x32xf32>
    %39 = arith.mulf %36, %28 : vector<24x32xf32>
    %40 = arith.mulf %35, %37 : vector<24x32xf32>
    %41 = arith.addf %39, %40 : vector<24x32xf32>
    %42 = math.tanh %41 : vector<24x32xf32>
    %43 = arith.mulf %38, %42 : vector<24x32xf32>
    %44 = vector.extract_strided_slice %18 {offsets = [0, 32], sizes = [24, 32], strides = [1, 1]} : vector<24x64xf32> to vector<24x32xf32>
    %45 = arith.negf %27 : vector<24x128xf32>
    %46 = math.exp %45 : vector<24x128xf32>
    %cst_23 = arith.constant 1.000000e+00 : f32
    %47 = vector.broadcast %cst_23 : f32 to vector<24x128xf32>
    %48 = arith.addf %47, %46 : vector<24x128xf32>
    %49 = arith.divf %47, %48 : vector<24x128xf32>
    %50 = math.tanh %27 : vector<24x128xf32>
    %51 = vector.extract_strided_slice %49 {offsets = [0, 0], sizes = [24, 32], strides = [1, 1]} : vector<24x128xf32> to vector<24x32xf32>
    %52 = vector.extract_strided_slice %49 {offsets = [0, 32], sizes = [24, 32], strides = [1, 1]} : vector<24x128xf32> to vector<24x32xf32>
    %53 = vector.extract_strided_slice %50 {offsets = [0, 64], sizes = [24, 32], strides = [1, 1]} : vector<24x128xf32> to vector<24x32xf32>
    %54 = vector.extract_strided_slice %49 {offsets = [0, 96], sizes = [24, 32], strides = [1, 1]} : vector<24x128xf32> to vector<24x32xf32>
    %55 = arith.mulf %52, %44 : vector<24x32xf32>
    %56 = arith.mulf %51, %53 : vector<24x32xf32>
    %57 = arith.addf %55, %56 : vector<24x32xf32>
    %58 = math.tanh %57 : vector<24x32xf32>
    %59 = arith.mulf %54, %58 : vector<24x32xf32>
    %60 = tpu.concatenate %43, %59 in 1 : vector<24x32xf32>, vector<24x32xf32> -> vector<24x64xf32>
    %c0_24 = arith.constant 0 : index
    %c0_25 = arith.constant 0 : index
    %61 = vector.load %arg16[%c0_24, %c0_25] : memref<24x64xf32, #tpu.memory_space<vmem>>, vector<24x64xf32>
    tpu.vector_store %arg16[%c0_24, %c0_25], %60 {strides = array<i32>} : memref<24x64xf32, #tpu.memory_space<vmem>>, vector<24x64xf32>,
    %62 = tpu.concatenate %41, %57 in 1 : vector<24x32xf32>, vector<24x32xf32> -> vector<24x64xf32>
    %c0_26 = arith.constant 0 : index
    %c0_27 = arith.constant 0 : index
    %63 = vector.load %arg17[%c0_26, %c0_27] : memref<24x64xf32, #tpu.memory_space<vmem>>, vector<24x64xf32>
    tpu.vector_store %arg17[%c0_26, %c0_27], %62 {strides = array<i32>} : memref<24x64xf32, #tpu.memory_space<vmem>>, vector<24x64xf32>,
    %c1_i32 = arith.constant 1 : i32
    %c24_i32_28 = arith.constant 24 : i32
    %64 = arith.muli %c1_i32, %c24_i32_28 : i32
    %65 = tpu.assume_multiple %64, 24 : i32
    %c5_i32_29 = arith.constant 5 : i32
    %66 = arith.subi %c5_i32_29, %c1_i32 : i32
    %c24_i32_30 = arith.constant 24 : i32
    %67 = arith.muli %66, %c24_i32_30 : i32
    %68 = tpu.assume_multiple %67, 24 : i32
    %c0_31 = arith.constant 0 : index
    %c0_32 = arith.constant 0 : index
    %69 = vector.load %arg16[%c0_31, %c0_32] : memref<24x64xf32, #tpu.memory_space<vmem>>, vector<24x64xf32>
    %c0_33 = arith.constant 0 : index
    %c0_34 = arith.constant 0 : index
    %70 = vector.load %arg17[%c0_33, %c0_34] : memref<24x64xf32, #tpu.memory_space<vmem>>, vector<24x64xf32>
    %cst_35 = arith.constant dense<0.000000e+00> : vector<24x256xf32>
    %71 = tpu.matmul %69, %7, %cst_35 {dimension_numbers = #tpu.dot_dimension_numbers<[1], [0], [0], [1], [0, 0, 1, 1], [], []>} : vector<24x64xf32>, vector<64x256xf32>, vector<24x256xf32> -> vector<24x256xf32>
    %72 = vector.extract_strided_slice %71 {offsets = [0, 0], sizes = [24, 128], strides = [1, 1]} : vector<24x256xf32> to vector<24x128xf32>
    %73 = arith.index_cast %65 : i32 to index
    %c0_36 = arith.constant 0 : index
    %74 = vector.load %arg15[%73, %c0_36] : memref<144x256xf32, #tpu.memory_space<vmem>>, vector<24x128xf32>
    %75 = arith.addf %72, %74 : vector<24x128xf32>
    %76 = vector.extract_strided_slice %71 {offsets = [0, 128], sizes = [24, 128], strides = [1, 1]} : vector<24x256xf32> to vector<24x128xf32>
    %77 = arith.index_cast %68 : i32 to index
    %c128_37 = arith.constant 128 : index
    %78 = vector.load %arg15[%77, %c128_37] : memref<144x256xf32, #tpu.memory_space<vmem>>, vector<24x128xf32>
    %79 = arith.addf %76, %78 : vector<24x128xf32>
    %80 = vector.extract_strided_slice %70 {offsets = [0, 0], sizes = [24, 32], strides = [1, 1]} : vector<24x64xf32> to vector<24x32xf32>
    %81 = arith.negf %75 : vector<24x128xf32>
    %82 = math.exp %81 : vector<24x128xf32>
    %cst_38 = arith.constant 1.000000e+00 : f32
    %83 = vector.broadcast %cst_38 : f32 to vector<24x128xf32>
    %84 = arith.addf %83, %82 : vector<24x128xf32>
    %85 = arith.divf %83, %84 : vector<24x128xf32>
    %86 = math.tanh %75 : vector<24x128xf32>
    %87 = vector.extract_strided_slice %85 {offsets = [0, 0], sizes = [24, 32], strides = [1, 1]} : vector<24x128xf32> to vector<24x32xf32>
    %88 = vector.extract_strided_slice %85 {offsets = [0, 32], sizes = [24, 32], strides = [1, 1]} : vector<24x128xf32> to vector<24x32xf32>
    %89 = vector.extract_strided_slice %86 {offsets = [0, 64], sizes = [24, 32], strides = [1, 1]} : vector<24x128xf32> to vector<24x32xf32>
    %90 = vector.extract_strided_slice %85 {offsets = [0, 96], sizes = [24, 32], strides = [1, 1]} : vector<24x128xf32> to vector<24x32xf32>
    %91 = arith.mulf %88, %80 : vector<24x32xf32>
    %92 = arith.mulf %87, %89 : vector<24x32xf32>
    %93 = arith.addf %91, %92 : vector<24x32xf32>
    %94 = math.tanh %93 : vector<24x32xf32>
    %95 = arith.mulf %90, %94 : vector<24x32xf32>
    %96 = vector.extract_strided_slice %70 {offsets = [0, 32], sizes = [24, 32], strides = [1, 1]} : vector<24x64xf32> to vector<24x32xf32>
    %97 = arith.negf %79 : vector<24x128xf32>
    %98 = math.exp %97 : vector<24x128xf32>
    %cst_39 = arith.constant 1.000000e+00 : f32
    %99 = vector.broadcast %cst_39 : f32 to vector<24x128xf32>
    %100 = arith.addf %99, %98 : vector<24x128xf32>
    %101 = arith.divf %99, %100 : vector<24x128xf32>
    %102 = math.tanh %79 : vector<24x128xf32>
    %103 = vector.extract_strided_slice %101 {offsets = [0, 0], sizes = [24, 32], strides = [1, 1]} : vector<24x128xf32> to vector<24x32xf32>
    %104 = vector.extract_strided_slice %101 {offsets = [0, 32], sizes = [24, 32], strides = [1, 1]} : vector<24x128xf32> to vector<24x32xf32>
    %105 = vector.extract_strided_slice %102 {offsets = [0, 64], sizes = [24, 32], strides = [1, 1]} : vector<24x128xf32> to vector<24x32xf32>
    %106 = vector.extract_strided_slice %101 {offsets = [0, 96], sizes = [24, 32], strides = [1, 1]} : vector<24x128xf32> to vector<24x32xf32>
    %107 = arith.mulf %104, %96 : vector<24x32xf32>
    %108 = arith.mulf %103, %105 : vector<24x32xf32>
    %109 = arith.addf %107, %108 : vector<24x32xf32>
    %110 = math.tanh %109 : vector<24x32xf32>
    %111 = arith.mulf %106, %110 : vector<24x32xf32>
    %112 = tpu.concatenate %95, %111 in 1 : vector<24x32xf32>, vector<24x32xf32> -> vector<24x64xf32>
    %c0_40 = arith.constant 0 : index
    %c0_41 = arith.constant 0 : index
    %113 = vector.load %arg16[%c0_40, %c0_41] : memref<24x64xf32, #tpu.memory_space<vmem>>, vector<24x64xf32>
    tpu.vector_store %arg16[%c0_40, %c0_41], %112 {strides = array<i32>} : memref<24x64xf32, #tpu.memory_space<vmem>>, vector<24x64xf32>,
    %114 = tpu.concatenate %93, %109 in 1 : vector<24x32xf32>, vector<24x32xf32> -> vector<24x64xf32>
    %c0_42 = arith.constant 0 : index
    %c0_43 = arith.constant 0 : index
    %115 = vector.load %arg17[%c0_42, %c0_43] : memref<24x64xf32, #tpu.memory_space<vmem>>, vector<24x64xf32>
    tpu.vector_store %arg17[%c0_42, %c0_43], %114 {strides = array<i32>} : memref<24x64xf32, #tpu.memory_space<vmem>>, vector<24x64xf32>,
    %c2_i32 = arith.constant 2 : i32
    %c24_i32_44 = arith.constant 24 : i32
    %116 = arith.muli %c2_i32, %c24_i32_44 : i32
    %117 = tpu.assume_multiple %116, 24 : i32
    %c5_i32_45 = arith.constant 5 : i32
    %118 = arith.subi %c5_i32_45, %c2_i32 : i32
    %c24_i32_46 = arith.constant 24 : i32
    %119 = arith.muli %118, %c24_i32_46 : i32
    %120 = tpu.assume_multiple %119, 24 : i32
    %c0_47 = arith.constant 0 : index
    %c0_48 = arith.constant 0 : index
    %121 = vector.load %arg16[%c0_47, %c0_48] : memref<24x64xf32, #tpu.memory_space<vmem>>, vector<24x64xf32>
    %c0_49 = arith.constant 0 : index
    %c0_50 = arith.constant 0 : index
    %122 = vector.load %arg17[%c0_49, %c0_50] : memref<24x64xf32, #tpu.memory_space<vmem>>, vector<24x64xf32>
    %cst_51 = arith.constant dense<0.000000e+00> : vector<24x256xf32>
    %123 = tpu.matmul %121, %7, %cst_51 {dimension_numbers = #tpu.dot_dimension_numbers<[1], [0], [0], [1], [0, 0, 1, 1], [], []>} : vector<24x64xf32>, vector<64x256xf32>, vector<24x256xf32> -> vector<24x256xf32>
    %124 = vector.extract_strided_slice %123 {offsets = [0, 0], sizes = [24, 128], strides = [1, 1]} : vector<24x256xf32> to vector<24x128xf32>
    %125 = arith.index_cast %117 : i32 to index
    %c0_52 = arith.constant 0 : index
    %126 = vector.load %arg15[%125, %c0_52] : memref<144x256xf32, #tpu.memory_space<vmem>>, vector<24x128xf32>
    %127 = arith.addf %124, %126 : vector<24x128xf32>
    %128 = vector.extract_strided_slice %123 {offsets = [0, 128], sizes = [24, 128], strides = [1, 1]} : vector<24x256xf32> to vector<24x128xf32>
    %129 = arith.index_cast %120 : i32 to index
    %c128_53 = arith.constant 128 : index
    %130 = vector.load %arg15[%129, %c128_53] : memref<144x256xf32, #tpu.memory_space<vmem>>, vector<24x128xf32>
    %131 = arith.addf %128, %130 : vector<24x128xf32>
    %132 = vector.extract_strided_slice %122 {offsets = [0, 0], sizes = [24, 32], strides = [1, 1]} : vector<24x64xf32> to vector<24x32xf32>
    %133 = arith.negf %127 : vector<24x128xf32>
    %134 = math.exp %133 : vector<24x128xf32>
    %cst_54 = arith.constant 1.000000e+00 : f32
    %135 = vector.broadcast %cst_54 : f32 to vector<24x128xf32>
    %136 = arith.addf %135, %134 : vector<24x128xf32>
    %137 = arith.divf %135, %136 : vector<24x128xf32>
    %138 = math.tanh %127 : vector<24x128xf32>
    %139 = vector.extract_strided_slice %137 {offsets = [0, 0], sizes = [24, 32], strides = [1, 1]} : vector<24x128xf32> to vector<24x32xf32>
    %140 = vector.extract_strided_slice %137 {offsets = [0, 32], sizes = [24, 32], strides = [1, 1]} : vector<24x128xf32> to vector<24x32xf32>
    %141 = vector.extract_strided_slice %138 {offsets = [0, 64], sizes = [24, 32], strides = [1, 1]} : vector<24x128xf32> to vector<24x32xf32>
    %142 = vector.extract_strided_slice %137 {offsets = [0, 96], sizes = [24, 32], strides = [1, 1]} : vector<24x128xf32> to vector<24x32xf32>
    %143 = arith.mulf %140, %132 : vector<24x32xf32>
    %144 = arith.mulf %139, %141 : vector<24x32xf32>
    %145 = arith.addf %143, %144 : vector<24x32xf32>
    %146 = math.tanh %145 : vector<24x32xf32>
    %147 = arith.mulf %142, %146 : vector<24x32xf32>
    %148 = vector.extract_strided_slice %122 {offsets = [0, 32], sizes = [24, 32], strides = [1, 1]} : vector<24x64xf32> to vector<24x32xf32>
    %149 = arith.negf %131 : vector<24x128xf32>
    %150 = math.exp %149 : vector<24x128xf32>
    %cst_55 = arith.constant 1.000000e+00 : f32
    %151 = vector.broadcast %cst_55 : f32 to vector<24x128xf32>
    %152 = arith.addf %151, %150 : vector<24x128xf32>
    %153 = arith.divf %151, %152 : vector<24x128xf32>
    %154 = math.tanh %131 : vector<24x128xf32>
    %155 = vector.extract_strided_slice %153 {offsets = [0, 0], sizes = [24, 32], strides = [1, 1]} : vector<24x128xf32> to vector<24x32xf32>
    %156 = vector.extract_strided_slice %153 {offsets = [0, 32], sizes = [24, 32], strides = [1, 1]} : vector<24x128xf32> to vector<24x32xf32>
    %157 = vector.extract_strided_slice %154 {offsets = [0, 64], sizes = [24, 32], strides = [1, 1]} : vector<24x128xf32> to vector<24x32xf32>
    %158 = vector.extract_strided_slice %153 {offsets = [0, 96], sizes = [24, 32], strides = [1, 1]} : vector<24x128xf32> to vector<24x32xf32>
    %159 = arith.mulf %156, %148 : vector<24x32xf32>
    %160 = arith.mulf %155, %157 : vector<24x32xf32>
    %161 = arith.addf %159, %160 : vector<24x32xf32>
    %162 = math.tanh %161 : vector<24x32xf32>
    %163 = arith.mulf %158, %162 : vector<24x32xf32>
    %164 = tpu.concatenate %147, %163 in 1 : vector<24x32xf32>, vector<24x32xf32> -> vector<24x64xf32>
    %c0_56 = arith.constant 0 : index
    %c0_57 = arith.constant 0 : index
    %165 = vector.load %arg16[%c0_56, %c0_57] : memref<24x64xf32, #tpu.memory_space<vmem>>, vector<24x64xf32>
    tpu.vector_store %arg16[%c0_56, %c0_57], %164 {strides = array<i32>} : memref<24x64xf32, #tpu.memory_space<vmem>>, vector<24x64xf32>,
    %166 = tpu.concatenate %145, %161 in 1 : vector<24x32xf32>, vector<24x32xf32> -> vector<24x64xf32>
    %c0_58 = arith.constant 0 : index
    %c0_59 = arith.constant 0 : index
    %167 = vector.load %arg17[%c0_58, %c0_59] : memref<24x64xf32, #tpu.memory_space<vmem>>, vector<24x64xf32>
    tpu.vector_store %arg17[%c0_58, %c0_59], %166 {strides = array<i32>} : memref<24x64xf32, #tpu.memory_space<vmem>>, vector<24x64xf32>,
    %c3_i32 = arith.constant 3 : i32
    %c24_i32_60 = arith.constant 24 : i32
    %168 = arith.muli %c3_i32, %c24_i32_60 : i32
    %169 = tpu.assume_multiple %168, 24 : i32
    %c5_i32_61 = arith.constant 5 : i32
    %170 = arith.subi %c5_i32_61, %c3_i32 : i32
    %c24_i32_62 = arith.constant 24 : i32
    %171 = arith.muli %170, %c24_i32_62 : i32
    %172 = tpu.assume_multiple %171, 24 : i32
    %c0_63 = arith.constant 0 : index
    %c0_64 = arith.constant 0 : index
    %173 = vector.load %arg16[%c0_63, %c0_64] : memref<24x64xf32, #tpu.memory_space<vmem>>, vector<24x64xf32>
    %c0_65 = arith.constant 0 : index
    %c0_66 = arith.constant 0 : index
    %174 = vector.load %arg17[%c0_65, %c0_66] : memref<24x64xf32, #tpu.memory_space<vmem>>, vector<24x64xf32>
    %cst_67 = arith.constant dense<0.000000e+00> : vector<24x256xf32>
    %175 = tpu.matmul %173, %7, %cst_67 {dimension_numbers = #tpu.dot_dimension_numbers<[1], [0], [0], [1], [0, 0, 1, 1], [], []>} : vector<24x64xf32>, vector<64x256xf32>, vector<24x256xf32> -> vector<24x256xf32>
    %176 = vector.extract_strided_slice %175 {offsets = [0, 0], sizes = [24, 128], strides = [1, 1]} : vector<24x256xf32> to vector<24x128xf32>
    %177 = arith.index_cast %169 : i32 to index
    %c0_68 = arith.constant 0 : index
    %178 = vector.load %arg15[%177, %c0_68] : memref<144x256xf32, #tpu.memory_space<vmem>>, vector<24x128xf32>
    %179 = arith.addf %176, %178 : vector<24x128xf32>
    %180 = vector.extract_strided_slice %175 {offsets = [0, 128], sizes = [24, 128], strides = [1, 1]} : vector<24x256xf32> to vector<24x128xf32>
    %181 = arith.index_cast %172 : i32 to index
    %c128_69 = arith.constant 128 : index
    %182 = vector.load %arg15[%181, %c128_69] : memref<144x256xf32, #tpu.memory_space<vmem>>, vector<24x128xf32>
    %183 = arith.addf %180, %182 : vector<24x128xf32>
    %184 = vector.extract_strided_slice %174 {offsets = [0, 0], sizes = [24, 32], strides = [1, 1]} : vector<24x64xf32> to vector<24x32xf32>
    %185 = arith.negf %179 : vector<24x128xf32>
    %186 = math.exp %185 : vector<24x128xf32>
    %cst_70 = arith.constant 1.000000e+00 : f32
    %187 = vector.broadcast %cst_70 : f32 to vector<24x128xf32>
    %188 = arith.addf %187, %186 : vector<24x128xf32>
    %189 = arith.divf %187, %188 : vector<24x128xf32>
    %190 = math.tanh %179 : vector<24x128xf32>
    %191 = vector.extract_strided_slice %189 {offsets = [0, 0], sizes = [24, 32], strides = [1, 1]} : vector<24x128xf32> to vector<24x32xf32>
    %192 = vector.extract_strided_slice %189 {offsets = [0, 32], sizes = [24, 32], strides = [1, 1]} : vector<24x128xf32> to vector<24x32xf32>
    %193 = vector.extract_strided_slice %190 {offsets = [0, 64], sizes = [24, 32], strides = [1, 1]} : vector<24x128xf32> to vector<24x32xf32>
    %194 = vector.extract_strided_slice %189 {offsets = [0, 96], sizes = [24, 32], strides = [1, 1]} : vector<24x128xf32> to vector<24x32xf32>
    %195 = arith.mulf %192, %184 : vector<24x32xf32>
    %196 = arith.mulf %191, %193 : vector<24x32xf32>
    %197 = arith.addf %195, %196 : vector<24x32xf32>
    %198 = math.tanh %197 : vector<24x32xf32>
    %199 = arith.mulf %194, %198 : vector<24x32xf32>
    %200 = vector.extract_strided_slice %174 {offsets = [0, 32], sizes = [24, 32], strides = [1, 1]} : vector<24x64xf32> to vector<24x32xf32>
    %201 = arith.negf %183 : vector<24x128xf32>
    %202 = math.exp %201 : vector<24x128xf32>
    %cst_71 = arith.constant 1.000000e+00 : f32
    %203 = vector.broadcast %cst_71 : f32 to vector<24x128xf32>
    %204 = arith.addf %203, %202 : vector<24x128xf32>
    %205 = arith.divf %203, %204 : vector<24x128xf32>
    %206 = math.tanh %183 : vector<24x128xf32>
    %207 = vector.extract_strided_slice %205 {offsets = [0, 0], sizes = [24, 32], strides = [1, 1]} : vector<24x128xf32> to vector<24x32xf32>
    %208 = vector.extract_strided_slice %205 {offsets = [0, 32], sizes = [24, 32], strides = [1, 1]} : vector<24x128xf32> to vector<24x32xf32>
    %209 = vector.extract_strided_slice %206 {offsets = [0, 64], sizes = [24, 32], strides = [1, 1]} : vector<24x128xf32> to vector<24x32xf32>
    %210 = vector.extract_strided_slice %205 {offsets = [0, 96], sizes = [24, 32], strides = [1, 1]} : vector<24x128xf32> to vector<24x32xf32>
    %211 = arith.mulf %208, %200 : vector<24x32xf32>
    %212 = arith.mulf %207, %209 : vector<24x32xf32>
    %213 = arith.addf %211, %212 : vector<24x32xf32>
    %214 = math.tanh %213 : vector<24x32xf32>
    %215 = arith.mulf %210, %214 : vector<24x32xf32>
    %216 = tpu.concatenate %199, %215 in 1 : vector<24x32xf32>, vector<24x32xf32> -> vector<24x64xf32>
    %c0_72 = arith.constant 0 : index
    %c0_73 = arith.constant 0 : index
    %217 = vector.load %arg16[%c0_72, %c0_73] : memref<24x64xf32, #tpu.memory_space<vmem>>, vector<24x64xf32>
    tpu.vector_store %arg16[%c0_72, %c0_73], %216 {strides = array<i32>} : memref<24x64xf32, #tpu.memory_space<vmem>>, vector<24x64xf32>,
    %218 = tpu.concatenate %197, %213 in 1 : vector<24x32xf32>, vector<24x32xf32> -> vector<24x64xf32>
    %c0_74 = arith.constant 0 : index
    %c0_75 = arith.constant 0 : index
    %219 = vector.load %arg17[%c0_74, %c0_75] : memref<24x64xf32, #tpu.memory_space<vmem>>, vector<24x64xf32>
    tpu.vector_store %arg17[%c0_74, %c0_75], %218 {strides = array<i32>} : memref<24x64xf32, #tpu.memory_space<vmem>>, vector<24x64xf32>,
    %c4_i32 = arith.constant 4 : i32
    %c24_i32_76 = arith.constant 24 : i32
    %220 = arith.muli %c4_i32, %c24_i32_76 : i32
    %221 = tpu.assume_multiple %220, 24 : i32
    %c5_i32_77 = arith.constant 5 : i32
    %222 = arith.subi %c5_i32_77, %c4_i32 : i32
    %c24_i32_78 = arith.constant 24 : i32
    %223 = arith.muli %222, %c24_i32_78 : i32
    %224 = tpu.assume_multiple %223, 24 : i32
    %c0_79 = arith.constant 0 : index
    %c0_80 = arith.constant 0 : index
    %225 = vector.load %arg16[%c0_79, %c0_80] : memref<24x64xf32, #tpu.memory_space<vmem>>, vector<24x64xf32>
    %c0_81 = arith.constant 0 : index
    %c0_82 = arith.constant 0 : index
    %226 = vector.load %arg17[%c0_81, %c0_82] : memref<24x64xf32, #tpu.memory_space<vmem>>, vector<24x64xf32>
    %cst_83 = arith.constant dense<0.000000e+00> : vector<24x256xf32>
    %227 = tpu.matmul %225, %7, %cst_83 {dimension_numbers = #tpu.dot_dimension_numbers<[1], [0], [0], [1], [0, 0, 1, 1], [], []>} : vector<24x64xf32>, vector<64x256xf32>, vector<24x256xf32> -> vector<24x256xf32>
    %228 = vector.extract_strided_slice %227 {offsets = [0, 0], sizes = [24, 128], strides = [1, 1]} : vector<24x256xf32> to vector<24x128xf32>
    %229 = arith.index_cast %221 : i32 to index
    %c0_84 = arith.constant 0 : index
    %230 = vector.load %arg15[%229, %c0_84] : memref<144x256xf32, #tpu.memory_space<vmem>>, vector<24x128xf32>
    %231 = arith.addf %228, %230 : vector<24x128xf32>
    %232 = vector.extract_strided_slice %227 {offsets = [0, 128], sizes = [24, 128], strides = [1, 1]} : vector<24x256xf32> to vector<24x128xf32>
    %233 = arith.index_cast %224 : i32 to index
    %c128_85 = arith.constant 128 : index
    %234 = vector.load %arg15[%233, %c128_85] : memref<144x256xf32, #tpu.memory_space<vmem>>, vector<24x128xf32>
    %235 = arith.addf %232, %234 : vector<24x128xf32>
    %236 = vector.extract_strided_slice %226 {offsets = [0, 0], sizes = [24, 32], strides = [1, 1]} : vector<24x64xf32> to vector<24x32xf32>
    %237 = arith.negf %231 : vector<24x128xf32>
    %238 = math.exp %237 : vector<24x128xf32>
    %cst_86 = arith.constant 1.000000e+00 : f32
    %239 = vector.broadcast %cst_86 : f32 to vector<24x128xf32>
    %240 = arith.addf %239, %238 : vector<24x128xf32>
    %241 = arith.divf %239, %240 : vector<24x128xf32>
    %242 = math.tanh %231 : vector<24x128xf32>
    %243 = vector.extract_strided_slice %241 {offsets = [0, 0], sizes = [24, 32], strides = [1, 1]} : vector<24x128xf32> to vector<24x32xf32>
    %244 = vector.extract_strided_slice %241 {offsets = [0, 32], sizes = [24, 32], strides = [1, 1]} : vector<24x128xf32> to vector<24x32xf32>
    %245 = vector.extract_strided_slice %242 {offsets = [0, 64], sizes = [24, 32], strides = [1, 1]} : vector<24x128xf32> to vector<24x32xf32>
    %246 = vector.extract_strided_slice %241 {offsets = [0, 96], sizes = [24, 32], strides = [1, 1]} : vector<24x128xf32> to vector<24x32xf32>
    %247 = arith.mulf %244, %236 : vector<24x32xf32>
    %248 = arith.mulf %243, %245 : vector<24x32xf32>
    %249 = arith.addf %247, %248 : vector<24x32xf32>
    %250 = math.tanh %249 : vector<24x32xf32>
    %251 = arith.mulf %246, %250 : vector<24x32xf32>
    %252 = vector.extract_strided_slice %226 {offsets = [0, 32], sizes = [24, 32], strides = [1, 1]} : vector<24x64xf32> to vector<24x32xf32>
    %253 = arith.negf %235 : vector<24x128xf32>
    %254 = math.exp %253 : vector<24x128xf32>
    %cst_87 = arith.constant 1.000000e+00 : f32
    %255 = vector.broadcast %cst_87 : f32 to vector<24x128xf32>
    %256 = arith.addf %255, %254 : vector<24x128xf32>
    %257 = arith.divf %255, %256 : vector<24x128xf32>
    %258 = math.tanh %235 : vector<24x128xf32>
    %259 = vector.extract_strided_slice %257 {offsets = [0, 0], sizes = [24, 32], strides = [1, 1]} : vector<24x128xf32> to vector<24x32xf32>
    %260 = vector.extract_strided_slice %257 {offsets = [0, 32], sizes = [24, 32], strides = [1, 1]} : vector<24x128xf32> to vector<24x32xf32>
    %261 = vector.extract_strided_slice %258 {offsets = [0, 64], sizes = [24, 32], strides = [1, 1]} : vector<24x128xf32> to vector<24x32xf32>
    %262 = vector.extract_strided_slice %257 {offsets = [0, 96], sizes = [24, 32], strides = [1, 1]} : vector<24x128xf32> to vector<24x32xf32>
    %263 = arith.mulf %260, %252 : vector<24x32xf32>
    %264 = arith.mulf %259, %261 : vector<24x32xf32>
    %265 = arith.addf %263, %264 : vector<24x32xf32>
    %266 = math.tanh %265 : vector<24x32xf32>
    %267 = arith.mulf %262, %266 : vector<24x32xf32>
    %268 = tpu.concatenate %251, %267 in 1 : vector<24x32xf32>, vector<24x32xf32> -> vector<24x64xf32>
    %c0_88 = arith.constant 0 : index
    %c0_89 = arith.constant 0 : index
    %269 = vector.load %arg16[%c0_88, %c0_89] : memref<24x64xf32, #tpu.memory_space<vmem>>, vector<24x64xf32>
    tpu.vector_store %arg16[%c0_88, %c0_89], %268 {strides = array<i32>} : memref<24x64xf32, #tpu.memory_space<vmem>>, vector<24x64xf32>,
    %270 = tpu.concatenate %249, %265 in 1 : vector<24x32xf32>, vector<24x32xf32> -> vector<24x64xf32>
    %c0_90 = arith.constant 0 : index
    %c0_91 = arith.constant 0 : index
    %271 = vector.load %arg17[%c0_90, %c0_91] : memref<24x64xf32, #tpu.memory_space<vmem>>, vector<24x64xf32>
    tpu.vector_store %arg17[%c0_90, %c0_91], %270 {strides = array<i32>} : memref<24x64xf32, #tpu.memory_space<vmem>>, vector<24x64xf32>,
    %c5_i32_92 = arith.constant 5 : i32
    %c24_i32_93 = arith.constant 24 : i32
    %272 = arith.muli %c5_i32_92, %c24_i32_93 : i32
    %273 = tpu.assume_multiple %272, 24 : i32
    %c5_i32_94 = arith.constant 5 : i32
    %274 = arith.subi %c5_i32_94, %c5_i32_92 : i32
    %c24_i32_95 = arith.constant 24 : i32
    %275 = arith.muli %274, %c24_i32_95 : i32
    %276 = tpu.assume_multiple %275, 24 : i32
    %c0_96 = arith.constant 0 : index
    %c0_97 = arith.constant 0 : index
    %277 = vector.load %arg16[%c0_96, %c0_97] : memref<24x64xf32, #tpu.memory_space<vmem>>, vector<24x64xf32>
    %c0_98 = arith.constant 0 : index
    %c0_99 = arith.constant 0 : index
    %278 = vector.load %arg17[%c0_98, %c0_99] : memref<24x64xf32, #tpu.memory_space<vmem>>, vector<24x64xf32>
    %cst_100 = arith.constant dense<0.000000e+00> : vector<24x256xf32>
    %279 = tpu.matmul %277, %7, %cst_100 {dimension_numbers = #tpu.dot_dimension_numbers<[1], [0], [0], [1], [0, 0, 1, 1], [], []>} : vector<24x64xf32>, vector<64x256xf32>, vector<24x256xf32> -> vector<24x256xf32>
    %280 = vector.extract_strided_slice %279 {offsets = [0, 0], sizes = [24, 128], strides = [1, 1]} : vector<24x256xf32> to vector<24x128xf32>
    %281 = arith.index_cast %273 : i32 to index
    %c0_101 = arith.constant 0 : index
    %282 = vector.load %arg15[%281, %c0_101] : memref<144x256xf32, #tpu.memory_space<vmem>>, vector<24x128xf32>
    %283 = arith.addf %280, %282 : vector<24x128xf32>
    %284 = vector.extract_strided_slice %279 {offsets = [0, 128], sizes = [24, 128], strides = [1, 1]} : vector<24x256xf32> to vector<24x128xf32>
    %285 = arith.index_cast %276 : i32 to index
    %c128_102 = arith.constant 128 : index
    %286 = vector.load %arg15[%285, %c128_102] : memref<144x256xf32, #tpu.memory_space<vmem>>, vector<24x128xf32>
    %287 = arith.addf %284, %286 : vector<24x128xf32>
    %288 = vector.extract_strided_slice %278 {offsets = [0, 0], sizes = [24, 32], strides = [1, 1]} : vector<24x64xf32> to vector<24x32xf32>
    %289 = arith.negf %283 : vector<24x128xf32>
    %290 = math.exp %289 : vector<24x128xf32>
    %cst_103 = arith.constant 1.000000e+00 : f32
    %291 = vector.broadcast %cst_103 : f32 to vector<24x128xf32>
    %292 = arith.addf %291, %290 : vector<24x128xf32>
    %293 = arith.divf %291, %292 : vector<24x128xf32>
    %294 = math.tanh %283 : vector<24x128xf32>
    %295 = vector.extract_strided_slice %293 {offsets = [0, 0], sizes = [24, 32], strides = [1, 1]} : vector<24x128xf32> to vector<24x32xf32>
    %296 = vector.extract_strided_slice %293 {offsets = [0, 32], sizes = [24, 32], strides = [1, 1]} : vector<24x128xf32> to vector<24x32xf32>
    %297 = vector.extract_strided_slice %294 {offsets = [0, 64], sizes = [24, 32], strides = [1, 1]} : vector<24x128xf32> to vector<24x32xf32>
    %298 = vector.extract_strided_slice %293 {offsets = [0, 96], sizes = [24, 32], strides = [1, 1]} : vector<24x128xf32> to vector<24x32xf32>
    %299 = arith.mulf %296, %288 : vector<24x32xf32>
    %300 = arith.mulf %295, %297 : vector<24x32xf32>
    %301 = arith.addf %299, %300 : vector<24x32xf32>
    %302 = math.tanh %301 : vector<24x32xf32>
    %303 = arith.mulf %298, %302 : vector<24x32xf32>
    %304 = vector.extract_strided_slice %278 {offsets = [0, 32], sizes = [24, 32], strides = [1, 1]} : vector<24x64xf32> to vector<24x32xf32>
    %305 = arith.negf %287 : vector<24x128xf32>
    %306 = math.exp %305 : vector<24x128xf32>
    %cst_104 = arith.constant 1.000000e+00 : f32
    %307 = vector.broadcast %cst_104 : f32 to vector<24x128xf32>
    %308 = arith.addf %307, %306 : vector<24x128xf32>
    %309 = arith.divf %307, %308 : vector<24x128xf32>
    %310 = math.tanh %287 : vector<24x128xf32>
    %311 = vector.extract_strided_slice %309 {offsets = [0, 0], sizes = [24, 32], strides = [1, 1]} : vector<24x128xf32> to vector<24x32xf32>
    %312 = vector.extract_strided_slice %309 {offsets = [0, 32], sizes = [24, 32], strides = [1, 1]} : vector<24x128xf32> to vector<24x32xf32>
    %313 = vector.extract_strided_slice %310 {offsets = [0, 64], sizes = [24, 32], strides = [1, 1]} : vector<24x128xf32> to vector<24x32xf32>
    %314 = vector.extract_strided_slice %309 {offsets = [0, 96], sizes = [24, 32], strides = [1, 1]} : vector<24x128xf32> to vector<24x32xf32>
    %315 = arith.mulf %312, %304 : vector<24x32xf32>
    %316 = arith.mulf %311, %313 : vector<24x32xf32>
    %317 = arith.addf %315, %316 : vector<24x32xf32>
    %318 = math.tanh %317 : vector<24x32xf32>
    %319 = arith.mulf %314, %318 : vector<24x32xf32>
    %320 = tpu.concatenate %303, %319 in 1 : vector<24x32xf32>, vector<24x32xf32> -> vector<24x64xf32>
    %c0_105 = arith.constant 0 : index
    %c0_106 = arith.constant 0 : index
    %321 = vector.load %arg16[%c0_105, %c0_106] : memref<24x64xf32, #tpu.memory_space<vmem>>, vector<24x64xf32>
    tpu.vector_store %arg16[%c0_105, %c0_106], %320 {strides = array<i32>} : memref<24x64xf32, #tpu.memory_space<vmem>>, vector<24x64xf32>,
    %322 = tpu.concatenate %301, %317 in 1 : vector<24x32xf32>, vector<24x32xf32> -> vector<24x64xf32>
    %c0_107 = arith.constant 0 : index
    %c0_108 = arith.constant 0 : index
    %323 = vector.load %arg17[%c0_107, %c0_108] : memref<24x64xf32, #tpu.memory_space<vmem>>, vector<24x64xf32>
    tpu.vector_store %arg17[%c0_107, %c0_108], %322 {strides = array<i32>} : memref<24x64xf32, #tpu.memory_space<vmem>>, vector<24x64xf32>,
    %c6_i32 = arith.constant 6 : i32
    %c0_109 = arith.constant 0 : index
    %c0_110 = arith.constant 0 : index
    %324 = vector.load %arg16[%c0_109, %c0_110] : memref<24x64xf32, #tpu.memory_space<vmem>>, vector<24x64xf32>
    %c0_111 = arith.constant 0 : index
    %c0_112 = arith.constant 0 : index
    %325 = vector.load %arg5[%c0_111, %c0_112] : memref<64x128xf32, #tpu.memory_space<vmem>>, vector<64x128xf32>
    %cst_113 = arith.constant dense<0.000000e+00> : vector<24x128xf32>
    %326 = tpu.matmul %324, %325, %cst_113 {dimension_numbers = #tpu.dot_dimension_numbers<[1], [0], [0], [1], [0, 0, 1, 1], [], []>} : vector<24x64xf32>, vector<64x128xf32>, vector<24x128xf32> -> vector<24x128xf32>
    %c0_114 = arith.constant 0 : index
    %c0_115 = arith.constant 0 : index
    %327 = vector.load %arg6[%c0_114, %c0_115] : memref<1x128xf32, #tpu.memory_space<vmem>>, vector<1x128xf32>
    %328 = vector.broadcast %327 : vector<1x128xf32> to vector<24x128xf32>
    %329 = arith.addf %326, %328 : vector<24x128xf32>
    %c0_116 = arith.constant 0 : index
    %c0_117 = arith.constant 0 : index
    %330 = vector.load %arg18[%c0_116, %c0_117] : memref<24x128xf32, #tpu.memory_space<vmem>>, vector<24x128xf32>
    tpu.vector_store %arg18[%c0_116, %c0_117], %329 {strides = array<i32>} : memref<24x128xf32, #tpu.memory_space<vmem>>, vector<24x128xf32>,
    %c0_118 = arith.constant 0 : index
    %c0_119 = arith.constant 0 : index
    %331 = vector.load %arg4[%c0_118, %c0_119] : memref<40x16xf32, #tpu.memory_space<vmem>>, vector<40x16xf32>
    %c0_120 = arith.constant 0 : index
    %c0_121 = arith.constant 0 : index
    %332 = vector.load %arg7[%c0_120, %c0_121] : memref<16x128xf32, #tpu.memory_space<vmem>>, vector<16x128xf32>
    %cst_122 = arith.constant dense<0.000000e+00> : vector<40x128xf32>
    %333 = tpu.matmul %331, %332, %cst_122 {dimension_numbers = #tpu.dot_dimension_numbers<[1], [0], [0], [1], [0, 0, 1, 1], [], []>} : vector<40x16xf32>, vector<16x128xf32>, vector<40x128xf32> -> vector<40x128xf32>
    %c0_123 = arith.constant 0 : index
    %c0_124 = arith.constant 0 : index
    %334 = vector.load %arg8[%c0_123, %c0_124] : memref<1x128xf32, #tpu.memory_space<vmem>>, vector<1x128xf32>
    %335 = vector.broadcast %334 : vector<1x128xf32> to vector<40x128xf32>
    %336 = arith.addf %333, %335 : vector<40x128xf32>
    %c0_125 = arith.constant 0 : index
    %c0_126 = arith.constant 0 : index
    %337 = vector.load %arg19[%c0_125, %c0_126] : memref<40x128xf32, #tpu.memory_space<vmem>>, vector<40x128xf32>
    tpu.vector_store %arg19[%c0_125, %c0_126], %336 {strides = array<i32>} : memref<40x128xf32, #tpu.memory_space<vmem>>, vector<40x128xf32>,
    %c0_127 = arith.constant 0 : index
    %c0_128 = arith.constant 0 : index
    %338 = vector.load %arg9[%c0_127, %c0_128] : memref<64x256xf32, #tpu.memory_space<vmem>>, vector<64x256xf32>
    %cst_129 = arith.constant 0.000000e+00 : f32
    %339 = vector.broadcast %cst_129 : f32 to vector<8x64xf32>
    %c0_130 = arith.constant 0 : index
    %c0_131 = arith.constant 0 : index
    %340 = vector.load %arg20[%c0_130, %c0_131] : memref<8x64xf32, #tpu.memory_space<vmem>>, vector<8x64xf32>
    tpu.vector_store %arg20[%c0_130, %c0_131], %339 {strides = array<i32>} : memref<8x64xf32, #tpu.memory_space<vmem>>, vector<8x64xf32>,
    %cst_132 = arith.constant 0.000000e+00 : f32
    %341 = vector.broadcast %cst_132 : f32 to vector<8x64xf32>
    %c0_133 = arith.constant 0 : index
    %c0_134 = arith.constant 0 : index
    %342 = vector.load %arg21[%c0_133, %c0_134] : memref<8x64xf32, #tpu.memory_space<vmem>>, vector<8x64xf32>
    tpu.vector_store %arg21[%c0_133, %c0_134], %341 {strides = array<i32>} : memref<8x64xf32, #tpu.memory_space<vmem>>, vector<8x64xf32>,
    %c0_i32_135 = arith.constant 0 : i32
    %c2_i32_136 = arith.constant 2 : i32
    %343 = arith.minsi %c0_i32_135, %c2_i32_136 : i32
    %c4_i32_137 = arith.constant 4 : i32
    %344 = arith.minsi %c0_i32_135, %c4_i32_137 : i32
    %c8_i32 = arith.constant 8 : i32
    %345 = arith.muli %343, %c8_i32 : i32
    %346 = tpu.assume_multiple %345, 8 : i32
    %c8_i32_138 = arith.constant 8 : i32
    %347 = arith.muli %344, %c8_i32_138 : i32
    %348 = tpu.assume_multiple %347, 8 : i32
    %c0_139 = arith.constant 0 : index
    %c0_140 = arith.constant 0 : index
    %349 = vector.load %arg20[%c0_139, %c0_140] : memref<8x64xf32, #tpu.memory_space<vmem>>, vector<8x64xf32>
    %c0_141 = arith.constant 0 : index
    %c0_142 = arith.constant 0 : index
    %350 = vector.load %arg21[%c0_141, %c0_142] : memref<8x64xf32, #tpu.memory_space<vmem>>, vector<8x64xf32>
    %cst_143 = arith.constant dense<0.000000e+00> : vector<8x256xf32>
    %351 = tpu.matmul %349, %338, %cst_143 {dimension_numbers = #tpu.dot_dimension_numbers<[1], [0], [0], [1], [0, 0, 1, 1], [], []>} : vector<8x64xf32>, vector<64x256xf32>, vector<8x256xf32> -> vector<8x256xf32>
    %352 = vector.extract_strided_slice %351 {offsets = [0, 0], sizes = [8, 128], strides = [1, 1]} : vector<8x256xf32> to vector<8x128xf32>
    %353 = arith.index_cast %346 : i32 to index
    %c0_144 = arith.constant 0 : index
    %354 = vector.load %arg18[%353, %c0_144] : memref<24x128xf32, #tpu.memory_space<vmem>>, vector<8x128xf32>
    %355 = arith.addf %352, %354 : vector<8x128xf32>
    %356 = vector.extract_strided_slice %351 {offsets = [0, 128], sizes = [8, 128], strides = [1, 1]} : vector<8x256xf32> to vector<8x128xf32>
    %357 = arith.index_cast %348 : i32 to index
    %c0_145 = arith.constant 0 : index
    %358 = vector.load %arg19[%357, %c0_145] : memref<40x128xf32, #tpu.memory_space<vmem>>, vector<8x128xf32>
    %359 = arith.addf %356, %358 : vector<8x128xf32>
    %360 = vector.extract_strided_slice %350 {offsets = [0, 0], sizes = [8, 32], strides = [1, 1]} : vector<8x64xf32> to vector<8x32xf32>
    %361 = arith.negf %355 : vector<8x128xf32>
    %362 = math.exp %361 : vector<8x128xf32>
    %cst_146 = arith.constant 1.000000e+00 : f32
    %363 = vector.broadcast %cst_146 : f32 to vector<8x128xf32>
    %364 = arith.addf %363, %362 : vector<8x128xf32>
    %365 = arith.divf %363, %364 : vector<8x128xf32>
    %366 = math.tanh %355 : vector<8x128xf32>
    %367 = vector.extract_strided_slice %365 {offsets = [0, 0], sizes = [8, 32], strides = [1, 1]} : vector<8x128xf32> to vector<8x32xf32>
    %368 = vector.extract_strided_slice %365 {offsets = [0, 32], sizes = [8, 32], strides = [1, 1]} : vector<8x128xf32> to vector<8x32xf32>
    %369 = vector.extract_strided_slice %366 {offsets = [0, 64], sizes = [8, 32], strides = [1, 1]} : vector<8x128xf32> to vector<8x32xf32>
    %370 = vector.extract_strided_slice %365 {offsets = [0, 96], sizes = [8, 32], strides = [1, 1]} : vector<8x128xf32> to vector<8x32xf32>
    %371 = arith.mulf %368, %360 : vector<8x32xf32>
    %372 = arith.mulf %367, %369 : vector<8x32xf32>
    %373 = arith.addf %371, %372 : vector<8x32xf32>
    %374 = math.tanh %373 : vector<8x32xf32>
    %375 = arith.mulf %370, %374 : vector<8x32xf32>
    %376 = vector.extract_strided_slice %350 {offsets = [0, 32], sizes = [8, 32], strides = [1, 1]} : vector<8x64xf32> to vector<8x32xf32>
    %377 = arith.negf %359 : vector<8x128xf32>
    %378 = math.exp %377 : vector<8x128xf32>
    %cst_147 = arith.constant 1.000000e+00 : f32
    %379 = vector.broadcast %cst_147 : f32 to vector<8x128xf32>
    %380 = arith.addf %379, %378 : vector<8x128xf32>
    %381 = arith.divf %379, %380 : vector<8x128xf32>
    %382 = math.tanh %359 : vector<8x128xf32>
    %383 = vector.extract_strided_slice %381 {offsets = [0, 0], sizes = [8, 32], strides = [1, 1]} : vector<8x128xf32> to vector<8x32xf32>
    %384 = vector.extract_strided_slice %381 {offsets = [0, 32], sizes = [8, 32], strides = [1, 1]} : vector<8x128xf32> to vector<8x32xf32>
    %385 = vector.extract_strided_slice %382 {offsets = [0, 64], sizes = [8, 32], strides = [1, 1]} : vector<8x128xf32> to vector<8x32xf32>
    %386 = vector.extract_strided_slice %381 {offsets = [0, 96], sizes = [8, 32], strides = [1, 1]} : vector<8x128xf32> to vector<8x32xf32>
    %387 = arith.mulf %384, %376 : vector<8x32xf32>
    %388 = arith.mulf %383, %385 : vector<8x32xf32>
    %389 = arith.addf %387, %388 : vector<8x32xf32>
    %390 = math.tanh %389 : vector<8x32xf32>
    %391 = arith.mulf %386, %390 : vector<8x32xf32>
    %c3_i32_148 = arith.constant 3 : i32
    %392 = arith.cmpi slt, %c0_i32_135, %c3_i32_148 : i32
    %c5_i32_149 = arith.constant 5 : i32
    %393 = arith.cmpi slt, %c0_i32_135, %c5_i32_149 : i32
    %394 = vector.extract_strided_slice %349 {offsets = [0, 0], sizes = [8, 32], strides = [1, 1]} : vector<8x64xf32> to vector<8x32xf32>
    %395 = arith.select %392, %375, %394 : vector<8x32xf32>
    %396 = vector.extract_strided_slice %350 {offsets = [0, 0], sizes = [8, 32], strides = [1, 1]} : vector<8x64xf32> to vector<8x32xf32>
    %397 = arith.select %392, %373, %396 : vector<8x32xf32>
    %398 = vector.extract_strided_slice %349 {offsets = [0, 32], sizes = [8, 32], strides = [1, 1]} : vector<8x64xf32> to vector<8x32xf32>
    %399 = arith.select %393, %391, %398 : vector<8x32xf32>
    %400 = vector.extract_strided_slice %350 {offsets = [0, 32], sizes = [8, 32], strides = [1, 1]} : vector<8x64xf32> to vector<8x32xf32>
    %401 = arith.select %393, %389, %400 : vector<8x32xf32>
    %402 = tpu.concatenate %395, %399 in 1 : vector<8x32xf32>, vector<8x32xf32> -> vector<8x64xf32>
    %c0_150 = arith.constant 0 : index
    %c0_151 = arith.constant 0 : index
    %403 = vector.load %arg20[%c0_150, %c0_151] : memref<8x64xf32, #tpu.memory_space<vmem>>, vector<8x64xf32>
    tpu.vector_store %arg20[%c0_150, %c0_151], %402 {strides = array<i32>} : memref<8x64xf32, #tpu.memory_space<vmem>>, vector<8x64xf32>,
    %404 = tpu.concatenate %397, %401 in 1 : vector<8x32xf32>, vector<8x32xf32> -> vector<8x64xf32>
    %c0_152 = arith.constant 0 : index
    %c0_153 = arith.constant 0 : index
    %405 = vector.load %arg21[%c0_152, %c0_153] : memref<8x64xf32, #tpu.memory_space<vmem>>, vector<8x64xf32>
    tpu.vector_store %arg21[%c0_152, %c0_153], %404 {strides = array<i32>} : memref<8x64xf32, #tpu.memory_space<vmem>>, vector<8x64xf32>,
    %c1_i32_154 = arith.constant 1 : i32
    %c2_i32_155 = arith.constant 2 : i32
    %406 = arith.minsi %c1_i32_154, %c2_i32_155 : i32
    %c4_i32_156 = arith.constant 4 : i32
    %407 = arith.minsi %c1_i32_154, %c4_i32_156 : i32
    %c8_i32_157 = arith.constant 8 : i32
    %408 = arith.muli %406, %c8_i32_157 : i32
    %409 = tpu.assume_multiple %408, 8 : i32
    %c8_i32_158 = arith.constant 8 : i32
    %410 = arith.muli %407, %c8_i32_158 : i32
    %411 = tpu.assume_multiple %410, 8 : i32
    %c0_159 = arith.constant 0 : index
    %c0_160 = arith.constant 0 : index
    %412 = vector.load %arg20[%c0_159, %c0_160] : memref<8x64xf32, #tpu.memory_space<vmem>>, vector<8x64xf32>
    %c0_161 = arith.constant 0 : index
    %c0_162 = arith.constant 0 : index
    %413 = vector.load %arg21[%c0_161, %c0_162] : memref<8x64xf32, #tpu.memory_space<vmem>>, vector<8x64xf32>
    %cst_163 = arith.constant dense<0.000000e+00> : vector<8x256xf32>
    %414 = tpu.matmul %412, %338, %cst_163 {dimension_numbers = #tpu.dot_dimension_numbers<[1], [0], [0], [1], [0, 0, 1, 1], [], []>} : vector<8x64xf32>, vector<64x256xf32>, vector<8x256xf32> -> vector<8x256xf32>
    %415 = vector.extract_strided_slice %414 {offsets = [0, 0], sizes = [8, 128], strides = [1, 1]} : vector<8x256xf32> to vector<8x128xf32>
    %416 = arith.index_cast %409 : i32 to index
    %c0_164 = arith.constant 0 : index
    %417 = vector.load %arg18[%416, %c0_164] : memref<24x128xf32, #tpu.memory_space<vmem>>, vector<8x128xf32>
    %418 = arith.addf %415, %417 : vector<8x128xf32>
    %419 = vector.extract_strided_slice %414 {offsets = [0, 128], sizes = [8, 128], strides = [1, 1]} : vector<8x256xf32> to vector<8x128xf32>
    %420 = arith.index_cast %411 : i32 to index
    %c0_165 = arith.constant 0 : index
    %421 = vector.load %arg19[%420, %c0_165] : memref<40x128xf32, #tpu.memory_space<vmem>>, vector<8x128xf32>
    %422 = arith.addf %419, %421 : vector<8x128xf32>
    %423 = vector.extract_strided_slice %413 {offsets = [0, 0], sizes = [8, 32], strides = [1, 1]} : vector<8x64xf32> to vector<8x32xf32>
    %424 = arith.negf %418 : vector<8x128xf32>
    %425 = math.exp %424 : vector<8x128xf32>
    %cst_166 = arith.constant 1.000000e+00 : f32
    %426 = vector.broadcast %cst_166 : f32 to vector<8x128xf32>
    %427 = arith.addf %426, %425 : vector<8x128xf32>
    %428 = arith.divf %426, %427 : vector<8x128xf32>
    %429 = math.tanh %418 : vector<8x128xf32>
    %430 = vector.extract_strided_slice %428 {offsets = [0, 0], sizes = [8, 32], strides = [1, 1]} : vector<8x128xf32> to vector<8x32xf32>
    %431 = vector.extract_strided_slice %428 {offsets = [0, 32], sizes = [8, 32], strides = [1, 1]} : vector<8x128xf32> to vector<8x32xf32>
    %432 = vector.extract_strided_slice %429 {offsets = [0, 64], sizes = [8, 32], strides = [1, 1]} : vector<8x128xf32> to vector<8x32xf32>
    %433 = vector.extract_strided_slice %428 {offsets = [0, 96], sizes = [8, 32], strides = [1, 1]} : vector<8x128xf32> to vector<8x32xf32>
    %434 = arith.mulf %431, %423 : vector<8x32xf32>
    %435 = arith.mulf %430, %432 : vector<8x32xf32>
    %436 = arith.addf %434, %435 : vector<8x32xf32>
    %437 = math.tanh %436 : vector<8x32xf32>
    %438 = arith.mulf %433, %437 : vector<8x32xf32>
    %439 = vector.extract_strided_slice %413 {offsets = [0, 32], sizes = [8, 32], strides = [1, 1]} : vector<8x64xf32> to vector<8x32xf32>
    %440 = arith.negf %422 : vector<8x128xf32>
    %441 = math.exp %440 : vector<8x128xf32>
    %cst_167 = arith.constant 1.000000e+00 : f32
    %442 = vector.broadcast %cst_167 : f32 to vector<8x128xf32>
    %443 = arith.addf %442, %441 : vector<8x128xf32>
    %444 = arith.divf %442, %443 : vector<8x128xf32>
    %445 = math.tanh %422 : vector<8x128xf32>
    %446 = vector.extract_strided_slice %444 {offsets = [0, 0], sizes = [8, 32], strides = [1, 1]} : vector<8x128xf32> to vector<8x32xf32>
    %447 = vector.extract_strided_slice %444 {offsets = [0, 32], sizes = [8, 32], strides = [1, 1]} : vector<8x128xf32> to vector<8x32xf32>
    %448 = vector.extract_strided_slice %445 {offsets = [0, 64], sizes = [8, 32], strides = [1, 1]} : vector<8x128xf32> to vector<8x32xf32>
    %449 = vector.extract_strided_slice %444 {offsets = [0, 96], sizes = [8, 32], strides = [1, 1]} : vector<8x128xf32> to vector<8x32xf32>
    %450 = arith.mulf %447, %439 : vector<8x32xf32>
    %451 = arith.mulf %446, %448 : vector<8x32xf32>
    %452 = arith.addf %450, %451 : vector<8x32xf32>
    %453 = math.tanh %452 : vector<8x32xf32>
    %454 = arith.mulf %449, %453 : vector<8x32xf32>
    %c3_i32_168 = arith.constant 3 : i32
    %455 = arith.cmpi slt, %c1_i32_154, %c3_i32_168 : i32
    %c5_i32_169 = arith.constant 5 : i32
    %456 = arith.cmpi slt, %c1_i32_154, %c5_i32_169 : i32
    %457 = vector.extract_strided_slice %412 {offsets = [0, 0], sizes = [8, 32], strides = [1, 1]} : vector<8x64xf32> to vector<8x32xf32>
    %458 = arith.select %455, %438, %457 : vector<8x32xf32>
    %459 = vector.extract_strided_slice %413 {offsets = [0, 0], sizes = [8, 32], strides = [1, 1]} : vector<8x64xf32> to vector<8x32xf32>
    %460 = arith.select %455, %436, %459 : vector<8x32xf32>
    %461 = vector.extract_strided_slice %412 {offsets = [0, 32], sizes = [8, 32], strides = [1, 1]} : vector<8x64xf32> to vector<8x32xf32>
    %462 = arith.select %456, %454, %461 : vector<8x32xf32>
    %463 = vector.extract_strided_slice %413 {offsets = [0, 32], sizes = [8, 32], strides = [1, 1]} : vector<8x64xf32> to vector<8x32xf32>
    %464 = arith.select %456, %452, %463 : vector<8x32xf32>
    %465 = tpu.concatenate %458, %462 in 1 : vector<8x32xf32>, vector<8x32xf32> -> vector<8x64xf32>
    %c0_170 = arith.constant 0 : index
    %c0_171 = arith.constant 0 : index
    %466 = vector.load %arg20[%c0_170, %c0_171] : memref<8x64xf32, #tpu.memory_space<vmem>>, vector<8x64xf32>
    tpu.vector_store %arg20[%c0_170, %c0_171], %465 {strides = array<i32>} : memref<8x64xf32, #tpu.memory_space<vmem>>, vector<8x64xf32>,
    %467 = tpu.concatenate %460, %464 in 1 : vector<8x32xf32>, vector<8x32xf32> -> vector<8x64xf32>
    %c0_172 = arith.constant 0 : index
    %c0_173 = arith.constant 0 : index
    %468 = vector.load %arg21[%c0_172, %c0_173] : memref<8x64xf32, #tpu.memory_space<vmem>>, vector<8x64xf32>
    tpu.vector_store %arg21[%c0_172, %c0_173], %467 {strides = array<i32>} : memref<8x64xf32, #tpu.memory_space<vmem>>, vector<8x64xf32>,
    %c2_i32_174 = arith.constant 2 : i32
    %c2_i32_175 = arith.constant 2 : i32
    %469 = arith.minsi %c2_i32_174, %c2_i32_175 : i32
    %c4_i32_176 = arith.constant 4 : i32
    %470 = arith.minsi %c2_i32_174, %c4_i32_176 : i32
    %c8_i32_177 = arith.constant 8 : i32
    %471 = arith.muli %469, %c8_i32_177 : i32
    %472 = tpu.assume_multiple %471, 8 : i32
    %c8_i32_178 = arith.constant 8 : i32
    %473 = arith.muli %470, %c8_i32_178 : i32
    %474 = tpu.assume_multiple %473, 8 : i32
    %c0_179 = arith.constant 0 : index
    %c0_180 = arith.constant 0 : index
    %475 = vector.load %arg20[%c0_179, %c0_180] : memref<8x64xf32, #tpu.memory_space<vmem>>, vector<8x64xf32>
    %c0_181 = arith.constant 0 : index
    %c0_182 = arith.constant 0 : index
    %476 = vector.load %arg21[%c0_181, %c0_182] : memref<8x64xf32, #tpu.memory_space<vmem>>, vector<8x64xf32>
    %cst_183 = arith.constant dense<0.000000e+00> : vector<8x256xf32>
    %477 = tpu.matmul %475, %338, %cst_183 {dimension_numbers = #tpu.dot_dimension_numbers<[1], [0], [0], [1], [0, 0, 1, 1], [], []>} : vector<8x64xf32>, vector<64x256xf32>, vector<8x256xf32> -> vector<8x256xf32>
    %478 = vector.extract_strided_slice %477 {offsets = [0, 0], sizes = [8, 128], strides = [1, 1]} : vector<8x256xf32> to vector<8x128xf32>
    %479 = arith.index_cast %472 : i32 to index
    %c0_184 = arith.constant 0 : index
    %480 = vector.load %arg18[%479, %c0_184] : memref<24x128xf32, #tpu.memory_space<vmem>>, vector<8x128xf32>
    %481 = arith.addf %478, %480 : vector<8x128xf32>
    %482 = vector.extract_strided_slice %477 {offsets = [0, 128], sizes = [8, 128], strides = [1, 1]} : vector<8x256xf32> to vector<8x128xf32>
    %483 = arith.index_cast %474 : i32 to index
    %c0_185 = arith.constant 0 : index
    %484 = vector.load %arg19[%483, %c0_185] : memref<40x128xf32, #tpu.memory_space<vmem>>, vector<8x128xf32>
    %485 = arith.addf %482, %484 : vector<8x128xf32>
    %486 = vector.extract_strided_slice %476 {offsets = [0, 0], sizes = [8, 32], strides = [1, 1]} : vector<8x64xf32> to vector<8x32xf32>
    %487 = arith.negf %481 : vector<8x128xf32>
    %488 = math.exp %487 : vector<8x128xf32>
    %cst_186 = arith.constant 1.000000e+00 : f32
    %489 = vector.broadcast %cst_186 : f32 to vector<8x128xf32>
    %490 = arith.addf %489, %488 : vector<8x128xf32>
    %491 = arith.divf %489, %490 : vector<8x128xf32>
    %492 = math.tanh %481 : vector<8x128xf32>
    %493 = vector.extract_strided_slice %491 {offsets = [0, 0], sizes = [8, 32], strides = [1, 1]} : vector<8x128xf32> to vector<8x32xf32>
    %494 = vector.extract_strided_slice %491 {offsets = [0, 32], sizes = [8, 32], strides = [1, 1]} : vector<8x128xf32> to vector<8x32xf32>
    %495 = vector.extract_strided_slice %492 {offsets = [0, 64], sizes = [8, 32], strides = [1, 1]} : vector<8x128xf32> to vector<8x32xf32>
    %496 = vector.extract_strided_slice %491 {offsets = [0, 96], sizes = [8, 32], strides = [1, 1]} : vector<8x128xf32> to vector<8x32xf32>
    %497 = arith.mulf %494, %486 : vector<8x32xf32>
    %498 = arith.mulf %493, %495 : vector<8x32xf32>
    %499 = arith.addf %497, %498 : vector<8x32xf32>
    %500 = math.tanh %499 : vector<8x32xf32>
    %501 = arith.mulf %496, %500 : vector<8x32xf32>
    %502 = vector.extract_strided_slice %476 {offsets = [0, 32], sizes = [8, 32], strides = [1, 1]} : vector<8x64xf32> to vector<8x32xf32>
    %503 = arith.negf %485 : vector<8x128xf32>
    %504 = math.exp %503 : vector<8x128xf32>
    %cst_187 = arith.constant 1.000000e+00 : f32
    %505 = vector.broadcast %cst_187 : f32 to vector<8x128xf32>
    %506 = arith.addf %505, %504 : vector<8x128xf32>
    %507 = arith.divf %505, %506 : vector<8x128xf32>
    %508 = math.tanh %485 : vector<8x128xf32>
    %509 = vector.extract_strided_slice %507 {offsets = [0, 0], sizes = [8, 32], strides = [1, 1]} : vector<8x128xf32> to vector<8x32xf32>
    %510 = vector.extract_strided_slice %507 {offsets = [0, 32], sizes = [8, 32], strides = [1, 1]} : vector<8x128xf32> to vector<8x32xf32>
    %511 = vector.extract_strided_slice %508 {offsets = [0, 64], sizes = [8, 32], strides = [1, 1]} : vector<8x128xf32> to vector<8x32xf32>
    %512 = vector.extract_strided_slice %507 {offsets = [0, 96], sizes = [8, 32], strides = [1, 1]} : vector<8x128xf32> to vector<8x32xf32>
    %513 = arith.mulf %510, %502 : vector<8x32xf32>
    %514 = arith.mulf %509, %511 : vector<8x32xf32>
    %515 = arith.addf %513, %514 : vector<8x32xf32>
    %516 = math.tanh %515 : vector<8x32xf32>
    %517 = arith.mulf %512, %516 : vector<8x32xf32>
    %c3_i32_188 = arith.constant 3 : i32
    %518 = arith.cmpi slt, %c2_i32_174, %c3_i32_188 : i32
    %c5_i32_189 = arith.constant 5 : i32
    %519 = arith.cmpi slt, %c2_i32_174, %c5_i32_189 : i32
    %520 = vector.extract_strided_slice %475 {offsets = [0, 0], sizes = [8, 32], strides = [1, 1]} : vector<8x64xf32> to vector<8x32xf32>
    %521 = arith.select %518, %501, %520 : vector<8x32xf32>
    %522 = vector.extract_strided_slice %476 {offsets = [0, 0], sizes = [8, 32], strides = [1, 1]} : vector<8x64xf32> to vector<8x32xf32>
    %523 = arith.select %518, %499, %522 : vector<8x32xf32>
    %524 = vector.extract_strided_slice %475 {offsets = [0, 32], sizes = [8, 32], strides = [1, 1]} : vector<8x64xf32> to vector<8x32xf32>
    %525 = arith.select %519, %517, %524 : vector<8x32xf32>
    %526 = vector.extract_strided_slice %476 {offsets = [0, 32], sizes = [8, 32], strides = [1, 1]} : vector<8x64xf32> to vector<8x32xf32>
    %527 = arith.select %519, %515, %526 : vector<8x32xf32>
    %528 = tpu.concatenate %521, %525 in 1 : vector<8x32xf32>, vector<8x32xf32> -> vector<8x64xf32>
    %c0_190 = arith.constant 0 : index
    %c0_191 = arith.constant 0 : index
    %529 = vector.load %arg20[%c0_190, %c0_191] : memref<8x64xf32, #tpu.memory_space<vmem>>, vector<8x64xf32>
    tpu.vector_store %arg20[%c0_190, %c0_191], %528 {strides = array<i32>} : memref<8x64xf32, #tpu.memory_space<vmem>>, vector<8x64xf32>,
    %530 = tpu.concatenate %523, %527 in 1 : vector<8x32xf32>, vector<8x32xf32> -> vector<8x64xf32>
    %c0_192 = arith.constant 0 : index
    %c0_193 = arith.constant 0 : index
    %531 = vector.load %arg21[%c0_192, %c0_193] : memref<8x64xf32, #tpu.memory_space<vmem>>, vector<8x64xf32>
    tpu.vector_store %arg21[%c0_192, %c0_193], %530 {strides = array<i32>} : memref<8x64xf32, #tpu.memory_space<vmem>>, vector<8x64xf32>,
    %c3_i32_194 = arith.constant 3 : i32
    %c2_i32_195 = arith.constant 2 : i32
    %532 = arith.minsi %c3_i32_194, %c2_i32_195 : i32
    %c4_i32_196 = arith.constant 4 : i32
    %533 = arith.minsi %c3_i32_194, %c4_i32_196 : i32
    %c8_i32_197 = arith.constant 8 : i32
    %534 = arith.muli %532, %c8_i32_197 : i32
    %535 = tpu.assume_multiple %534, 8 : i32
    %c8_i32_198 = arith.constant 8 : i32
    %536 = arith.muli %533, %c8_i32_198 : i32
    %537 = tpu.assume_multiple %536, 8 : i32
    %c0_199 = arith.constant 0 : index
    %c0_200 = arith.constant 0 : index
    %538 = vector.load %arg20[%c0_199, %c0_200] : memref<8x64xf32, #tpu.memory_space<vmem>>, vector<8x64xf32>
    %c0_201 = arith.constant 0 : index
    %c0_202 = arith.constant 0 : index
    %539 = vector.load %arg21[%c0_201, %c0_202] : memref<8x64xf32, #tpu.memory_space<vmem>>, vector<8x64xf32>
    %cst_203 = arith.constant dense<0.000000e+00> : vector<8x256xf32>
    %540 = tpu.matmul %538, %338, %cst_203 {dimension_numbers = #tpu.dot_dimension_numbers<[1], [0], [0], [1], [0, 0, 1, 1], [], []>} : vector<8x64xf32>, vector<64x256xf32>, vector<8x256xf32> -> vector<8x256xf32>
    %541 = vector.extract_strided_slice %540 {offsets = [0, 0], sizes = [8, 128], strides = [1, 1]} : vector<8x256xf32> to vector<8x128xf32>
    %542 = arith.index_cast %535 : i32 to index
    %c0_204 = arith.constant 0 : index
    %543 = vector.load %arg18[%542, %c0_204] : memref<24x128xf32, #tpu.memory_space<vmem>>, vector<8x128xf32>
    %544 = arith.addf %541, %543 : vector<8x128xf32>
    %545 = vector.extract_strided_slice %540 {offsets = [0, 128], sizes = [8, 128], strides = [1, 1]} : vector<8x256xf32> to vector<8x128xf32>
    %546 = arith.index_cast %537 : i32 to index
    %c0_205 = arith.constant 0 : index
    %547 = vector.load %arg19[%546, %c0_205] : memref<40x128xf32, #tpu.memory_space<vmem>>, vector<8x128xf32>
    %548 = arith.addf %545, %547 : vector<8x128xf32>
    %549 = vector.extract_strided_slice %539 {offsets = [0, 0], sizes = [8, 32], strides = [1, 1]} : vector<8x64xf32> to vector<8x32xf32>
    %550 = arith.negf %544 : vector<8x128xf32>
    %551 = math.exp %550 : vector<8x128xf32>
    %cst_206 = arith.constant 1.000000e+00 : f32
    %552 = vector.broadcast %cst_206 : f32 to vector<8x128xf32>
    %553 = arith.addf %552, %551 : vector<8x128xf32>
    %554 = arith.divf %552, %553 : vector<8x128xf32>
    %555 = math.tanh %544 : vector<8x128xf32>
    %556 = vector.extract_strided_slice %554 {offsets = [0, 0], sizes = [8, 32], strides = [1, 1]} : vector<8x128xf32> to vector<8x32xf32>
    %557 = vector.extract_strided_slice %554 {offsets = [0, 32], sizes = [8, 32], strides = [1, 1]} : vector<8x128xf32> to vector<8x32xf32>
    %558 = vector.extract_strided_slice %555 {offsets = [0, 64], sizes = [8, 32], strides = [1, 1]} : vector<8x128xf32> to vector<8x32xf32>
    %559 = vector.extract_strided_slice %554 {offsets = [0, 96], sizes = [8, 32], strides = [1, 1]} : vector<8x128xf32> to vector<8x32xf32>
    %560 = arith.mulf %557, %549 : vector<8x32xf32>
    %561 = arith.mulf %556, %558 : vector<8x32xf32>
    %562 = arith.addf %560, %561 : vector<8x32xf32>
    %563 = math.tanh %562 : vector<8x32xf32>
    %564 = arith.mulf %559, %563 : vector<8x32xf32>
    %565 = vector.extract_strided_slice %539 {offsets = [0, 32], sizes = [8, 32], strides = [1, 1]} : vector<8x64xf32> to vector<8x32xf32>
    %566 = arith.negf %548 : vector<8x128xf32>
    %567 = math.exp %566 : vector<8x128xf32>
    %cst_207 = arith.constant 1.000000e+00 : f32
    %568 = vector.broadcast %cst_207 : f32 to vector<8x128xf32>
    %569 = arith.addf %568, %567 : vector<8x128xf32>
    %570 = arith.divf %568, %569 : vector<8x128xf32>
    %571 = math.tanh %548 : vector<8x128xf32>
    %572 = vector.extract_strided_slice %570 {offsets = [0, 0], sizes = [8, 32], strides = [1, 1]} : vector<8x128xf32> to vector<8x32xf32>
    %573 = vector.extract_strided_slice %570 {offsets = [0, 32], sizes = [8, 32], strides = [1, 1]} : vector<8x128xf32> to vector<8x32xf32>
    %574 = vector.extract_strided_slice %571 {offsets = [0, 64], sizes = [8, 32], strides = [1, 1]} : vector<8x128xf32> to vector<8x32xf32>
    %575 = vector.extract_strided_slice %570 {offsets = [0, 96], sizes = [8, 32], strides = [1, 1]} : vector<8x128xf32> to vector<8x32xf32>
    %576 = arith.mulf %573, %565 : vector<8x32xf32>
    %577 = arith.mulf %572, %574 : vector<8x32xf32>
    %578 = arith.addf %576, %577 : vector<8x32xf32>
    %579 = math.tanh %578 : vector<8x32xf32>
    %580 = arith.mulf %575, %579 : vector<8x32xf32>
    %c3_i32_208 = arith.constant 3 : i32
    %581 = arith.cmpi slt, %c3_i32_194, %c3_i32_208 : i32
    %c5_i32_209 = arith.constant 5 : i32
    %582 = arith.cmpi slt, %c3_i32_194, %c5_i32_209 : i32
    %583 = vector.extract_strided_slice %538 {offsets = [0, 0], sizes = [8, 32], strides = [1, 1]} : vector<8x64xf32> to vector<8x32xf32>
    %584 = arith.select %581, %564, %583 : vector<8x32xf32>
    %585 = vector.extract_strided_slice %539 {offsets = [0, 0], sizes = [8, 32], strides = [1, 1]} : vector<8x64xf32> to vector<8x32xf32>
    %586 = arith.select %581, %562, %585 : vector<8x32xf32>
    %587 = vector.extract_strided_slice %538 {offsets = [0, 32], sizes = [8, 32], strides = [1, 1]} : vector<8x64xf32> to vector<8x32xf32>
    %588 = arith.select %582, %580, %587 : vector<8x32xf32>
    %589 = vector.extract_strided_slice %539 {offsets = [0, 32], sizes = [8, 32], strides = [1, 1]} : vector<8x64xf32> to vector<8x32xf32>
    %590 = arith.select %582, %578, %589 : vector<8x32xf32>
    %591 = tpu.concatenate %584, %588 in 1 : vector<8x32xf32>, vector<8x32xf32> -> vector<8x64xf32>
    %c0_210 = arith.constant 0 : index
    %c0_211 = arith.constant 0 : index
    %592 = vector.load %arg20[%c0_210, %c0_211] : memref<8x64xf32, #tpu.memory_space<vmem>>, vector<8x64xf32>
    tpu.vector_store %arg20[%c0_210, %c0_211], %591 {strides = array<i32>} : memref<8x64xf32, #tpu.memory_space<vmem>>, vector<8x64xf32>,
    %593 = tpu.concatenate %586, %590 in 1 : vector<8x32xf32>, vector<8x32xf32> -> vector<8x64xf32>
    %c0_212 = arith.constant 0 : index
    %c0_213 = arith.constant 0 : index
    %594 = vector.load %arg21[%c0_212, %c0_213] : memref<8x64xf32, #tpu.memory_space<vmem>>, vector<8x64xf32>
    tpu.vector_store %arg21[%c0_212, %c0_213], %593 {strides = array<i32>} : memref<8x64xf32, #tpu.memory_space<vmem>>, vector<8x64xf32>,
    %c4_i32_214 = arith.constant 4 : i32
    %c2_i32_215 = arith.constant 2 : i32
    %595 = arith.minsi %c4_i32_214, %c2_i32_215 : i32
    %c4_i32_216 = arith.constant 4 : i32
    %596 = arith.minsi %c4_i32_214, %c4_i32_216 : i32
    %c8_i32_217 = arith.constant 8 : i32
    %597 = arith.muli %595, %c8_i32_217 : i32
    %598 = tpu.assume_multiple %597, 8 : i32
    %c8_i32_218 = arith.constant 8 : i32
    %599 = arith.muli %596, %c8_i32_218 : i32
    %600 = tpu.assume_multiple %599, 8 : i32
    %c0_219 = arith.constant 0 : index
    %c0_220 = arith.constant 0 : index
    %601 = vector.load %arg20[%c0_219, %c0_220] : memref<8x64xf32, #tpu.memory_space<vmem>>, vector<8x64xf32>
    %c0_221 = arith.constant 0 : index
    %c0_222 = arith.constant 0 : index
    %602 = vector.load %arg21[%c0_221, %c0_222] : memref<8x64xf32, #tpu.memory_space<vmem>>, vector<8x64xf32>
    %cst_223 = arith.constant dense<0.000000e+00> : vector<8x256xf32>
    %603 = tpu.matmul %601, %338, %cst_223 {dimension_numbers = #tpu.dot_dimension_numbers<[1], [0], [0], [1], [0, 0, 1, 1], [], []>} : vector<8x64xf32>, vector<64x256xf32>, vector<8x256xf32> -> vector<8x256xf32>
    %604 = vector.extract_strided_slice %603 {offsets = [0, 0], sizes = [8, 128], strides = [1, 1]} : vector<8x256xf32> to vector<8x128xf32>
    %605 = arith.index_cast %598 : i32 to index
    %c0_224 = arith.constant 0 : index
    %606 = vector.load %arg18[%605, %c0_224] : memref<24x128xf32, #tpu.memory_space<vmem>>, vector<8x128xf32>
    %607 = arith.addf %604, %606 : vector<8x128xf32>
    %608 = vector.extract_strided_slice %603 {offsets = [0, 128], sizes = [8, 128], strides = [1, 1]} : vector<8x256xf32> to vector<8x128xf32>
    %609 = arith.index_cast %600 : i32 to index
    %c0_225 = arith.constant 0 : index
    %610 = vector.load %arg19[%609, %c0_225] : memref<40x128xf32, #tpu.memory_space<vmem>>, vector<8x128xf32>
    %611 = arith.addf %608, %610 : vector<8x128xf32>
    %612 = vector.extract_strided_slice %602 {offsets = [0, 0], sizes = [8, 32], strides = [1, 1]} : vector<8x64xf32> to vector<8x32xf32>
    %613 = arith.negf %607 : vector<8x128xf32>
    %614 = math.exp %613 : vector<8x128xf32>
    %cst_226 = arith.constant 1.000000e+00 : f32
    %615 = vector.broadcast %cst_226 : f32 to vector<8x128xf32>
    %616 = arith.addf %615, %614 : vector<8x128xf32>
    %617 = arith.divf %615, %616 : vector<8x128xf32>
    %618 = math.tanh %607 : vector<8x128xf32>
    %619 = vector.extract_strided_slice %617 {offsets = [0, 0], sizes = [8, 32], strides = [1, 1]} : vector<8x128xf32> to vector<8x32xf32>
    %620 = vector.extract_strided_slice %617 {offsets = [0, 32], sizes = [8, 32], strides = [1, 1]} : vector<8x128xf32> to vector<8x32xf32>
    %621 = vector.extract_strided_slice %618 {offsets = [0, 64], sizes = [8, 32], strides = [1, 1]} : vector<8x128xf32> to vector<8x32xf32>
    %622 = vector.extract_strided_slice %617 {offsets = [0, 96], sizes = [8, 32], strides = [1, 1]} : vector<8x128xf32> to vector<8x32xf32>
    %623 = arith.mulf %620, %612 : vector<8x32xf32>
    %624 = arith.mulf %619, %621 : vector<8x32xf32>
    %625 = arith.addf %623, %624 : vector<8x32xf32>
    %626 = math.tanh %625 : vector<8x32xf32>
    %627 = arith.mulf %622, %626 : vector<8x32xf32>
    %628 = vector.extract_strided_slice %602 {offsets = [0, 32], sizes = [8, 32], strides = [1, 1]} : vector<8x64xf32> to vector<8x32xf32>
    %629 = arith.negf %611 : vector<8x128xf32>
    %630 = math.exp %629 : vector<8x128xf32>
    %cst_227 = arith.constant 1.000000e+00 : f32
    %631 = vector.broadcast %cst_227 : f32 to vector<8x128xf32>
    %632 = arith.addf %631, %630 : vector<8x128xf32>
    %633 = arith.divf %631, %632 : vector<8x128xf32>
    %634 = math.tanh %611 : vector<8x128xf32>
    %635 = vector.extract_strided_slice %633 {offsets = [0, 0], sizes = [8, 32], strides = [1, 1]} : vector<8x128xf32> to vector<8x32xf32>
    %636 = vector.extract_strided_slice %633 {offsets = [0, 32], sizes = [8, 32], strides = [1, 1]} : vector<8x128xf32> to vector<8x32xf32>
    %637 = vector.extract_strided_slice %634 {offsets = [0, 64], sizes = [8, 32], strides = [1, 1]} : vector<8x128xf32> to vector<8x32xf32>
    %638 = vector.extract_strided_slice %633 {offsets = [0, 96], sizes = [8, 32], strides = [1, 1]} : vector<8x128xf32> to vector<8x32xf32>
    %639 = arith.mulf %636, %628 : vector<8x32xf32>
    %640 = arith.mulf %635, %637 : vector<8x32xf32>
    %641 = arith.addf %639, %640 : vector<8x32xf32>
    %642 = math.tanh %641 : vector<8x32xf32>
    %643 = arith.mulf %638, %642 : vector<8x32xf32>
    %c3_i32_228 = arith.constant 3 : i32
    %644 = arith.cmpi slt, %c4_i32_214, %c3_i32_228 : i32
    %c5_i32_229 = arith.constant 5 : i32
    %645 = arith.cmpi slt, %c4_i32_214, %c5_i32_229 : i32
    %646 = vector.extract_strided_slice %601 {offsets = [0, 0], sizes = [8, 32], strides = [1, 1]} : vector<8x64xf32> to vector<8x32xf32>
    %647 = arith.select %644, %627, %646 : vector<8x32xf32>
    %648 = vector.extract_strided_slice %602 {offsets = [0, 0], sizes = [8, 32], strides = [1, 1]} : vector<8x64xf32> to vector<8x32xf32>
    %649 = arith.select %644, %625, %648 : vector<8x32xf32>
    %650 = vector.extract_strided_slice %601 {offsets = [0, 32], sizes = [8, 32], strides = [1, 1]} : vector<8x64xf32> to vector<8x32xf32>
    %651 = arith.select %645, %643, %650 : vector<8x32xf32>
    %652 = vector.extract_strided_slice %602 {offsets = [0, 32], sizes = [8, 32], strides = [1, 1]} : vector<8x64xf32> to vector<8x32xf32>
    %653 = arith.select %645, %641, %652 : vector<8x32xf32>
    %654 = tpu.concatenate %647, %651 in 1 : vector<8x32xf32>, vector<8x32xf32> -> vector<8x64xf32>
    %c0_230 = arith.constant 0 : index
    %c0_231 = arith.constant 0 : index
    %655 = vector.load %arg20[%c0_230, %c0_231] : memref<8x64xf32, #tpu.memory_space<vmem>>, vector<8x64xf32>
    tpu.vector_store %arg20[%c0_230, %c0_231], %654 {strides = array<i32>} : memref<8x64xf32, #tpu.memory_space<vmem>>, vector<8x64xf32>,
    %656 = tpu.concatenate %649, %653 in 1 : vector<8x32xf32>, vector<8x32xf32> -> vector<8x64xf32>
    %c0_232 = arith.constant 0 : index
    %c0_233 = arith.constant 0 : index
    %657 = vector.load %arg21[%c0_232, %c0_233] : memref<8x64xf32, #tpu.memory_space<vmem>>, vector<8x64xf32>
    tpu.vector_store %arg21[%c0_232, %c0_233], %656 {strides = array<i32>} : memref<8x64xf32, #tpu.memory_space<vmem>>, vector<8x64xf32>,
    %c5_i32_234 = arith.constant 5 : i32
    %c16 = arith.constant 16 : index
    %c0_235 = arith.constant 0 : index
    %658 = vector.load %arg16[%c16, %c0_235] : memref<24x64xf32, #tpu.memory_space<vmem>>, vector<8x64xf32>
    %c0_236 = arith.constant 0 : index
    %c0_237 = arith.constant 0 : index
    %659 = vector.load %arg20[%c0_236, %c0_237] : memref<8x64xf32, #tpu.memory_space<vmem>>, vector<8x64xf32>
    %c0_238 = arith.constant 0 : index
    %c0_239 = arith.constant 0 : index
    %660 = vector.load %arg10[%c0_238, %c0_239] : memref<8x32xf32, #tpu.memory_space<vmem>>, vector<8x32xf32>
    %c0_240 = arith.constant 0 : index
    %c0_241 = arith.constant 0 : index
    %661 = vector.load %arg11[%c0_240, %c0_241] : memref<160x128xf32, #tpu.memory_space<vmem>>, vector<64x128xf32>
    %cst_242 = arith.constant dense<0.000000e+00> : vector<8x128xf32>
    %662 = tpu.matmul %658, %661, %cst_242 {dimension_numbers = #tpu.dot_dimension_numbers<[1], [0], [0], [1], [0, 0, 1, 1], [], []>} : vector<8x64xf32>, vector<64x128xf32>, vector<8x128xf32> -> vector<8x128xf32>
    %c64 = arith.constant 64 : index
    %c0_243 = arith.constant 0 : index
    %663 = vector.load %arg11[%c64, %c0_243] : memref<160x128xf32, #tpu.memory_space<vmem>>, vector<64x128xf32>
    %cst_244 = arith.constant dense<0.000000e+00> : vector<8x128xf32>
    %664 = tpu.matmul %659, %663, %cst_244 {dimension_numbers = #tpu.dot_dimension_numbers<[1], [0], [0], [1], [0, 0, 1, 1], [], []>} : vector<8x64xf32>, vector<64x128xf32>, vector<8x128xf32> -> vector<8x128xf32>
    %665 = arith.addf %662, %664 : vector<8x128xf32>
    %c128_245 = arith.constant 128 : index
    %c0_246 = arith.constant 0 : index
    %666 = vector.load %arg11[%c128_245, %c0_246] : memref<160x128xf32, #tpu.memory_space<vmem>>, vector<32x128xf32>
    %cst_247 = arith.constant dense<0.000000e+00> : vector<8x128xf32>
    %667 = tpu.matmul %660, %666, %cst_247 {dimension_numbers = #tpu.dot_dimension_numbers<[1], [0], [0], [1], [0, 0, 1, 1], [], []>} : vector<8x32xf32>, vector<32x128xf32>, vector<8x128xf32> -> vector<8x128xf32>
    %668 = arith.addf %665, %667 : vector<8x128xf32>
    %c0_248 = arith.constant 0 : index
    %c0_249 = arith.constant 0 : index
    %669 = vector.load %arg12[%c0_248, %c0_249] : memref<1x128xf32, #tpu.memory_space<vmem>>, vector<1x128xf32>
    %670 = vector.broadcast %669 : vector<1x128xf32> to vector<8x128xf32>
    %671 = arith.addf %668, %670 : vector<8x128xf32>
    %cst_250 = arith.constant 0.000000e+00 : f32
    %672 = vector.broadcast %cst_250 : f32 to vector<8x128xf32>
    %673 = arith.maximumf %671, %672 : vector<8x128xf32>
    %c0_251 = arith.constant 0 : index
    %c0_252 = arith.constant 0 : index
    %674 = vector.load %arg13[%c0_251, %c0_252] : memref<128x128xf32, #tpu.memory_space<vmem>>, vector<128x128xf32>
    %cst_253 = arith.constant dense<0.000000e+00> : vector<8x128xf32>
    %675 = tpu.matmul %673, %674, %cst_253 {dimension_numbers = #tpu.dot_dimension_numbers<[1], [0], [0], [1], [0, 0, 1, 1], [], []>} : vector<8x128xf32>, vector<128x128xf32>, vector<8x128xf32> -> vector<8x128xf32>
    %c0_254 = arith.constant 0 : index
    %c0_255 = arith.constant 0 : index
    %676 = vector.load %arg14[%c0_254, %c0_255] : memref<8x128xf32, #tpu.memory_space<vmem>>, vector<8x128xf32>
    tpu.vector_store %arg14[%c0_254, %c0_255], %675 {strides = array<i32>} : memref<8x128xf32, #tpu.memory_space<vmem>>, vector<8x128xf32>,
    return
  }
}

</mosaic_0001>

<bundles_post_ra>
// kernel: dst_forward.1
= control target key start
LH: loop header
LB: loop body
LE: loop exit
PB: predicated region body
PF: predicated region fallthrough
CT: control target
= control target key end

     0   :  { %vm365_vm0 = vcmask 523264   ;;  %v5838_v3 = vmov 0.0   ;;  %vm85_vm1 = vcmask 261120   ;;  %s4203_s30 = smov 32   ;;  %s4204_s15 = smov 96   ;;  %vm4205_vm2 = vmmov 0   ;;  %s5823_s1 = inlined_call_operand.vmem [shape: f32[32,256], index: 1, kind: input, shape index: {}]   ;;  %s5824_s2 = inlined_call_operand.vmem [shape: f32[64,256], index: 2, kind: input, shape index: {}]   ;;  %s5825_s0 = inlined_call_operand.vmem [shape: f32[144,32], index: 0, kind: input, shape index: {}]   ;;  %s5826_s3 = inlined_call_operand.vmem [shape: f32[1,256], index: 3, kind: input, shape index: {}]   ;;  %s5827_s5 = inlined_call_operand.vmem [shape: f32[64,128], index: 5, kind: input, shape index: {}]   ;;  %s5828_s9 = inlined_call_operand.vmem [shape: f32[64,256], index: 9, kind: input, shape index: {}]   ;;  %s5829_s7 = inlined_call_operand.vmem [shape: f32[16,128], index: 7, kind: input, shape index: {}]   ;;  %s5830_s4 = inlined_call_operand.vmem [shape: f32[40,16], index: 4, kind: input, shape index: {}]   ;;  %s5831_s6 = inlined_call_operand.vmem [shape: f32[1,128], index: 6, kind: input, shape index: {}]   ;;  %s5832_s8 = inlined_call_operand.vmem [shape: f32[1,128], index: 8, kind: input, shape index: {}]   ;;  %s5833_s11 = inlined_call_operand.vmem [shape: f32[160,128], index: 11, kind: input, shape index: {}]   ;;  %s5834_s10 = inlined_call_operand.vmem [shape: f32[8,32], index: 10, kind: input, shape index: {}]   ;;  %s5835_s13 = inlined_call_operand.vmem [shape: f32[128,128], index: 13, kind: input, shape index: {}]   ;;  %s5836_s12 = inlined_call_operand.vmem [shape: f32[1,128], index: 12, kind: input, shape index: {}]   ;;  %s5837_s14 = inlined_call_operand.vmem [shape: f32[8,128], index: 14, kind: output, shape index: {}]  }
   0x1   :  { %v72_v0 = vld [vmem:[%s5823_s1 + $0x38] sm:$0xff]  ;;  %v71_v1 = vld [vmem:[%s5823_s1 + $0x30] sm:$0xff]  ;;  %v70_v2 = vld [vmem:[%s5823_s1 + $0x28] sm:$0xff]  ;;  %204 = vmatprep.mubr.f32.mxu0 %v5838_v3  ;;  %366 = vst.msk [vmem:[#allocation3] sm:$0xff] %vm365_vm0, %v5838_v3  ;;  %771 = vmatprep.mubr.f32.mxu1 %v5838_v3  ;;  %vm2398_vm3 = vcmask 130048  }
   0x2   :  { %367 = vst.msk [vmem:[#allocation3 + $0x8] sm:$0xff] %vm365_vm0, %v5838_v3  ;;  %368 = vst.msk [vmem:[#allocation3 + $0x10] sm:$0xff] %vm365_vm0, %v5838_v3  ;;  %164 = vmatprep.subr.mxu0 %v72_v0  ;;  %v69_v4 = vld [vmem:[%s5823_s1 + $0x20] sm:$0xff]  ;;  %v68_v5 = vld [vmem:[%s5823_s1 + $0x18] sm:$0xff] }
   0x3   :  { %369 = vst.msk [vmem:[#allocation4] sm:$0xff] %vm365_vm0, %v5838_v3  ;;  %370 = vst.msk [vmem:[#allocation4 + $0x8] sm:$0xff] %vm365_vm0, %v5838_v3  ;;  %165 = vmatpush1.msra.mxu0 %v71_v1  ;;  %v67_v6 = vld [vmem:[%s5823_s1 + $0x10] sm:$0xff]  ;;  %v4320_v7 = vld [vmem:[%s5824_s2 + $0x78] sm:$0xff] }
   0x4   :  { %371 = vst.msk [vmem:[#allocation4 + $0x10] sm:$0xff] %vm365_vm0, %v5838_v3  ;;  %2525 = vst.msk [vmem:[#allocation7] sm:$0xff] %vm365_vm0, %v5838_v3  ;;  %166 = vmatprep.subr.mxu0 %v70_v2  ;;  %v66_v8 = vld [vmem:[%s5823_s1 + $0x8] sm:$0xff]  ;;  %v4328_v9 = vld [vmem:[%s5824_s2 + $0x70] sm:$0xff]  ;;  %723 = vmatprep.subr.mxu1 %v4320_v7 }
   0x5   :  { %2526 = vst.msk [vmem:[#allocation8] sm:$0xff] %vm365_vm0, %v5838_v3  ;;  %167 = vmatpush1.msra.mxu0 %v69_v4  ;;  %v65_v10 = vld [vmem:[%s5823_s1] sm:$0xff]  ;;  %v4337_v11 = vld [vmem:[%s5824_s2 + $0x68] sm:$0xff]  ;;  %724 = vmatpush1.msra.mxu1 %v4328_v9  ;;  %v4352_v14 = vld [vmem:[%s5824_s2 + $0x58] sm:$0xff] }
   0x6   :  { %168 = vmatprep.subr.mxu0 %v68_v5  ;;  %v47_v12 = vld [vmem:[%s5825_s0] sm:$0xff]  ;;  %725 = vmatprep.subr.mxu1 %v4337_v11  ;;  %v48_v15 = vld [vmem:[%s5825_s0 + $0x8] sm:$0xff]  ;;  %v4366_v16 = vld [vmem:[%s5824_s2 + $0x50] sm:$0xff] }
   0x7   :  { %169 = vmatpush1.msra.mxu0 %v67_v6  ;;  %v4346_v13 = vld [vmem:[%s5824_s2 + $0x60] sm:$0xff]  ;;  %v4372_v17 = vld [vmem:[%s5824_s2 + $0x48] sm:$0xff]  ;;  %v49_v19 = vld [vmem:[%s5825_s0 + $0x10] sm:$0xff] }
   0x8   :  { %170 = vmatprep.subr.mxu0 %v66_v8  ;;  %726 = vmatpush1.msra.mxu1 %v4346_v13  ;;  %v4382_v18 = vld [vmem:[%s5824_s2 + $0x40] sm:$0xff]  ;;  %v4392_v20 = vld [vmem:[%s5824_s2 + $0x38] sm:$0xff]  ;;  %v4398_v21 = vld [vmem:[%s5824_s2 + $0x30] sm:$0xff] }
   0x9   :  { %171 = vmatpush1.msra.mxu0 %v65_v10  ;;  %727 = vmatprep.subr.mxu1 %v4352_v14  ;;  %v4405_v22 = vld [vmem:[%s5824_s2 + $0x28] sm:$0xff]  ;;  %v4413_v23 = vld [vmem:[%s5824_s2 + $0x20] sm:$0xff]  ;;  %v50_v24 = vld [vmem:[%s5825_s0 + $0x18] sm:$0xff] }
   0xa   :  { %3543 = vmatmul.mubr.msk.f32.vlgmr.msra.gmra.mxu0 %vm85_vm1, %v47_v12  ;;  %403 = vmatprep.subr.mxu0 %v4320_v7  ;;  %v4423_v25 = vld [vmem:[%s5824_s2 + $0x18] sm:$0xff]  ;;  %v4429_v26 = vld [vmem:[%s5824_s2 + $0x10] sm:$0xff]  ;;  %v4436_v27 = vld [vmem:[%s5824_s2 + $0x8] sm:$0xff] }
   0xb   :  { %404 = vmatpush1.msra.mxu0 %v4328_v9  ;;  %210 = vmatprep.mubr.f32.mxu0 %v5838_v3  ;;  %v4444_v28 = vld [vmem:[%s5824_s2] sm:$0xff]  ;;  %v52_v30 = vld [vmem:[%s5825_s0 + $0x28] sm:$0xff]  ;;  %v53_v31 = vld [vmem:[%s5825_s0 + $0x30] sm:$0xff] }
   0xc   :  { %405 = vmatprep.subr.mxu0 %v4337_v11  ;;  %728 = vmatpush1.msra.mxu1 %v4366_v16  ;;  %v51_v29 = vld [vmem:[%s5825_s0 + $0x20] sm:$0xff]  ;;  %v54_v32 = vld [vmem:[%s5825_s0 + $0x38] sm:$0xff]  ;;  %v56_v34 = vld [vmem:[%s5825_s0 + $0x48] sm:$0xff] }
   0xd   :  { %406 = vmatpush1.msra.mxu0 %v4346_v13  ;;  %729 = vmatprep.subr.mxu1 %v4372_v17  ;;  %v55_v33 = vld [vmem:[%s5825_s0 + $0x40] sm:$0xff]  ;;  %v57_v35 = vld [vmem:[%s5825_s0 + $0x50] sm:$0xff]  ;;  %v58_v36 = vld [vmem:[%s5825_s0 + $0x58] sm:$0xff] }
   0xe   :  { %3544 = vmatmul.mubr.msk.f32.gmra.mxu0 %vm85_vm1, %v48_v15  ;;  %407 = vmatprep.subr.mxu0 %v4352_v14  ;;  %v59_v37 = vld [vmem:[%s5825_s0 + $0x60] sm:$0xff]  ;;  %v60_v38 = vld [vmem:[%s5825_s0 + $0x68] sm:$0xff]  ;;  %v61_v39 = vld [vmem:[%s5825_s0 + $0x70] sm:$0xff] }
   0xf   :  { %216 = vmatprep.mubr.f32.mxu0 %v5838_v3  ;;  %408 = vmatpush1.msra.mxu0 %v4366_v16  ;;  %v62_v40 = vld [vmem:[%s5825_s0 + $0x78] sm:$0xff]  ;;  %v63_v41 = vld [vmem:[%s5825_s0 + $0x80] sm:$0xff]  ;;  %v64_v42 = vld [vmem:[%s5825_s0 + $0x88] sm:$0xff] }
  0x10   :  { %409 = vmatprep.subr.mxu0 %v4372_v17  ;;  %730 = vmatpush1.msra.mxu1 %v4382_v18  ;;  %v372_v43 = vld [vmem:[#allocation3] sm:$0xff]  ;;  %v373_v44 = vld [vmem:[#allocation3 + $0x8] sm:$0xff]  ;;  %v374_v45 = vld [vmem:[#allocation3 + $0x10] sm:$0xff] }
  0x11   :  { %410 = vmatpush1.msra.mxu0 %v4382_v18  ;;  %731 = vmatprep.subr.mxu1 %v4392_v20 }
  0x12   :  { %3545 = vmatmul.mubr.msk.f32.gmra.mxu0 %vm85_vm1, %v49_v19  ;;  %411 = vmatprep.subr.mxu0 %v4392_v20  ;;  %v75_v19 = vlaneseq }
  0x13   :  { %222 = vmatprep.mubr.f32.mxu0 %v5838_v3  ;;  %412 = vmatpush1.msra.mxu0 %v4398_v21 }
  0x14   :  { %413 = vmatprep.subr.mxu0 %v4405_v22  ;;  %732 = vmatpush1.msra.mxu1 %v4398_v21 }
  0x15   :  { %414 = vmatpush1.msra.mxu0 %v4413_v23  ;;  %733 = vmatprep.subr.mxu1 %v4405_v22 }
  0x16   :  { %3546 = vmatmul.mubr.msk.f32.gmra.mxu0 %vm85_vm1, %v50_v24  ;;  %415 = vmatprep.subr.mxu0 %v4423_v25 }
  0x17   :  { %228 = vmatprep.mubr.f32.mxu0 %v5838_v3  ;;  %416 = vmatpush1.msra.mxu0 %v4429_v26 }
  0x18   :  { %417 = vmatprep.subr.mxu0 %v4436_v27  ;;  %734 = vmatpush1.msra.mxu1 %v4413_v23 }
  0x19   :  { %418 = vmatpush1.msra.mxu0 %v4444_v28  ;;  %735 = vmatprep.subr.mxu1 %v4423_v25 }
  0x1a   :  { %3547 = vmatmul.mubr.msk.f32.gmra.mxu0 %vm85_vm1, %v51_v29  ;;  %736 = vmatpush1.msra.mxu1 %v4429_v26 }
  0x1b   :  { %234 = vmatprep.mubr.f32.mxu0 %v5838_v3  ;;  %737 = vmatprep.subr.mxu1 %v4436_v27 }
  0x1c   :  { %738 = vmatpush1.msra.mxu1 %v4444_v28  ;;  %1677 = vmatprep.subr.mxu0 %v4320_v7 }
  0x1d   :  { %1043 = vmatprep.subr.mxu1 %v4320_v7 }
  0x1e   :  { %3548 = vmatmul.mubr.msk.f32.gmra.mxu0 %vm85_vm1, %v52_v30  ;;  %v76_v30 = vshrl.u32 %v75_v19, 7 }
  0x1f   :  { %240 = vmatprep.mubr.f32.mxu0 %v5838_v3 }
  0x22   :  { %3549 = vmatmul.mubr.msk.f32.gmra.mxu0 %vm85_vm1, %v53_v31 }
  0x23   :  { %246 = vmatprep.mubr.f32.mxu0 %v5838_v3 }
  0x26   :  { %3550 = vmatmul.mubr.msk.f32.gmra.mxu0 %vm85_vm1, %v54_v32 }
  0x27   :  { %252 = vmatprep.mubr.f32.mxu0 %v5838_v3 }
  0x2a   :  { %3551 = vmatmul.mubr.msk.f32.gmra.mxu0 %vm85_vm1, %v55_v33  ;;  %v77_v33 = vsub.s32 0, %v76_v30 }
  0x2b   :  { %258 = vmatprep.mubr.f32.mxu0 %v5838_v3 }
  0x2e   :  { %3552 = vmatmul.mubr.msk.f32.gmra.mxu0 %vm85_vm1, %v56_v34  ;;  %v73_v34 = vld [vmem:[%s5826_s3] sm:$0x3]  ;;  %s4202_s3 = smov 64  }
  0x2f   :  { %264 = vmatprep.mubr.f32.mxu0 %v5838_v3 }
  0x32   :  { %3553 = vmatmul.mubr.msk.f32.gmra.mxu0 %vm85_vm1, %v57_v35 }
  0x33   :  { %270 = vmatprep.mubr.f32.mxu0 %v5838_v3 }
  0x36   :  { %3554 = vmatmul.mubr.msk.f32.gmra.mxu0 %vm85_vm1, %v58_v36 }
  0x37   :  { %276 = vmatprep.mubr.f32.mxu0 %v5838_v3 }
  0x3a   :  { %3555 = vmatmul.mubr.msk.f32.gmra.mxu0 %vm85_vm1, %v59_v37  ;;  %v4610_v37 = vrot.slane %v73_v34, %v77_v33 }
  0x3b   :  { %282 = vmatprep.mubr.f32.mxu0 %v5838_v3 }
  0x3e   :  { %3556 = vmatmul.mubr.msk.f32.gmra.mxu0 %vm85_vm1, %v60_v38  ;;  %v81_v38 = vsub.s32 1, %v76_v30 }
  0x3f   :  { %288 = vmatprep.mubr.f32.mxu0 %v5838_v3 }
  0x42   :  { %3557 = vmatmul.mubr.msk.f32.gmra.mxu0 %vm85_vm1, %v61_v39 }
  0x43   :  { %294 = vmatprep.mubr.f32.mxu0 %v5838_v3 }
  0x46   :  { %3558 = vmatmul.mubr.msk.f32.gmra.mxu0 %vm85_vm1, %v62_v40 }
  0x47   :  { %300 = vmatprep.mubr.f32.mxu0 %v5838_v3 }
  0x4a   :  { %3559 = vmatmul.mubr.msk.f32.gmra.mxu0 %vm85_vm1, %v63_v41 }
  0x4b   :  { %306 = vmatprep.mubr.f32.mxu0 %v5838_v3 }
  0x4e   :  { %3560 = vmatmul.mubr.msk.f32.gmra.mxu0 %vm85_vm1, %v64_v42  ;;  %v4615_v42 = vrot.slane %v73_v34, %v81_v38 }
  0x4f   :  { %451 = vmatprep.mubr.f32.mxu0 %v5838_v3 }
  0x52   :  { %3561 = vmatmul.mubr.msk.f32.vlgmr.msra.gmra.mxu0 %vm365_vm0, %v372_v43 }
  0x53   :  { %457 = vmatprep.mubr.f32.mxu0 %v5838_v3  ;;  %1678 = vmatpush1.msra.mxu0 %v4328_v9 }
  0x54   :  { %1679 = vmatprep.subr.mxu0 %v4337_v11 }
  0x55   :  { %1680 = vmatpush1.msra.mxu0 %v4346_v13 }
  0x56   :  { %3562 = vmatmul.mubr.msk.f32.gmra.mxu0 %vm365_vm0, %v373_v44  ;;  %1681 = vmatprep.subr.mxu0 %v4352_v14 }
  0x57   :  { %463 = vmatprep.mubr.f32.mxu0 %v5838_v3  ;;  %1682 = vmatpush1.msra.mxu0 %v4366_v16 }
  0x58   :  { %1683 = vmatprep.subr.mxu0 %v4372_v17 }
  0x59   :  { %1684 = vmatpush1.msra.mxu0 %v4382_v18 }
  0x5a   :  { %3563 = vmatmul.mubr.msk.f32.gmra.mxu0 %vm365_vm0, %v374_v45  ;;  %1685 = vmatprep.subr.mxu0 %v4392_v20 }
  0x5b   :  { %1686 = vmatpush1.msra.mxu0 %v4398_v21  ;;  %1725 = vmatprep.mubr.f32.mxu0 %v5838_v3 }
  0x5c   :  { %1687 = vmatprep.subr.mxu0 %v4405_v22 }
  0x5d   :  { %1688 = vmatpush1.msra.mxu0 %v4413_v23 }
  0x5e   :  { %1689 = vmatprep.subr.mxu0 %v4423_v25 }
  0x5f   :  { %1690 = vmatpush1.msra.mxu0 %v4429_v26 }
  0x60   :  { %1691 = vmatprep.subr.mxu0 %v4436_v27 }
  0x61   :  { %1692 = vmatpush1.msra.mxu0 %v4444_v28 }
  0x62   :  { %3700 = vmatprep.subr.mxu0 %v5838_v3 }
  0xca   :  { %v206_v46 = vpop.f32.mrf.mxu0 }
  0xcb   :  { %v207_v41 = vadd.f32 %v206_v46, %v4610_v37 }
  0xcc   :  { %v4549_v47 = vpop.f32.mrf.mxu0 }
  0xcd   :  { %5840 = vst [vmem:[#allocation9_spill] sm:$0xff] %v4549_v47 }
  0xce   :  { %v212_v48 = vpop.f32.mrf.mxu0 }
  0xcf   :  { %v213_v3 = vadd.f32 %v212_v48, %v4610_v37 }
  0xd0   :  { %v4551_v49 = vpop.f32.mrf.mxu0 }
  0xd1   :  { %5841 = vst [vmem:[#allocation10_spill] sm:$0xff] %v4551_v49 }
  0xd2   :  { %v218_v50 = vpop.f32.mrf.mxu0 }
  0xd4   :  { %v4553_v51 = vpop.f32.mrf.mxu0 }
  0xd5   :  { %5842 = vst [vmem:[#allocation11_spill] sm:$0xff] %v4553_v51 }
  0xd6   :  { %v4555_v52 = vpop.f32.mrf.mxu0 }
  0xd8   :  { %v4557_v53 = vpop.f32.mrf.mxu0 }
  0xda   :  { %v4559_v54 = vpop.f32.mrf.mxu0 }
  0xdc   :  { %v4561_v55 = vpop.f32.mrf.mxu0 }
  0xdd   :  { %5843 = vst [vmem:[#allocation12_spill] sm:$0xff] %v4561_v55 }
  0xde   :  { %v4563_v56 = vpop.f32.mrf.mxu0 }
  0xe0   :  { %v4565_v57 = vpop.f32.mrf.mxu0 }
  0xe1   :  { %5844 = vst [vmem:[#allocation13_spill] sm:$0xff] %v4565_v57 }
  0xe2   :  { %v4567_v58 = vpop.f32.mrf.mxu0 }
  0xe4   :  { %v4569_v59 = vpop.f32.mrf.mxu0 }
  0xe6   :  { %v4571_v60 = vpop.f32.mrf.mxu0 }
  0xe8   :  { %v4573_v61 = vpop.f32.mrf.mxu0 }
  0xea   :  { %v4575_v62 = vpop.f32.mrf.mxu0 }
  0xec   :  { %v4577_v63 = vpop.f32.mrf.mxu0 }
  0xee   :  { %v4579_v0 = vpop.f32.mrf.mxu0 }
  0xf0   :  { %v4581_v1 = vpop.f32.mrf.mxu0 }
  0xf2   :  { %v4583_v2 = vpop.f32.mrf.mxu0 }
  0xf4   :  { %v4585_v4 = vpop.f32.mrf.mxu0 }
  0xf6   :  { %v4587_v5 = vpop.f32.mrf.mxu0 }
  0xf8   :  { %v4589_v6 = vpop.f32.mrf.mxu0 }
  0xfa   :  { %v4591_v8 = vpop.f32.mrf.mxu0 }
  0xfc   :  { %v4593_v10 = vpop.f32.mrf.mxu0 }
  0xfe   :  { %v4595_v12 = vpop.f32.mrf.mxu0 }
 0x100   :  { %v4597_v15 = vpop.f32.mrf.mxu0 }
 0x102   :  { %v4599_v24 = vpop.f32.mrf.mxu0 }
 0x103   :  { %5845 = vst [vmem:[#allocation14_spill] sm:$0xff] %v4599_v24 }
 0x104   :  { %v4601_v29 = vpop.f32.mrf.mxu0 }
 0x106   :  { %v4603_v31 = vpop.f32.mrf.mxu0 }
 0x107   :  { %5846 = vst [vmem:[#allocation15_spill] sm:$0xff] %v4603_v31 }
 0x108   :  { %v298_v32 = vpop.f32.mrf.mxu0 }
 0x109   :  { %v299_v44 = vadd.f32 %v298_v32, %v4615_v42 }
 0x10a   :  { %v4608_v35 = vpop.f32.mrf.mxu0 }
 0x10b   :  { %5847 = vst [vmem:[#allocation16_spill] sm:$0xff] %v4608_v35 }
 0x10c   :  { %v304_v36 = vpop.f32.mrf.mxu0 }
 0x10d   :  { %v305_v33 = vadd.f32 %v304_v36, %v4615_v42  ;;  %v4627_v36 = vld [vmem:[#allocation4] sm:$0xff] }
 0x10e   :  { %v4612_v39 = vpop.f32.mrf.mxu0 }
 0x10f   :  { %5848 = vst [vmem:[#allocation17_spill] sm:$0xff] %v4612_v39  ;;  %v219_v39 = vadd.f32 %v218_v50, %v4610_v37 }
 0x110   :  { %v310_v40 = vpop.f32.mrf.mxu0 }
 0x111   :  { %v311_v32 = vadd.f32 %v310_v40, %v4615_v42 }
 0x112   :  { %v453_v43 = vpop.f32.mrf.mxu0 }
 0x113   :  { %v476_v45 = vadd.f32 %v453_v43, %v207_v41 }
 0x114   :  { %v455_v19 = vpop.f32.mrf.mxu0 }
 0x115   :  { %3833 = vtanh.f32 %v476_v45  ;;  %v485_v51 = vadd.f32 %v455_v19, %v299_v44  ;;  %v3564_v40 = vmul.f32 -1.442695, %v476_v45 }
 0x116   :  { %v459_v49 = vpop.f32.mrf.mxu0 }
 0x117   :  { %v477_v30 = vadd.f32 %v459_v49, %v213_v3  ;;  %3835 = vtanh.f32 %v485_v51  ;;  %v3567_v44 = vmul.f32 -1.442695, %v485_v51 }
 0x118   :  { %v461_v35 = vpop.f32.mrf.mxu0 }
 0x119   :  { %v486_v46 = vadd.f32 %v461_v35, %v305_v33  ;;  %3837 = vtanh.f32 %v477_v30  ;;  %v3565_v33 = vmul.f32 -1.442695, %v477_v30 }
 0x11a   :  { %v465_v34 = vpop.f32.mrf.mxu0 }
 0x11b   :  { %v478_v38 = vadd.f32 %v465_v34, %v219_v39  ;;  %3839 = vtanh.f32 %v486_v46  ;;  %v3568_v19 = vmul.f32 -1.442695, %v486_v46 }
 0x11c   :  { %v467_v41 = vpop.f32.mrf.mxu0 }
 0x11d   :  { %3841 = vtanh.f32 %v478_v38  ;;  %v487_v48 = vadd.f32 %v467_v41, %v311_v32  ;;  %v3566_v34 = vmul.f32 -1.442695, %v478_v38 }
 0x11f   :  { %3843 = vtanh.f32 %v487_v48  ;;  %v3569_v32 = vmul.f32 -1.442695, %v487_v48 }
 0x120   :  { %3845 = vpow2.f32 %v3564_v40 }
 0x121   :  { %3847 = vpow2.f32 %v3567_v44 }
 0x122   :  { %v3834_v43 = vpop.eup %3833  ;;  %3849 = vpow2.f32 %v3568_v19 }
 0x123   :  { %527 = vrot.lane.b32.xlu0 %v3834_v43, %s4202_s3  ;;  %3851 = vpow2.f32 %v3565_v33 }
 0x124   :  { %v3836_v3 = vpop.eup %3835  ;;  %3853 = vpow2.f32 %v3566_v34 }
 0x125   :  { %3855 = vpow2.f32 %v3569_v32 }
 0x126   :  { %v3838_v49 = vpop.eup %3837 }
 0x127   :  { %599 = vrot.lane.b32.xlu0 %v3836_v3, %s4202_s3  ;;  %529 = vrot.lane.b32.xlu1 %v3838_v49, %s4202_s3 }
 0x128   :  { %v3840_v50 = vpop.eup %3839 }
 0x12a   :  { %v3842_v35 = vpop.eup %3841 }
 0x12b   :  { %601 = vrot.lane.b32.xlu1 %v3840_v50, %s4202_s3  ;;  %531 = vrot.lane.b32.xlu0 %v3842_v35, %s4202_s3 }
 0x12c   :  { %v3844_v39 = vpop.eup %3843 }
 0x12d   :  { %v3846_v41 = vpop.eup %3845 }
 0x12e   :  { %v497_v43 = vadd.f32 1.0, %v3846_v41  ;;  %v3848_v3 = vpop.eup %3847  ;;  %v376_v41 = vld [vmem:[#allocation4 + $0x8] sm:$0xff] }
 0x12f   :  { %603 = vrot.lane.b32.xlu1 %v3844_v39, %s4202_s3  ;;  %512 = vrot.lane.b32.xlu0 %v4627_v36, %s4203_s30  ;;  %v581_v49 = vadd.f32 1.0, %v3848_v3  ;;  %v3850_v50 = vpop.eup %3849 }
 0x130   :  { %3857 = vrcp.f32 %v497_v43  ;;  %v3852_v35 = vpop.eup %3851  ;;  %v582_v45 = vadd.f32 1.0, %v3850_v50  ;;  %v377_v50 = vld [vmem:[#allocation4 + $0x10] sm:$0xff] }
 0x131   :  { %3859 = vrcp.f32 %v581_v49  ;;  %v3854_v39 = vpop.eup %3853  ;;  %v498_v51 = vadd.f32 1.0, %v3852_v35 }
 0x132   :  { %v3856_v40 = vpop.eup %3855  ;;  %3861 = vrcp.f32 %v582_v45  ;;  %v499_v30 = vadd.f32 1.0, %v3854_v39 }
 0x133   :  { %3863 = vrcp.f32 %v498_v51  ;;  %v583_v46 = vadd.f32 1.0, %v3856_v40 }
 0x134   :  { %3865 = vrcp.f32 %v499_v30 }
 0x135   :  { %3867 = vrcp.f32 %v583_v46 }
 0x13d   :  { %v4632_v38 = vpop.eup %3857 }
 0x13e   :  { %v4636_v19 = vpop.eup %3859 }
 0x13f   :  { %v4641_v43 = vpop.eup %3861 }
 0x140   :  { %v3864_v45 = vpop.eup %3863 }
 0x141   :  { %v4646_v39 = vpop.eup %3865 }
 0x142   :  { %v3868_v46 = vpop.eup %3867 }
 0x195   :  { %v528_v48 = vpop.permute.xlu0 %527 }
 0x196   :  { %v536_v44 = vmul.f32 %v4632_v38, %v528_v48 }
 0x198   :  { %542 = vrot.lane.b32.xlu1 %v536_v44, %s4203_s30 }
 0x199   :  { %v600_v33 = vpop.permute.xlu0 %599  ;;  %v530_v34 = vpop.permute.xlu1 %529 }
 0x19a   :  { %v608_v32 = vmul.f32 %v4636_v19, %v600_v33  ;;  %v537_v51 = vmul.f32 %v3864_v45, %v530_v34  ;;  %v593_v34 = vmul.f32 %v4636_v19, %v4627_v36 }
 0x19c   :  { %614 = vrot.lane.b32.xlu0 %v608_v32, %s4203_s30  ;;  %514 = vrot.lane.b32.xlu1 %v376_v41, %s4203_s30 }
 0x19d   :  { %v602_v3 = vpop.permute.xlu1 %601  ;;  %v532_v35 = vpop.permute.xlu0 %531 }
 0x19e   :  { %v609_v49 = vmul.f32 %v4641_v43, %v602_v3  ;;  %v538_v40 = vmul.f32 %v4646_v39, %v532_v35 }
 0x1a0   :  { %516 = vrot.lane.b32.xlu0 %v377_v50, %s4203_s30  ;;  %616 = vrot.lane.b32.xlu1 %v609_v49, %s4203_s30 }
 0x1a1   :  { %v604_v30 = vpop.permute.xlu1 %603  ;;  %v513_v44 = vpop.permute.xlu0 %512 }
 0x1a2   :  { %v610_v48 = vmul.f32 %v3868_v46, %v604_v30  ;;  %v521_v33 = vmul.f32 %v4632_v38, %v513_v44 }
 0x1a4   :  { %544 = vrot.lane.b32.xlu0 %v537_v51, %s4203_s30  ;;  %546 = vrot.lane.b32.xlu1 %v538_v40, %s4203_s30  ;;  %v594_v40 = vmul.f32 %v4641_v43, %v376_v41 }
 0x1a8   :  { %618 = vrot.lane.b32.xlu0 %v610_v48, %s4203_s30 }
 0x20a   :  { %v543_v32 = vpop.permute.xlu1 %542 }
 0x20b   :  { %v551_v3 = vadd.f32 %v543_v32, %v521_v33 }
 0x20d   :  { %3869 = vtanh.f32 %v551_v3 }
 0x20e   :  { %v615_v49 = vpop.permute.xlu0 %614  ;;  %v515_v35 = vpop.permute.xlu1 %514 }
 0x20f   :  { %v4655_v47 = vadd.f32 %v615_v49, %v593_v34  ;;  %v522_v31 = vmul.f32 %v3864_v45, %v515_v35  ;;  %v595_v34 = vmul.f32 %v3868_v46, %v377_v50 }
 0x211   :  { %3871 = vtanh.f32 %v4655_v47 }
 0x212   :  { %v517_v51 = vpop.permute.xlu0 %516  ;;  %v617_v30 = vpop.permute.xlu1 %616 }
 0x213   :  { %v4659_v48 = vadd.f32 %v617_v30, %v594_v40  ;;  %v523_v44 = vmul.f32 %v4646_v39, %v517_v51 }
 0x215   :  { %3873 = vtanh.f32 %v4659_v48 }
 0x216   :  { %v545_v33 = vpop.permute.xlu0 %544  ;;  %v547_v36 = vpop.permute.xlu1 %546 }
 0x217   :  { %v552_v32 = vadd.f32 %v545_v33, %v522_v31  ;;  %v4663_v57 = vadd.f32 %v547_v36, %v523_v44 }
 0x219   :  { %3875 = vtanh.f32 %v552_v32 }
 0x21a   :  { %v3870_v49 = vpop.eup %3869  ;;  %v619_v24 = vpop.permute.xlu0 %618  ;;  %3877 = vtanh.f32 %v4663_v57 }
 0x21b   :  { %v4665_v55 = vadd.f32 %v619_v24, %v595_v34  ;;  %560 = vrot.lane.b32.xlu1 %v3870_v49, %s4202_s3 }
 0x21d   :  { %3879 = vtanh.f32 %v4665_v55 }
 0x21e   :  { %v3872_v41 = vpop.eup %3871 }
 0x21f   :  { %632 = vrot.lane.b32.xlu0 %v3872_v41, %s4202_s3 }
 0x222   :  { %v3874_v35 = vpop.eup %3873 }
 0x223   :  { %634 = vrot.lane.b32.xlu0 %v3874_v35, %s4202_s3 }
 0x226   :  { %v3876_v31 = vpop.eup %3875 }
 0x227   :  { %562 = vrot.lane.b32.xlu1 %v3876_v31, %s4202_s3  ;;  %v3878_v50 = vpop.eup %3877 }
 0x22a   :  { %v3880_v51 = vpop.eup %3879 }
 0x22b   :  { %636 = vrot.lane.b32.xlu0 %v3880_v51, %s4202_s3  ;;  %564 = vrot.lane.b32.xlu1 %v3878_v50, %s4202_s3 }
 0x28d   :  { %v561_v24 = vpop.permute.xlu1 %560 }
 0x28e   :  { %v569_v40 = vmul.f32 %v4632_v38, %v561_v24  ;;  %v5849_v24 = vmov 0.0  }
 0x290   :  { %647 = vrot.lane.b32.xlu1 %v569_v40, %s4203_s30 }
 0x291   :  { %v633_v30 = vpop.permute.xlu0 %632 }
 0x292   :  { %v641_v44 = vmul.f32 %v4636_v19, %v633_v30 }
 0x294   :  { %659 = vrot.lane.b32.xlu0 %v641_v44, %s4202_s3 }
 0x295   :  { %v635_v33 = vpop.permute.xlu0 %634 }
 0x296   :  { %v642_v36 = vmul.f32 %v4641_v43, %v635_v33 }
 0x298   :  { %661 = vrot.lane.b32.xlu0 %v642_v36, %s4202_s3 }
 0x299   :  { %v563_v34 = vpop.permute.xlu1 %562 }
 0x29a   :  { %v570_v49 = vmul.f32 %v3864_v45, %v563_v34 }
 0x29c   :  { %649 = vrot.lane.b32.xlu1 %v570_v49, %s4203_s30 }
 0x29d   :  { %v637_v41 = vpop.permute.xlu0 %636  ;;  %v565_v35 = vpop.permute.xlu1 %564 }
 0x29e   :  { %v643_v31 = vmul.f32 %v3868_v46, %v637_v41  ;;  %v571_v38 = vmul.f32 %v4646_v39, %v565_v35 }
 0x2a0   :  { %663 = vrot.lane.b32.xlu0 %v643_v31, %s4202_s3  ;;  %651 = vrot.lane.b32.xlu1 %v571_v38, %s4203_s30 }
 0x2a4   :  { %679 = vrot.lane.b32.xlu0 %v552_v32, %s4204_s15  ;;  %677 = vrot.lane.b32.xlu1 %v551_v3, %s4204_s15 }
 0x302   :  { %v648_v19 = vpop.permute.xlu1 %647 }
 0x306   :  { %v660_v43 = vpop.permute.xlu0 %659 }
 0x307   :  { %v668_v45 = vsel %vm85_vm1, %v648_v19, %v660_v43 }
 0x308   :  { %671 = vst.msk [vmem:[#allocation3] sm:$0xff] %vm365_vm0, %v668_v45 }
 0x30a   :  { %v662_v50 = vpop.permute.xlu0 %661 }
 0x30e   :  { %v650_v51 = vpop.permute.xlu1 %649 }
 0x30f   :  { %v669_v46 = vsel %vm85_vm1, %v650_v51, %v662_v50  ;;  %v692_v39 = vld [vmem:[#allocation3] sm:$0xff] }
 0x310   :  { %672 = vst.msk [vmem:[#allocation3 + $0x8] sm:$0xff] %vm365_vm0, %v669_v46  ;;  %3570 = vmatmul.mubr.msk.f32.vlgmr.msra.gmra.mxu1 %vm365_vm0, %v692_v39 }
 0x311   :  { %777 = vmatprep.mubr.f32.mxu1 %v5849_v24  ;;  %1044 = vmatpush1.msra.mxu1 %v4328_v9 }
 0x312   :  { %v664_v3 = vpop.permute.xlu0 %663  ;;  %v652_v32 = vpop.permute.xlu1 %651  ;;  %1045 = vmatprep.subr.mxu1 %v4337_v11 }
 0x313   :  { %v670_v40 = vsel %vm85_vm1, %v652_v32, %v664_v3  ;;  %1046 = vmatpush1.msra.mxu1 %v4346_v13 }
 0x314   :  { %673 = vst.msk [vmem:[#allocation3 + $0x10] sm:$0xff] %vm365_vm0, %v670_v40  ;;  %1047 = vmatprep.subr.mxu1 %v4352_v14  ;;  %v225_v14 = vadd.f32 %v4555_v52, %v4610_v37  ;;  %v293_v52 = vadd.f32 %v4601_v29, %v4615_v42 }
 0x315   :  { %1048 = vmatpush1.msra.mxu1 %v4366_v16 }
 0x316   :  { %v680_v30 = vpop.permute.xlu0 %679  ;;  %v678_v44 = vpop.permute.xlu1 %677  ;;  %1049 = vmatprep.subr.mxu1 %v4372_v17  ;;  %v281_v17 = vadd.f32 %v4593_v10, %v4615_v42 }
 0x317   :  { %v687_v9 = vsel %vm85_vm1, %v680_v30, %v4659_v48  ;;  %v686_v11 = vsel %vm85_vm1, %v678_v44, %v4655_v47  ;;  %v693_v33 = vld [vmem:[#allocation3 + $0x8] sm:$0xff]  ;;  %1050 = vmatpush1.msra.mxu1 %v4382_v18 }
 0x318   :  { %690 = vst.msk [vmem:[#allocation4 + $0x8] sm:$0xff] %vm365_vm0, %v687_v9  ;;  %689 = vst.msk [vmem:[#allocation4] sm:$0xff] %vm365_vm0, %v686_v11  ;;  %3571 = vmatmul.mubr.msk.f32.gmra.mxu1 %vm365_vm0, %v693_v33  ;;  %1051 = vmatprep.subr.mxu1 %v4392_v20 }
 0x319   :  { %783 = vmatprep.mubr.f32.mxu1 %v5849_v24  ;;  %1052 = vmatpush1.msra.mxu1 %v4398_v21 }
 0x31a   :  { %1053 = vmatprep.subr.mxu1 %v4405_v22  ;;  %v231_v22 = vadd.f32 %v4559_v54, %v4610_v37 }
 0x31b   :  { %v694_v13 = vld [vmem:[#allocation3 + $0x10] sm:$0xff]  ;;  %1054 = vmatpush1.msra.mxu1 %v4413_v23 }
 0x31c   :  { %3572 = vmatmul.mubr.msk.f32.gmra.mxu1 %vm365_vm0, %v694_v13  ;;  %1055 = vmatprep.subr.mxu1 %v4423_v25  ;;  %v287_v25 = vadd.f32 %v4597_v15, %v4615_v42 }
 0x31d   :  { %1056 = vmatpush1.msra.mxu1 %v4429_v26  ;;  %1091 = vmatprep.mubr.f32.mxu1 %v5849_v24 }
 0x31e   :  { %1057 = vmatprep.subr.mxu1 %v4436_v27  ;;  %v237_v27 = vadd.f32 %v4563_v56, %v4610_v37 }
 0x31f   :  { %1058 = vmatpush1.msra.mxu1 %v4444_v28  ;;  %v4741_v41 = vld [vmem:[#allocation4] sm:$0xff] }
 0x320   :  { %1363 = vmatprep.subr.mxu1 %v4320_v7 }
 0x3d0   :  { %v773_v16 = vpop.f32.mrf.mxu1 }
 0x3d1   :  { %v796_v18 = vadd.f32 %v773_v16, %v225_v14 }
 0x3d2   :  { %v775_v20 = vpop.f32.mrf.mxu1 }
 0x3d3   :  { %3881 = vtanh.f32 %v796_v18  ;;  %v805_v21 = vadd.f32 %v775_v20, %v281_v17  ;;  %v3573_v35 = vmul.f32 -1.442695, %v796_v18 }
 0x3d5   :  { %3883 = vtanh.f32 %v805_v21  ;;  %v3576_v31 = vmul.f32 -1.442695, %v805_v21 }
 0x3d8   :  { %v779_v23 = vpop.f32.mrf.mxu1 }
 0x3d9   :  { %v797_v7 = vadd.f32 %v779_v23, %v231_v22  ;;  %v696_v22 = vld [vmem:[#allocation4 + $0x8] sm:$0xff] }
 0x3da   :  { %v781_v26 = vpop.f32.mrf.mxu1 }
 0x3db   :  { %3885 = vtanh.f32 %v797_v7  ;;  %v806_v28 = vadd.f32 %v781_v26, %v287_v25  ;;  %v3574_v38 = vmul.f32 -1.442695, %v797_v7 }
 0x3dc   :  { %v785_v47 = vpop.f32.mrf.mxu1 }
 0x3dd   :  { %v798_v10 = vadd.f32 %v785_v47, %v237_v27  ;;  %3887 = vtanh.f32 %v806_v28 }
 0x3de   :  { %v787_v48 = vpop.f32.mrf.mxu1 }
 0x3df   :  { %v807_v36 = vadd.f32 %v787_v48, %v293_v52  ;;  %3889 = vtanh.f32 %v798_v10  ;;  %v3575_v19 = vmul.f32 -1.442695, %v798_v10 }
 0x3e0   :  { %v3882_v54 = vpop.eup %3881 }
 0x3e1   :  { %847 = vrot.lane.b32.xlu1 %v3882_v54, %s4202_s3  ;;  %3891 = vtanh.f32 %v807_v36  ;;  %v3578_v45 = vmul.f32 -1.442695, %v807_v36 }
 0x3e2   :  { %v3884_v15 = vpop.eup %3883  ;;  %3893 = vpow2.f32 %v3573_v35 }
 0x3e3   :  { %919 = vrot.lane.b32.xlu0 %v3884_v15, %s4202_s3  ;;  %3895 = vpow2.f32 %v3576_v31 }
 0x3e5   :  { %681 = vrot.lane.b32.xlu1 %v4663_v57, %s4204_s15  ;;  %v3577_v57 = vmul.f32 -1.442695, %v806_v28 }
 0x3e7   :  { %3897 = vpow2.f32 %v3577_v57 }
 0x3e8   :  { %v3886_v56 = vpop.eup %3885  ;;  %3899 = vpow2.f32 %v3574_v38 }
 0x3e9   :  { %849 = vrot.lane.b32.xlu0 %v3886_v56, %s4202_s3  ;;  %3901 = vpow2.f32 %v3575_v19 }
 0x3ea   :  { %v3888_v34 = vpop.eup %3887  ;;  %3903 = vpow2.f32 %v3578_v45 }
 0x3eb   :  { %921 = vrot.lane.b32.xlu1 %v3888_v34, %s4202_s3 }
 0x3ec   :  { %v3890_v29 = vpop.eup %3889 }
 0x3ed   :  { %851 = vrot.lane.b32.xlu0 %v3890_v29, %s4202_s3 }
 0x3ee   :  { %v3892_v49 = vpop.eup %3891 }
 0x3ef   :  { %923 = vrot.lane.b32.xlu1 %v3892_v49, %s4202_s3  ;;  %v3894_v43 = vpop.eup %3893 }
 0x3f0   :  { %v3896_v50 = vpop.eup %3895  ;;  %v817_v51 = vadd.f32 1.0, %v3894_v43 }
 0x3f1   :  { %832 = vrot.lane.b32.xlu0 %v4741_v41, %s4203_s30  ;;  %v901_v46 = vadd.f32 1.0, %v3896_v50 }
 0x3f2   :  { %3905 = vrcp.f32 %v817_v51 }
 0x3f3   :  { %3907 = vrcp.f32 %v901_v46 }
 0x3f4   :  { %v3898_v39 = vpop.eup %3897 }
 0x3f5   :  { %v3900_v3 = vpop.eup %3899  ;;  %v902_v32 = vadd.f32 1.0, %v3898_v39 }
 0x3f6   :  { %v3902_v40 = vpop.eup %3901  ;;  %v818_v30 = vadd.f32 1.0, %v3900_v3 }
 0x3f7   :  { %3909 = vrcp.f32 %v902_v32  ;;  %v819_v44 = vadd.f32 1.0, %v3902_v40  ;;  %v3904_v9 = vpop.eup %3903 }
 0x3f8   :  { %3911 = vrcp.f32 %v818_v30  ;;  %v903_v14 = vadd.f32 1.0, %v3904_v9 }
 0x3f9   :  { %3913 = vrcp.f32 %v819_v44 }
 0x3fa   :  { %3915 = vrcp.f32 %v903_v14 }
 0x3ff   :  { %v4745_v11 = vpop.eup %3905 }
 0x400   :  { %v4748_v16 = vpop.eup %3907 }
 0x401   :  { %v913_v49 = vmul.f32 %v4748_v16, %v4741_v41 }
 0x404   :  { %v4757_v25 = vpop.eup %3909 }
 0x405   :  { %v3912_v47 = vpop.eup %3911  ;;  %v914_v38 = vmul.f32 %v4757_v25, %v696_v22 }
 0x453   :  { %v848_v33 = vpop.permute.xlu1 %847 }
 0x454   :  { %v856_v13 = vmul.f32 %v4745_v11, %v848_v33 }
 0x455   :  { %v920_v17 = vpop.permute.xlu0 %919 }
 0x456   :  { %862 = vrot.lane.b32.xlu1 %v856_v13, %s4203_s30  ;;  %v928_v18 = vmul.f32 %v4748_v16, %v920_v17 }
 0x457   :  { %v682_v20 = vpop.permute.xlu1 %681 }
 0x458   :  { %v688_v21 = vsel %vm85_vm1, %v682_v20, %v4665_v55  ;;  %934 = vrot.lane.b32.xlu0 %v928_v18, %s4203_s30  ;;  %v4762_v55 = vpop.eup %3913 }
 0x459   :  { %691 = vst.msk [vmem:[#allocation4 + $0x10] sm:$0xff] %vm365_vm0, %v688_v21  ;;  %v3916_v36 = vpop.eup %3915 }
 0x45a   :  { %834 = vrot.lane.b32.xlu1 %v696_v22, %s4203_s30 }
 0x45b   :  { %v850_v23 = vpop.permute.xlu0 %849 }
 0x45c   :  { %v857_v52 = vmul.f32 %v3912_v47, %v850_v23 }
 0x45d   :  { %v922_v7 = vpop.permute.xlu1 %921 }
 0x45e   :  { %v929_v26 = vmul.f32 %v4757_v25, %v922_v7 }
 0x45f   :  { %v852_v27 = vpop.permute.xlu0 %851 }
 0x460   :  { %v697_v28 = vld [vmem:[#allocation4 + $0x10] sm:$0xff]  ;;  %936 = vrot.lane.b32.xlu1 %v929_v26, %s4203_s30  ;;  %v858_v10 = vmul.f32 %v4762_v55, %v852_v27 }
 0x461   :  { %836 = vrot.lane.b32.xlu0 %v697_v28, %s4203_s30  ;;  %v924_v48 = vpop.permute.xlu1 %923  ;;  %v915_v32 = vmul.f32 %v3916_v36, %v697_v28 }
 0x462   :  { %v930_v54 = vmul.f32 %v3916_v36, %v924_v48 }
 0x463   :  { %v833_v15 = vpop.permute.xlu0 %832 }
 0x464   :  { %866 = vrot.lane.b32.xlu1 %v858_v10, %s4203_s30  ;;  %v841_v56 = vmul.f32 %v4745_v11, %v833_v15 }
 0x465   :  { %864 = vrot.lane.b32.xlu0 %v857_v52, %s4203_s30 }
 0x469   :  { %938 = vrot.lane.b32.xlu0 %v930_v54, %s4203_s30  ;;  %v4816_v54 = vld [vmem:[%s5824_s2 + $0x68] sm:$0xff] }
 0x4c8   :  { %v863_v34 = vpop.permute.xlu1 %862 }
 0x4c9   :  { %v871_v29 = vadd.f32 %v863_v34, %v841_v56  ;;  %v4822_v56 = vld [vmem:[%s5824_s2 + $0x60] sm:$0xff] }
 0x4ca   :  { %v935_v35 = vpop.permute.xlu0 %934 }
 0x4cb   :  { %3917 = vtanh.f32 %v871_v29  ;;  %v4771_v31 = vadd.f32 %v935_v35, %v913_v49  ;;  %v4836_v49 = vld [vmem:[%s5824_s2 + $0x50] sm:$0xff] }
 0x4cc   :  { %v835_v57 = vpop.permute.xlu1 %834 }
 0x4cd   :  { %3919 = vtanh.f32 %v4771_v31  ;;  %v842_v50 = vmul.f32 %v3912_v47, %v835_v57  ;;  %v4842_v57 = vld [vmem:[%s5824_s2 + $0x48] sm:$0xff] }
 0x4d2   :  { %v937_v19 = vpop.permute.xlu1 %936 }
 0x4d3   :  { %v837_v43 = vpop.permute.xlu0 %836  ;;  %v4775_v45 = vadd.f32 %v937_v19, %v914_v38  ;;  %v4848_v19 = vld [vmem:[%s5824_s2 + $0x40] sm:$0xff] }
 0x4d4   :  { %v843_v51 = vmul.f32 %v4762_v55, %v837_v43 }
 0x4d5   :  { %3921 = vtanh.f32 %v4775_v45 }
 0x4d6   :  { %v867_v39 = vpop.permute.xlu1 %866 }
 0x4d7   :  { %v865_v46 = vpop.permute.xlu0 %864  ;;  %v4780_v30 = vadd.f32 %v867_v39, %v843_v51  ;;  %v4862_v51 = vld [vmem:[%s5824_s2 + $0x30] sm:$0xff] }
 0x4d8   :  { %v3918_v41 = vpop.eup %3917  ;;  %v872_v3 = vadd.f32 %v865_v46, %v842_v50  ;;  %v4855_v50 = vld [vmem:[%s5824_s2 + $0x38] sm:$0xff] }
 0x4d9   :  { %880 = vrot.lane.b32.xlu1 %v3918_v41, %s4202_s3  ;;  %v4868_v41 = vld [vmem:[%s5824_s2 + $0x28] sm:$0xff] }
 0x4da   :  { %v3920_v40 = vpop.eup %3919  ;;  %3923 = vtanh.f32 %v872_v3 }
 0x4db   :  { %v939_v44 = vpop.permute.xlu0 %938  ;;  %952 = vrot.lane.b32.xlu0 %v3920_v40, %s4202_s3 }
 0x4dc   :  { %v4783_v9 = vadd.f32 %v939_v44, %v915_v32  ;;  %v4876_v32 = vld [vmem:[%s5824_s2 + $0x20] sm:$0xff] }
 0x4de   :  { %3925 = vtanh.f32 %v4783_v9 }
 0x4df   :  { %3927 = vtanh.f32 %v4780_v30 }
 0x4e2   :  { %v3922_v33 = vpop.eup %3921 }
 0x4e3   :  { %954 = vrot.lane.b32.xlu0 %v3922_v33, %s4202_s3  ;;  %v4885_v33 = vld [vmem:[%s5824_s2 + $0x18] sm:$0xff] }
 0x4e7   :  { %v3924_v13 = vpop.eup %3923 }
 0x4e8   :  { %882 = vrot.lane.b32.xlu1 %v3924_v13, %s4202_s3 }
 0x4eb   :  { %v3926_v14 = vpop.eup %3925 }
 0x4ec   :  { %v3928_v17 = vpop.eup %3927  ;;  %956 = vrot.lane.b32.xlu0 %v3926_v14, %s4202_s3  ;;  %v4906_v14 = vld [vmem:[%s5824_s2] sm:$0xff] }
 0x4ed   :  { %884 = vrot.lane.b32.xlu1 %v3928_v17, %s4202_s3  ;;  %v4200_v17 = vld [vmem:[%s5824_s2 + $0x78] sm:$0xff] }
 0x54b   :  { %v881_v18 = vpop.permute.xlu1 %880 }
 0x54c   :  { %v889_v20 = vmul.f32 %v4745_v11, %v881_v18  ;;  %v243_v18 = vadd.f32 %v4567_v58, %v4610_v37 }
 0x54d   :  { %v953_v21 = vpop.permute.xlu0 %952 }
 0x54e   :  { %967 = vrot.lane.b32.xlu1 %v889_v20, %s4203_s30  ;;  %v961_v22 = vmul.f32 %v4748_v16, %v953_v21  ;;  %v263_v21 = vadd.f32 %v4581_v1, %v4615_v42 }
 0x550   :  { %979 = vrot.lane.b32.xlu0 %v961_v22, %s4202_s3 }
 0x555   :  { %v955_v23 = vpop.permute.xlu0 %954 }
 0x556   :  { %v962_v7 = vmul.f32 %v4757_v25, %v955_v23 }
 0x558   :  { %981 = vrot.lane.b32.xlu0 %v962_v7, %s4202_s3 }
 0x55a   :  { %v883_v26 = vpop.permute.xlu1 %882 }
 0x55b   :  { %v890_v27 = vmul.f32 %v3912_v47, %v883_v26  ;;  %v249_v26 = vadd.f32 %v4571_v60, %v4610_v37  ;;  %v275_v60 = vadd.f32 %v4589_v6, %v4615_v42 }
 0x55d   :  { %969 = vrot.lane.b32.xlu1 %v890_v27, %s4203_s30 }
 0x55e   :  { %v957_v28 = vpop.permute.xlu0 %956 }
 0x55f   :  { %v963_v52 = vmul.f32 %v3916_v36, %v957_v28  ;;  %v885_v10 = vpop.permute.xlu1 %884  ;;  %v269_v28 = vadd.f32 %v4585_v4, %v4615_v42 }
 0x560   :  { %v891_v11 = vmul.f32 %v4762_v55, %v885_v10  ;;  %v4810_v55 = vld [vmem:[%s5824_s2 + $0x70] sm:$0xff] }
 0x561   :  { %983 = vrot.lane.b32.xlu0 %v963_v52, %s4202_s3 }
 0x562   :  { %971 = vrot.lane.b32.xlu1 %v891_v11, %s4203_s30 }
 0x565   :  { %999 = vrot.lane.b32.xlu0 %v872_v3, %s4204_s15 }
 0x566   :  { %997 = vrot.lane.b32.xlu1 %v871_v29, %s4204_s15  ;;  %v4829_v29 = vld [vmem:[%s5824_s2 + $0x58] sm:$0xff] }
 0x5c0   :  { %v968_v16 = vpop.permute.xlu1 %967 }
 0x5c2   :  { %v980_v25 = vpop.permute.xlu0 %979 }
 0x5c3   :  { %v988_v48 = vsel %vm85_vm1, %v968_v16, %v980_v25  ;;  %v255_v16 = vadd.f32 %v4575_v62, %v4610_v37 }
 0x5c4   :  { %991 = vst.msk [vmem:[#allocation3] sm:$0xff] %vm365_vm0, %v988_v48 }
 0x5ca   :  { %v982_v36 = vpop.permute.xlu0 %981 }
 0x5cb   :  { %v1012_v47 = vld [vmem:[#allocation3] sm:$0xff] }
 0x5cc   :  { %3579 = vmatmul.mubr.msk.f32.vlgmr.msra.gmra.mxu1 %vm365_vm0, %v1012_v47 }
 0x5cd   :  { %1097 = vmatprep.mubr.f32.mxu1 %v5849_v24  ;;  %1364 = vmatpush1.msra.mxu1 %v4810_v55 }
 0x5ce   :  { %1365 = vmatprep.subr.mxu1 %v4816_v54 }
 0x5cf   :  { %v970_v15 = vpop.permute.xlu1 %969  ;;  %1366 = vmatpush1.msra.mxu1 %v4822_v56 }
 0x5d0   :  { %v989_v34 = vsel %vm85_vm1, %v970_v15, %v982_v36  ;;  %1367 = vmatprep.subr.mxu1 %v4829_v29 }
 0x5d1   :  { %992 = vst.msk [vmem:[#allocation3 + $0x8] sm:$0xff] %vm365_vm0, %v989_v34  ;;  %1368 = vmatpush1.msra.mxu1 %v4836_v49 }
 0x5d2   :  { %1369 = vmatprep.subr.mxu1 %v4842_v57 }
 0x5d3   :  { %v984_v35 = vpop.permute.xlu0 %983  ;;  %1370 = vmatpush1.msra.mxu1 %v4848_v19 }
 0x5d4   :  { %v972_v38 = vpop.permute.xlu1 %971  ;;  %1371 = vmatprep.subr.mxu1 %v4855_v50 }
 0x5d5   :  { %v990_v43 = vsel %vm85_vm1, %v972_v38, %v984_v35  ;;  %1372 = vmatpush1.msra.mxu1 %v4862_v51 }
 0x5d6   :  { %993 = vst.msk [vmem:[#allocation3 + $0x10] sm:$0xff] %vm365_vm0, %v990_v43  ;;  %1373 = vmatprep.subr.mxu1 %v4868_v41 }
 0x5d7   :  { %v1000_v46 = vpop.permute.xlu0 %999  ;;  %1374 = vmatpush1.msra.mxu1 %v4876_v32 }
 0x5d8   :  { %v1007_v39 = vsel %vm85_vm1, %v1000_v46, %v4775_v45  ;;  %v998_v3 = vpop.permute.xlu1 %997  ;;  %v1013_v44 = vld [vmem:[#allocation3 + $0x8] sm:$0xff]  ;;  %1375 = vmatprep.subr.mxu1 %v4885_v33  ;;  %v4894_v45 = vld [vmem:[%s5824_s2 + $0x10] sm:$0xff] }
 0x5d9   :  { %1010 = vst.msk [vmem:[#allocation4 + $0x8] sm:$0xff] %vm365_vm0, %v1007_v39  ;;  %v1006_v40 = vsel %vm85_vm1, %v998_v3, %v4771_v31  ;;  %3580 = vmatmul.mubr.msk.f32.gmra.mxu1 %vm365_vm0, %v1013_v44  ;;  %v4900_v31 = vld [vmem:[%s5824_s2 + $0x8] sm:$0xff] }
 0x5da   :  { %1009 = vst.msk [vmem:[#allocation4] sm:$0xff] %vm365_vm0, %v1006_v40  ;;  %1103 = vmatprep.mubr.f32.mxu1 %v5849_v24  ;;  %1376 = vmatpush1.msra.mxu1 %v4894_v45 }
 0x5db   :  { %1377 = vmatprep.subr.mxu1 %v4900_v31 }
 0x5dc   :  { %1378 = vmatpush1.msra.mxu1 %v4906_v14 }
 0x5dd   :  { %v1014_v13 = vld [vmem:[#allocation3 + $0x10] sm:$0xff]  ;;  %1991 = vmatprep.subr.mxu1 %v4200_v17 }
 0x5de   :  { %3581 = vmatmul.mubr.msk.f32.gmra.mxu1 %vm365_vm0, %v1014_v13 }
 0x5df   :  { %1411 = vmatprep.mubr.f32.mxu1 %v5849_v24 }
 0x5e1   :  { %v4934_v6 = vld [vmem:[#allocation4] sm:$0xff] }
 0x68c   :  { %v1093_v20 = vpop.f32.mrf.mxu1 }
 0x68d   :  { %v1116_v22 = vadd.f32 %v1093_v20, %v243_v18 }
 0x68e   :  { %v1095_v23 = vpop.f32.mrf.mxu1 }
 0x68f   :  { %3929 = vtanh.f32 %v1116_v22  ;;  %v1125_v7 = vadd.f32 %v1095_v23, %v263_v21 }
 0x691   :  { %3931 = vtanh.f32 %v1125_v7  ;;  %v3585_v35 = vmul.f32 -1.442695, %v1125_v7 }
 0x699   :  { %v1099_v27 = vpop.f32.mrf.mxu1 }
 0x69a   :  { %v1117_v52 = vadd.f32 %v1099_v27, %v249_v26 }
 0x69b   :  { %v1101_v10 = vpop.f32.mrf.mxu1 }
 0x69c   :  { %v3930_v11 = vpop.eup %3929  ;;  %3933 = vtanh.f32 %v1117_v52  ;;  %v1126_v58 = vadd.f32 %v1101_v10, %v269_v28  ;;  %v3583_v38 = vmul.f32 -1.442695, %v1117_v52 }
 0x69d   :  { %1167 = vrot.lane.b32.xlu1 %v3930_v11, %s4202_s3 }
 0x69e   :  { %v1105_v1 = vpop.f32.mrf.mxu1  ;;  %v3932_v25 = vpop.eup %3931  ;;  %3935 = vtanh.f32 %v1126_v58  ;;  %v3586_v43 = vmul.f32 -1.442695, %v1126_v58 }
 0x69f   :  { %v1118_v47 = vadd.f32 %v1105_v1, %v255_v16  ;;  %1239 = vrot.lane.b32.xlu0 %v3932_v25, %s4202_s3  ;;  %v1016_v25 = vld [vmem:[#allocation4 + $0x8] sm:$0xff] }
 0x6a0   :  { %v1107_v48 = vpop.f32.mrf.mxu1 }
 0x6a1   :  { %1001 = vrot.lane.b32.xlu1 %v4780_v30, %s4204_s15  ;;  %v1127_v4 = vadd.f32 %v1107_v48, %v275_v60  ;;  %3937 = vtanh.f32 %v1118_v47  ;;  %v3582_v30 = vmul.f32 -1.442695, %v1116_v22  ;;  %v3584_v40 = vmul.f32 -1.442695, %v1118_v47 }
 0x6a3   :  { %3939 = vtanh.f32 %v1127_v4  ;;  %v3587_v13 = vmul.f32 -1.442695, %v1127_v4 }
 0x6a4   :  { %3941 = vpow2.f32 %v3582_v30 }
 0x6a5   :  { %3943 = vpow2.f32 %v3585_v35 }
 0x6a6   :  { %3945 = vpow2.f32 %v3583_v38 }
 0x6a7   :  { %3947 = vpow2.f32 %v3586_v43 }
 0x6a9   :  { %v3934_v36 = vpop.eup %3933 }
 0x6aa   :  { %1169 = vrot.lane.b32.xlu0 %v3934_v36, %s4202_s3 }
 0x6ab   :  { %v3936_v15 = vpop.eup %3935 }
 0x6ac   :  { %1241 = vrot.lane.b32.xlu1 %v3936_v15, %s4202_s3 }
 0x6ae   :  { %v3938_v62 = vpop.eup %3937 }
 0x6af   :  { %1171 = vrot.lane.b32.xlu0 %v3938_v62, %s4202_s3 }
 0x6b0   :  { %v3940_v34 = vpop.eup %3939 }
 0x6b1   :  { %1243 = vrot.lane.b32.xlu1 %v3940_v34, %s4202_s3  ;;  %v3942_v46 = vpop.eup %3941 }
 0x6b2   :  { %v3944_v39 = vpop.eup %3943  ;;  %v1137_v3 = vadd.f32 1.0, %v3942_v46 }
 0x6b3   :  { %1152 = vrot.lane.b32.xlu0 %v4934_v6, %s4203_s30  ;;  %v1221_v44 = vadd.f32 1.0, %v3944_v39  ;;  %v3946_v17 = vpop.eup %3945 }
 0x6b4   :  { %3949 = vrcp.f32 %v1137_v3  ;;  %v3948_v18 = vpop.eup %3947  ;;  %v1138_v20 = vadd.f32 1.0, %v3946_v17 }
 0x6b5   :  { %3951 = vpow2.f32 %v3584_v40  ;;  %v1222_v21 = vadd.f32 1.0, %v3948_v18 }
 0x6b6   :  { %3953 = vrcp.f32 %v1221_v44 }
 0x6b7   :  { %3955 = vpow2.f32 %v3587_v13 }
 0x6b8   :  { %3957 = vrcp.f32 %v1138_v20 }
 0x6b9   :  { %3959 = vrcp.f32 %v1222_v21 }
 0x6c1   :  { %v4938_v22 = vpop.eup %3949 }
 0x6c2   :  { %v3952_v7 = vpop.eup %3951 }
 0x6c3   :  { %v4941_v27 = vpop.eup %3953  ;;  %v1139_v10 = vadd.f32 1.0, %v3952_v7 }
 0x6c4   :  { %v3956_v28 = vpop.eup %3955  ;;  %v1233_v44 = vmul.f32 %v4941_v27, %v4934_v6 }
 0x6c5   :  { %v1223_v16 = vadd.f32 1.0, %v3956_v28  ;;  %3961 = vrcp.f32 %v1139_v10  ;;  %v3958_v47 = vpop.eup %3957 }
 0x6c6   :  { %v3960_v4 = vpop.eup %3959 }
 0x6c7   :  { %3963 = vrcp.f32 %v1223_v16  ;;  %v1234_v7 = vmul.f32 %v3960_v4, %v1016_v25 }
 0x70f   :  { %v1168_v23 = vpop.permute.xlu1 %1167 }
 0x710   :  { %v1176_v26 = vmul.f32 %v4938_v22, %v1168_v23 }
 0x711   :  { %v1240_v52 = vpop.permute.xlu0 %1239 }
 0x712   :  { %1182 = vrot.lane.b32.xlu1 %v1176_v26, %s4203_s30  ;;  %v1248_v11 = vmul.f32 %v4941_v27, %v1240_v52 }
 0x713   :  { %v1002_v58 = vpop.permute.xlu1 %1001 }
 0x714   :  { %v1008_v1 = vsel %vm85_vm1, %v1002_v58, %v4783_v9  ;;  %1254 = vrot.lane.b32.xlu0 %v1248_v11, %s4203_s30  ;;  %v3962_v9 = vpop.eup %3961 }
 0x715   :  { %1011 = vst.msk [vmem:[#allocation4 + $0x10] sm:$0xff] %vm365_vm0, %v1008_v1  ;;  %v3964_v35 = vpop.eup %3963 }
 0x716   :  { %1154 = vrot.lane.b32.xlu1 %v1016_v25, %s4203_s30 }
 0x71c   :  { %v1170_v48 = vpop.permute.xlu0 %1169  ;;  %v1017_v60 = vld [vmem:[#allocation4 + $0x10] sm:$0xff] }
 0x71d   :  { %1156 = vrot.lane.b32.xlu0 %v1017_v60, %s4203_s30  ;;  %v1177_v36 = vmul.f32 %v3958_v47, %v1170_v48  ;;  %v1235_v1 = vmul.f32 %v3964_v35, %v1017_v60 }
 0x71e   :  { %v1242_v15 = vpop.permute.xlu1 %1241 }
 0x71f   :  { %v1249_v62 = vmul.f32 %v3960_v4, %v1242_v15 }
 0x721   :  { %1184 = vrot.lane.b32.xlu0 %v1177_v36, %s4203_s30  ;;  %1256 = vrot.lane.b32.xlu1 %v1249_v62, %s4203_s30  ;;  %v1172_v34 = vpop.permute.xlu0 %1171 }
 0x722   :  { %v1178_v30 = vmul.f32 %v3962_v9, %v1172_v34 }
 0x723   :  { %v1244_v38 = vpop.permute.xlu1 %1243 }
 0x724   :  { %v1250_v43 = vmul.f32 %v3964_v35, %v1244_v38 }
 0x725   :  { %1186 = vrot.lane.b32.xlu1 %v1178_v30, %s4203_s30  ;;  %v1153_v46 = vpop.permute.xlu0 %1152 }
 0x726   :  { %1258 = vrot.lane.b32.xlu0 %v1250_v43, %s4203_s30  ;;  %v1161_v39 = vmul.f32 %v4938_v22, %v1153_v46 }
 0x784   :  { %v1183_v3 = vpop.permute.xlu1 %1182 }
 0x785   :  { %v1191_v40 = vadd.f32 %v1183_v3, %v1161_v39 }
 0x786   :  { %v1255_v13 = vpop.permute.xlu0 %1254 }
 0x787   :  { %3965 = vtanh.f32 %v1191_v40  ;;  %v4958_v17 = vadd.f32 %v1255_v13, %v1233_v44 }
 0x788   :  { %v1155_v18 = vpop.permute.xlu1 %1154 }
 0x789   :  { %3967 = vtanh.f32 %v4958_v17  ;;  %v1162_v21 = vmul.f32 %v3958_v47, %v1155_v18 }
 0x78f   :  { %v1157_v20 = vpop.permute.xlu0 %1156 }
 0x790   :  { %v1163_v11 = vmul.f32 %v3962_v9, %v1157_v20 }
 0x793   :  { %v1185_v23 = vpop.permute.xlu0 %1184  ;;  %v1257_v52 = vpop.permute.xlu1 %1256 }
 0x794   :  { %v3966_v26 = vpop.eup %3965  ;;  %v1192_v28 = vadd.f32 %v1185_v23, %v1162_v21  ;;  %v4961_v10 = vadd.f32 %v1257_v52, %v1234_v7  ;;  %v251_v7 = vadd.f32 %v4573_v61, %v4615_v42 }
 0x795   :  { %1200 = vrot.lane.b32.xlu1 %v3966_v26, %s4202_s3 }
 0x796   :  { %3969 = vtanh.f32 %v1192_v28  ;;  %v3968_v6 = vpop.eup %3967 }
 0x797   :  { %3971 = vtanh.f32 %v4961_v10  ;;  %1272 = vrot.lane.b32.xlu0 %v3968_v6, %s4202_s3  ;;  %v1187_v58 = vpop.permute.xlu1 %1186 }
 0x798   :  { %v4966_v16 = vadd.f32 %v1187_v58, %v1163_v11  ;;  %v1259_v48 = vpop.permute.xlu0 %1258 }
 0x799   :  { %v4968_v25 = vadd.f32 %v1259_v48, %v1235_v1 }
 0x79a   :  { %3973 = vtanh.f32 %v4966_v16 }
 0x79b   :  { %3975 = vtanh.f32 %v4968_v25 }
 0x7a3   :  { %v3970_v36 = vpop.eup %3969 }
 0x7a4   :  { %v3972_v15 = vpop.eup %3971  ;;  %1202 = vrot.lane.b32.xlu1 %v3970_v36, %s4202_s3 }
 0x7a5   :  { %1274 = vrot.lane.b32.xlu0 %v3972_v15, %s4202_s3 }
 0x7a7   :  { %v3974_v62 = vpop.eup %3973 }
 0x7a8   :  { %1204 = vrot.lane.b32.xlu1 %v3974_v62, %s4202_s3  ;;  %v3976_v34 = vpop.eup %3975 }
 0x7a9   :  { %1276 = vrot.lane.b32.xlu0 %v3976_v34, %s4202_s3 }
 0x807   :  { %v1201_v60 = vpop.permute.xlu1 %1200 }
 0x808   :  { %v1209_v30 = vmul.f32 %v4938_v22, %v1201_v60 }
 0x809   :  { %v1273_v38 = vpop.permute.xlu0 %1272 }
 0x80a   :  { %1287 = vrot.lane.b32.xlu1 %v1209_v30, %s4203_s30  ;;  %v1281_v43 = vmul.f32 %v4941_v27, %v1273_v38 }
 0x80c   :  { %1299 = vrot.lane.b32.xlu0 %v1281_v43, %s4202_s3 }
 0x816   :  { %v1203_v46 = vpop.permute.xlu1 %1202 }
 0x817   :  { %v1275_v39 = vpop.permute.xlu0 %1274  ;;  %v1210_v3 = vmul.f32 %v3958_v47, %v1203_v46 }
 0x818   :  { %v1282_v44 = vmul.f32 %v3960_v4, %v1275_v39 }
 0x819   :  { %1289 = vrot.lane.b32.xlu1 %v1210_v3, %s4203_s30 }
 0x81a   :  { %1301 = vrot.lane.b32.xlu0 %v1282_v44, %s4202_s3  ;;  %v1205_v13 = vpop.permute.xlu1 %1204 }
 0x81b   :  { %v1211_v18 = vmul.f32 %v3962_v9, %v1205_v13  ;;  %v1277_v20 = vpop.permute.xlu0 %1276 }
 0x81c   :  { %v1283_v21 = vmul.f32 %v3964_v35, %v1277_v20 }
 0x81d   :  { %1291 = vrot.lane.b32.xlu1 %v1211_v18, %s4203_s30 }
 0x81e   :  { %1303 = vrot.lane.b32.xlu0 %v1283_v21, %s4202_s3 }
 0x821   :  { %1317 = vrot.lane.b32.xlu1 %v1191_v40, %s4204_s15 }
 0x822   :  { %1319 = vrot.lane.b32.xlu0 %v1192_v28, %s4204_s15 }
 0x87c   :  { %v1288_v22 = vpop.permute.xlu1 %1287 }
 0x87e   :  { %v1300_v27 = vpop.permute.xlu0 %1299 }
 0x87f   :  { %v1308_v47 = vsel %vm85_vm1, %v1288_v22, %v1300_v27 }
 0x880   :  { %1311 = vst.msk [vmem:[#allocation3] sm:$0xff] %vm365_vm0, %v1308_v47 }
 0x887   :  { %v1332_v4 = vld [vmem:[#allocation3] sm:$0xff] }
 0x888   :  { %3588 = vmatmul.mubr.msk.f32.vlgmr.msra.gmra.mxu1 %vm365_vm0, %v1332_v4 }
 0x889   :  { %1417 = vmatprep.mubr.f32.mxu1 %v5849_v24  ;;  %1992 = vmatpush1.msra.mxu1 %v4810_v55 }
 0x88a   :  { %1993 = vmatprep.subr.mxu1 %v4816_v54 }
 0x88b   :  { %v1290_v9 = vpop.permute.xlu1 %1289  ;;  %1994 = vmatpush1.msra.mxu1 %v4822_v56 }
 0x88c   :  { %v1302_v35 = vpop.permute.xlu0 %1301  ;;  %1995 = vmatprep.subr.mxu1 %v4829_v29 }
 0x88d   :  { %v1309_v40 = vsel %vm85_vm1, %v1290_v9, %v1302_v35  ;;  %1996 = vmatpush1.msra.mxu1 %v4836_v49 }
 0x88e   :  { %1312 = vst.msk [vmem:[#allocation3 + $0x8] sm:$0xff] %vm365_vm0, %v1309_v40  ;;  %1997 = vmatprep.subr.mxu1 %v4842_v57 }
 0x88f   :  { %1998 = vmatpush1.msra.mxu1 %v4848_v19  ;;  %v1292_v23 = vpop.permute.xlu1 %1291 }
 0x890   :  { %1999 = vmatprep.subr.mxu1 %v4855_v50  ;;  %v1304_v55 = vpop.permute.xlu0 %1303 }
 0x891   :  { %2000 = vmatpush1.msra.mxu1 %v4862_v51  ;;  %v1310_v54 = vsel %vm85_vm1, %v1292_v23, %v1304_v55  ;;  %v261_v51 = vadd.f32 %v4579_v0, %v4610_v37 }
 0x892   :  { %2001 = vmatprep.subr.mxu1 %v4868_v41  ;;  %1313 = vst.msk [vmem:[#allocation3 + $0x10] sm:$0xff] %vm365_vm0, %v1310_v54 }
 0x893   :  { %2002 = vmatpush1.msra.mxu1 %v4876_v32  ;;  %v1318_v56 = vpop.permute.xlu1 %1317  ;;  %v245_v32 = vadd.f32 %v4569_v59, %v4615_v42 }
 0x894   :  { %2003 = vmatprep.subr.mxu1 %v4885_v33  ;;  %v1326_v49 = vsel %vm85_vm1, %v1318_v56, %v4958_v17  ;;  %v1320_v57 = vpop.permute.xlu0 %1319 }
 0x895   :  { %v1333_v29 = vld [vmem:[#allocation3 + $0x8] sm:$0xff]  ;;  %1329 = vst.msk [vmem:[#allocation4] sm:$0xff] %vm365_vm0, %v1326_v49  ;;  %2004 = vmatpush1.msra.mxu1 %v4894_v45  ;;  %v1327_v19 = vsel %vm85_vm1, %v1320_v57, %v4961_v10  ;;  %v273_v10 = vadd.f32 %v4587_v5, %v4610_v37 }
 0x896   :  { %3589 = vmatmul.mubr.msk.f32.gmra.mxu1 %vm365_vm0, %v1333_v29  ;;  %2005 = vmatprep.subr.mxu1 %v4900_v31  ;;  %1330 = vst.msk [vmem:[#allocation4 + $0x8] sm:$0xff] %vm365_vm0, %v1327_v19 }
 0x897   :  { %1423 = vmatprep.mubr.f32.mxu1 %v5849_v24  ;;  %2006 = vmatpush1.msra.mxu1 %v4906_v14  ;;  %v267_v14 = vadd.f32 %v4583_v2, %v4610_v37  ;;  %v257_v2 = vadd.f32 %v4577_v63, %v4615_v42 }
 0x898   :  { %3725 = vmatprep.subr.mxu1 %v5849_v24 }
 0x899   :  { %v1334_v50 = vld [vmem:[#allocation3 + $0x10] sm:$0xff] }
 0x89a   :  { %3590 = vmatmul.mubr.msk.f32.gmra.mxu1 %vm365_vm0, %v1334_v50 }
 0x89b   :  { %2039 = vmatprep.mubr.f32.mxu1 %v5849_v24 }
 0x89c   :  { %v5040_v63 = vld [vmem:[#allocation4] sm:$0xff] }
 0x89d   :  { %v1336_v56 = vld [vmem:[#allocation4 + $0x8] sm:$0xff] }
 0x948   :  { %v1413_v41 = vpop.f32.mrf.mxu1 }
 0x949   :  { %v1433_v33 = vadd.f32 %v1413_v41, %v261_v51 }
 0x94a   :  { %v1415_v45 = vpop.f32.mrf.mxu1 }
 0x94b   :  { %3977 = vtanh.f32 %v1433_v33  ;;  %v1439_v31 = vadd.f32 %v1415_v45, %v245_v32 }
 0x94d   :  { %3979 = vtanh.f32 %v1439_v31  ;;  %v3594_v15 = vmul.f32 -1.442695, %v1439_v31 }
 0x956   :  { %v1419_v17 = vpop.f32.mrf.mxu1 }
 0x957   :  { %v1434_v26 = vadd.f32 %v1419_v17, %v267_v14 }
 0x958   :  { %v1421_v28 = vpop.f32.mrf.mxu1  ;;  %v3978_v52 = vpop.eup %3977 }
 0x959   :  { %3981 = vtanh.f32 %v1434_v26  ;;  %v1440_v0 = vadd.f32 %v1421_v28, %v251_v7  ;;  %1481 = vrot.lane.b32.xlu1 %v3978_v52, %s4202_s3  ;;  %v3592_v62 = vmul.f32 -1.442695, %v1434_v26 }
 0x95a   :  { %v3980_v59 = vpop.eup %3979  ;;  %v1425_v6 = vpop.f32.mrf.mxu1 }
 0x95b   :  { %3983 = vtanh.f32 %v1440_v0  ;;  %1553 = vrot.lane.b32.xlu0 %v3980_v59, %s4202_s3  ;;  %v1435_v11 = vadd.f32 %v1425_v6, %v273_v10  ;;  %v3595_v34 = vmul.f32 -1.442695, %v1440_v0 }
 0x95c   :  { %v1427_v61 = vpop.f32.mrf.mxu1 }
 0x95d   :  { %1321 = vrot.lane.b32.xlu1 %v4966_v16, %s4204_s15  ;;  %v1441_v58 = vadd.f32 %v1427_v61, %v257_v2  ;;  %3985 = vtanh.f32 %v1435_v11  ;;  %v3591_v16 = vmul.f32 -1.442695, %v1433_v33  ;;  %v3593_v43 = vmul.f32 -1.442695, %v1435_v11 }
 0x95f   :  { %3987 = vtanh.f32 %v1441_v58  ;;  %v3596_v39 = vmul.f32 -1.442695, %v1441_v58 }
 0x960   :  { %3989 = vpow2.f32 %v3591_v16 }
 0x961   :  { %3991 = vpow2.f32 %v3594_v15 }
 0x962   :  { %3993 = vpow2.f32 %v3592_v62 }
 0x963   :  { %3995 = vpow2.f32 %v3595_v34 }
 0x966   :  { %v3982_v1 = vpop.eup %3981 }
 0x967   :  { %1483 = vrot.lane.b32.xlu0 %v3982_v1, %s4202_s3 }
 0x968   :  { %v3984_v48 = vpop.eup %3983 }
 0x969   :  { %1555 = vrot.lane.b32.xlu1 %v3984_v48, %s4202_s3 }
 0x96a   :  { %v3986_v5 = vpop.eup %3985 }
 0x96b   :  { %1485 = vrot.lane.b32.xlu0 %v3986_v5, %s4202_s3 }
 0x96c   :  { %v3988_v36 = vpop.eup %3987 }
 0x96d   :  { %1557 = vrot.lane.b32.xlu1 %v3988_v36, %s4202_s3  ;;  %v3990_v60 = vpop.eup %3989 }
 0x96e   :  { %v3992_v30 = vpop.eup %3991  ;;  %v1451_v38 = vadd.f32 1.0, %v3990_v60 }
 0x96f   :  { %1466 = vrot.lane.b32.xlu0 %v5040_v63, %s4203_s30  ;;  %v1535_v46 = vadd.f32 1.0, %v3992_v30  ;;  %v3994_v3 = vpop.eup %3993 }
 0x970   :  { %3997 = vrcp.f32 %v1451_v38  ;;  %v3996_v44 = vpop.eup %3995  ;;  %v1452_v13 = vadd.f32 1.0, %v3994_v3 }
 0x971   :  { %3999 = vpow2.f32 %v3593_v43  ;;  %v1536_v18 = vadd.f32 1.0, %v3996_v44 }
 0x972   :  { %4001 = vrcp.f32 %v1535_v46 }
 0x973   :  { %4003 = vpow2.f32 %v3596_v39 }
 0x974   :  { %4005 = vrcp.f32 %v1452_v13 }
 0x975   :  { %4007 = vrcp.f32 %v1536_v18 }
 0x97d   :  { %v5044_v20 = vpop.eup %3997 }
 0x97e   :  { %v4000_v22 = vpop.eup %3999 }
 0x97f   :  { %v5047_v47 = vpop.eup %4001  ;;  %v1453_v35 = vadd.f32 1.0, %v4000_v22 }
 0x980   :  { %v4004_v4 = vpop.eup %4003  ;;  %v1547_v52 = vmul.f32 %v5047_v47, %v5040_v63 }
 0x981   :  { %v1537_v54 = vadd.f32 1.0, %v4004_v4  ;;  %4009 = vrcp.f32 %v1453_v35  ;;  %v4006_v57 = vpop.eup %4005 }
 0x982   :  { %v4008_v19 = vpop.eup %4007 }
 0x983   :  { %4011 = vrcp.f32 %v1537_v54  ;;  %v1548_v61 = vmul.f32 %v4008_v19, %v1336_v56 }
 0x9cb   :  { %v1482_v21 = vpop.permute.xlu1 %1481 }
 0x9cc   :  { %v1490_v27 = vmul.f32 %v5044_v20, %v1482_v21 }
 0x9cd   :  { %v1554_v9 = vpop.permute.xlu0 %1553 }
 0x9ce   :  { %1496 = vrot.lane.b32.xlu1 %v1490_v27, %s4203_s30  ;;  %v1562_v40 = vmul.f32 %v5047_v47, %v1554_v9 }
 0x9cf   :  { %v1322_v23 = vpop.permute.xlu1 %1321 }
 0x9d0   :  { %v1328_v55 = vsel %vm85_vm1, %v1322_v23, %v4968_v25  ;;  %1568 = vrot.lane.b32.xlu0 %v1562_v40, %s4203_s30  ;;  %v4010_v25 = vpop.eup %4009 }
 0x9d1   :  { %1331 = vst.msk [vmem:[#allocation4 + $0x10] sm:$0xff] %vm365_vm0, %v1328_v55  ;;  %v4012_v45 = vpop.eup %4011 }
 0x9d2   :  { %1468 = vrot.lane.b32.xlu1 %v1336_v56, %s4203_s30 }
 0x9d8   :  { %v1337_v49 = vld [vmem:[#allocation4 + $0x10] sm:$0xff] }
 0x9d9   :  { %v1484_v29 = vpop.permute.xlu0 %1483  ;;  %1470 = vrot.lane.b32.xlu0 %v1337_v49, %s4203_s30  ;;  %v1549_v15 = vmul.f32 %v4012_v45, %v1337_v49 }
 0x9da   :  { %v1491_v50 = vmul.f32 %v4006_v57, %v1484_v29 }
 0x9db   :  { %v1556_v51 = vpop.permute.xlu1 %1555 }
 0x9dc   :  { %v1563_v41 = vmul.f32 %v4008_v19, %v1556_v51 }
 0x9dd   :  { %1498 = vrot.lane.b32.xlu0 %v1491_v50, %s4203_s30  ;;  %v1486_v32 = vpop.permute.xlu0 %1485 }
 0x9de   :  { %1570 = vrot.lane.b32.xlu1 %v1563_v41, %s4203_s30  ;;  %v1492_v33 = vmul.f32 %v4010_v25, %v1486_v32 }
 0x9df   :  { %v1558_v31 = vpop.permute.xlu1 %1557 }
 0x9e0   :  { %v1564_v14 = vmul.f32 %v4012_v45, %v1558_v31 }
 0x9e1   :  { %v1467_v17 = vpop.permute.xlu0 %1466 }
 0x9e2   :  { %1500 = vrot.lane.b32.xlu1 %v1492_v33, %s4203_s30  ;;  %1572 = vrot.lane.b32.xlu0 %v1564_v14, %s4203_s30  ;;  %v1475_v7 = vmul.f32 %v5044_v20, %v1467_v17  ;;  %v227_v14 = vadd.f32 %v4557_v53, %v4615_v42 }
 0xa40   :  { %v1497_v26 = vpop.permute.xlu1 %1496 }
 0xa41   :  { %v1505_v28 = vadd.f32 %v1497_v26, %v1475_v7 }
 0xa42   :  { %v1569_v0 = vpop.permute.xlu0 %1568 }
 0xa43   :  { %4013 = vtanh.f32 %v1505_v28  ;;  %v5064_v59 = vadd.f32 %v1569_v0, %v1547_v52  ;;  %v5850_v0 = vld [vmem:[#allocation12_spill] sm:$0xff] }
 0xa44   :  { %v1469_v10 = vpop.permute.xlu1 %1468 }
 0xa45   :  { %4015 = vtanh.f32 %v5064_v59  ;;  %v1476_v2 = vmul.f32 %v4006_v57, %v1469_v10 }
 0xa4b   :  { %v1471_v6 = vpop.permute.xlu0 %1470 }
 0xa4c   :  { %v1477_v63 = vmul.f32 %v4010_v25, %v1471_v6 }
 0xa4f   :  { %v1499_v11 = vpop.permute.xlu0 %1498 }
 0xa50   :  { %v4014_v58 = vpop.eup %4013  ;;  %v1506_v1 = vadd.f32 %v1499_v11, %v1476_v2  ;;  %v1571_v48 = vpop.permute.xlu1 %1570  ;;  %v5851_v11 = vld [vmem:[#allocation14_spill] sm:$0xff] }
 0xa51   :  { %v5067_v5 = vadd.f32 %v1571_v48, %v1548_v61  ;;  %1514 = vrot.lane.b32.xlu1 %v4014_v58, %s4202_s3  ;;  %v291_v61 = vadd.f32 %v5851_v11, %v4610_v37 }
 0xa52   :  { %4017 = vtanh.f32 %v1506_v1  ;;  %v4016_v36 = vpop.eup %4015 }
 0xa53   :  { %4019 = vtanh.f32 %v5067_v5  ;;  %1586 = vrot.lane.b32.xlu0 %v4016_v36, %s4202_s3 }
 0xa54   :  { %v1501_v16 = vpop.permute.xlu1 %1500  ;;  %v1573_v34 = vpop.permute.xlu0 %1572 }
 0xa55   :  { %v5072_v62 = vadd.f32 %v1501_v16, %v1477_v63  ;;  %v5074_v60 = vadd.f32 %v1573_v34, %v1549_v15 }
 0xa57   :  { %4021 = vtanh.f32 %v5072_v62 }
 0xa58   :  { %4023 = vtanh.f32 %v5074_v60 }
 0xa5f   :  { %v4018_v30 = vpop.eup %4017 }
 0xa60   :  { %v4020_v38 = vpop.eup %4019  ;;  %1516 = vrot.lane.b32.xlu1 %v4018_v30, %s4202_s3 }
 0xa61   :  { %1588 = vrot.lane.b32.xlu0 %v4020_v38, %s4202_s3 }
 0xa64   :  { %v4022_v43 = vpop.eup %4021 }
 0xa65   :  { %1518 = vrot.lane.b32.xlu1 %v4022_v43, %s4202_s3  ;;  %v4024_v46 = vpop.eup %4023 }
 0xa66   :  { %1590 = vrot.lane.b32.xlu0 %v4024_v46, %s4202_s3 }
 0xac3   :  { %v1515_v39 = vpop.permute.xlu1 %1514 }
 0xac4   :  { %v1523_v3 = vmul.f32 %v5044_v20, %v1515_v39 }
 0xac5   :  { %v1587_v44 = vpop.permute.xlu0 %1586 }
 0xac6   :  { %1601 = vrot.lane.b32.xlu1 %v1523_v3, %s4203_s30  ;;  %v1595_v13 = vmul.f32 %v5047_v47, %v1587_v44 }
 0xac8   :  { %1613 = vrot.lane.b32.xlu0 %v1595_v13, %s4202_s3 }
 0xad2   :  { %v1517_v18 = vpop.permute.xlu1 %1516 }
 0xad3   :  { %v1589_v21 = vpop.permute.xlu0 %1588  ;;  %v1524_v22 = vmul.f32 %v4006_v57, %v1517_v18 }
 0xad4   :  { %v1596_v27 = vmul.f32 %v4008_v19, %v1589_v21 }
 0xad5   :  { %1603 = vrot.lane.b32.xlu1 %v1524_v22, %s4203_s30 }
 0xad6   :  { %1615 = vrot.lane.b32.xlu0 %v1596_v27, %s4202_s3 }
 0xad7   :  { %v1519_v4 = vpop.permute.xlu1 %1518 }
 0xad8   :  { %v1525_v9 = vmul.f32 %v4010_v25, %v1519_v4  ;;  %v1591_v35 = vpop.permute.xlu0 %1590 }
 0xad9   :  { %v1597_v40 = vmul.f32 %v4012_v45, %v1591_v35  ;;  %v279_v45 = vadd.f32 %v4591_v8, %v4610_v37 }
 0xada   :  { %1605 = vrot.lane.b32.xlu1 %v1525_v9, %s4203_s30 }
 0xadb   :  { %1617 = vrot.lane.b32.xlu0 %v1597_v40, %s4202_s3 }
 0xade   :  { %1631 = vrot.lane.b32.xlu1 %v1505_v28, %s4204_s15  ;;  %v285_v28 = vadd.f32 %v4595_v12, %v4610_v37  ;;  %v5852_v12 = vld [vmem:[#allocation13_spill] sm:$0xff] }
 0xadf   :  { %1633 = vrot.lane.b32.xlu0 %v1506_v1, %s4204_s15  ;;  %v239_v1 = vadd.f32 %v5852_v12, %v4615_v42 }
 0xb38   :  { %v1602_v20 = vpop.permute.xlu1 %1601 }
 0xb3a   :  { %v1614_v47 = vpop.permute.xlu0 %1613 }
 0xb3b   :  { %v1622_v23 = vsel %vm85_vm1, %v1602_v20, %v1614_v47 }
 0xb3c   :  { %1625 = vst.msk [vmem:[#allocation3] sm:$0xff] %vm365_vm0, %v1622_v23 }
 0xb43   :  { %v1646_v55 = vld [vmem:[#allocation3] sm:$0xff] }
 0xb44   :  { %3597 = vmatmul.mubr.msk.f32.vlgmr.msra.gmra.mxu0 %vm365_vm0, %v1646_v55 }
 0xb45   :  { %1731 = vmatprep.mubr.f32.mxu0 %v5849_v24 }
 0xb47   :  { %v1604_v54 = vpop.permute.xlu1 %1603 }
 0xb48   :  { %v1616_v56 = vpop.permute.xlu0 %1615 }
 0xb49   :  { %v1623_v29 = vsel %vm85_vm1, %v1604_v54, %v1616_v56 }
 0xb4a   :  { %1626 = vst.msk [vmem:[#allocation3 + $0x8] sm:$0xff] %vm365_vm0, %v1623_v29 }
 0xb4c   :  { %v1606_v49 = vpop.permute.xlu1 %1605 }
 0xb4d   :  { %v1618_v57 = vpop.permute.xlu0 %1617 }
 0xb4e   :  { %v1624_v19 = vsel %vm85_vm1, %v1606_v49, %v1618_v57 }
 0xb4f   :  { %1627 = vst.msk [vmem:[#allocation3 + $0x10] sm:$0xff] %vm365_vm0, %v1624_v19 }
 0xb50   :  { %v1632_v50 = vpop.permute.xlu1 %1631 }
 0xb51   :  { %v1647_v51 = vld [vmem:[#allocation3 + $0x8] sm:$0xff]  ;;  %v1640_v41 = vsel %vm85_vm1, %v1632_v50, %v5064_v59  ;;  %v1634_v25 = vpop.permute.xlu0 %1633  ;;  %v233_v59 = vadd.f32 %v5850_v0, %v4615_v42 }
 0xb52   :  { %3598 = vmatmul.mubr.msk.f32.gmra.mxu0 %vm365_vm0, %v1647_v51  ;;  %1643 = vst.msk [vmem:[#allocation4] sm:$0xff] %vm365_vm0, %v1640_v41  ;;  %v1641_v32 = vsel %vm85_vm1, %v1634_v25, %v5067_v5 }
 0xb53   :  { %1737 = vmatprep.mubr.f32.mxu0 %v5849_v24  ;;  %1644 = vst.msk [vmem:[#allocation4 + $0x8] sm:$0xff] %vm365_vm0, %v1641_v32 }
 0xb56   :  { %v1648_v33 = vld [vmem:[#allocation3 + $0x10] sm:$0xff] }
 0xb57   :  { %3599 = vmatmul.mubr.msk.f32.gmra.mxu0 %vm365_vm0, %v1648_v33 }
 0xb58   :  { %3716 = vmatprep.mubr.msk.f32.mxu0 %vm4205_vm2, %v5849_v24 }
 0xb59   :  { %v5129_v30 = vld [vmem:[#allocation4] sm:$0xff] }
 0xb5a   :  { %v1650_v50 = vld [vmem:[#allocation4 + $0x8] sm:$0xff] }
 0xc04   :  { %v1727_v31 = vpop.f32.mrf.mxu0 }
 0xc05   :  { %v1747_v17 = vadd.f32 %v1727_v31, %v279_v45 }
 0xc06   :  { %v1729_v7 = vpop.f32.mrf.mxu0 }
 0xc07   :  { %4025 = vtanh.f32 %v1747_v17  ;;  %v1753_v26 = vadd.f32 %v1729_v7, %v227_v14 }
 0xc09   :  { %4027 = vtanh.f32 %v1753_v26  ;;  %v3603_v38 = vmul.f32 -1.442695, %v1753_v26 }
 0xc12   :  { %v1733_v52 = vpop.f32.mrf.mxu0 }
 0xc13   :  { %v1748_v10 = vadd.f32 %v1733_v52, %v285_v28 }
 0xc14   :  { %v1735_v6 = vpop.f32.mrf.mxu0  ;;  %v4026_v2 = vpop.eup %4025 }
 0xc15   :  { %4029 = vtanh.f32 %v1748_v10  ;;  %v1754_v8 = vadd.f32 %v1735_v6, %v233_v59  ;;  %1795 = vrot.lane.b32.xlu1 %v4026_v2, %s4202_s3  ;;  %v3601_v43 = vmul.f32 -1.442695, %v1748_v10 }
 0xc16   :  { %v4028_v53 = vpop.eup %4027 }
 0xc17   :  { %4031 = vtanh.f32 %v1754_v8  ;;  %v1739_v58 = vpop.f32.mrf.mxu0  ;;  %1867 = vrot.lane.b32.xlu0 %v4028_v53, %s4202_s3  ;;  %v3604_v46 = vmul.f32 -1.442695, %v1754_v8 }
 0xc18   :  { %v1749_v48 = vadd.f32 %v1739_v58, %v291_v61 }
 0xc19   :  { %1635 = vrot.lane.b32.xlu1 %v5072_v62, %s4204_s15  ;;  %v1741_v5 = vpop.f32.mrf.mxu0  ;;  %v3600_v62 = vmul.f32 -1.442695, %v1747_v17 }
 0xc1a   :  { %v1755_v36 = vadd.f32 %v1741_v5, %v239_v1  ;;  %4033 = vtanh.f32 %v1749_v48  ;;  %v3602_v13 = vmul.f32 -1.442695, %v1749_v48 }
 0xc1c   :  { %4035 = vtanh.f32 %v1755_v36  ;;  %v3605_v21 = vmul.f32 -1.442695, %v1755_v36 }
 0xc1d   :  { %4037 = vpow2.f32 %v3600_v62 }
 0xc1e   :  { %4039 = vpow2.f32 %v3603_v38 }
 0xc1f   :  { %4041 = vpow2.f32 %v3601_v43 }
 0xc20   :  { %4043 = vpow2.f32 %v3604_v46 }
 0xc22   :  { %v4030_v63 = vpop.eup %4029 }
 0xc23   :  { %1797 = vrot.lane.b32.xlu0 %v4030_v63, %s4202_s3 }
 0xc24   :  { %v4032_v16 = vpop.eup %4031 }
 0xc25   :  { %1869 = vrot.lane.b32.xlu1 %v4032_v16, %s4202_s3 }
 0xc27   :  { %v4034_v15 = vpop.eup %4033 }
 0xc28   :  { %1799 = vrot.lane.b32.xlu0 %v4034_v15, %s4202_s3 }
 0xc29   :  { %v4036_v34 = vpop.eup %4035 }
 0xc2a   :  { %1871 = vrot.lane.b32.xlu1 %v4036_v34, %s4202_s3  ;;  %v4038_v39 = vpop.eup %4037 }
 0xc2b   :  { %v4040_v3 = vpop.eup %4039  ;;  %v1765_v44 = vadd.f32 1.0, %v4038_v39 }
 0xc2c   :  { %1780 = vrot.lane.b32.xlu0 %v5129_v30, %s4203_s30  ;;  %v1849_v18 = vadd.f32 1.0, %v4040_v3  ;;  %v4042_v22 = vpop.eup %4041 }
 0xc2d   :  { %4045 = vrcp.f32 %v1765_v44  ;;  %v4044_v27 = vpop.eup %4043  ;;  %v1766_v4 = vadd.f32 1.0, %v4042_v22 }
 0xc2e   :  { %4047 = vpow2.f32 %v3602_v13  ;;  %v1850_v9 = vadd.f32 1.0, %v4044_v27 }
 0xc2f   :  { %4049 = vrcp.f32 %v1849_v18 }
 0xc30   :  { %4051 = vpow2.f32 %v3605_v21 }
 0xc31   :  { %4053 = vrcp.f32 %v1766_v4 }
 0xc32   :  { %4055 = vrcp.f32 %v1850_v9 }
 0xc3a   :  { %v5133_v35 = vpop.eup %4045 }
 0xc3b   :  { %v4048_v20 = vpop.eup %4047 }
 0xc3c   :  { %v5136_v23 = vpop.eup %4049  ;;  %v1767_v56 = vadd.f32 1.0, %v4048_v20 }
 0xc3d   :  { %v4052_v55 = vpop.eup %4051  ;;  %v1861_v6 = vmul.f32 %v5136_v23, %v5129_v30 }
 0xc3e   :  { %v1851_v19 = vadd.f32 1.0, %v4052_v55  ;;  %4057 = vrcp.f32 %v1767_v56  ;;  %v4054_v25 = vpop.eup %4053 }
 0xc3f   :  { %v4056_v32 = vpop.eup %4055 }
 0xc40   :  { %4059 = vrcp.f32 %v1851_v19  ;;  %v1862_v12 = vmul.f32 %v4056_v32, %v1650_v50 }
 0xc87   :  { %v1796_v40 = vpop.permute.xlu1 %1795 }
 0xc88   :  { %v1804_v47 = vmul.f32 %v5133_v35, %v1796_v40 }
 0xc89   :  { %v1868_v54 = vpop.permute.xlu0 %1867 }
 0xc8a   :  { %1810 = vrot.lane.b32.xlu1 %v1804_v47, %s4203_s30  ;;  %v1876_v29 = vmul.f32 %v5136_v23, %v1868_v54 }
 0xc8b   :  { %v1636_v49 = vpop.permute.xlu1 %1635 }
 0xc8c   :  { %v1642_v57 = vsel %vm85_vm1, %v1636_v49, %v5074_v60  ;;  %1882 = vrot.lane.b32.xlu0 %v1876_v29, %s4203_s30  ;;  %v4058_v60 = vpop.eup %4057 }
 0xc8d   :  { %1645 = vst.msk [vmem:[#allocation4 + $0x10] sm:$0xff] %vm365_vm0, %v1642_v57  ;;  %v4060_v7 = vpop.eup %4059 }
 0xc8e   :  { %1782 = vrot.lane.b32.xlu1 %v1650_v50, %s4203_s30 }
 0xc94   :  { %v1651_v41 = vld [vmem:[#allocation4 + $0x10] sm:$0xff] }
 0xc95   :  { %v1798_v51 = vpop.permute.xlu0 %1797  ;;  %1784 = vrot.lane.b32.xlu0 %v1651_v41, %s4203_s30  ;;  %v1863_v34 = vmul.f32 %v4060_v7, %v1651_v41 }
 0xc96   :  { %v1805_v33 = vmul.f32 %v4054_v25, %v1798_v51 }
 0xc97   :  { %v1870_v45 = vpop.permute.xlu1 %1869 }
 0xc98   :  { %v1877_v31 = vmul.f32 %v4056_v32, %v1870_v45 }
 0xc99   :  { %1812 = vrot.lane.b32.xlu0 %v1805_v33, %s4203_s30 }
 0xc9a   :  { %1884 = vrot.lane.b32.xlu1 %v1877_v31, %s4203_s30  ;;  %v1800_v14 = vpop.permute.xlu0 %1799 }
 0xc9b   :  { %v1806_v17 = vmul.f32 %v4058_v60, %v1800_v14 }
 0xc9c   :  { %v1872_v26 = vpop.permute.xlu1 %1871 }
 0xc9d   :  { %v1878_v28 = vmul.f32 %v4060_v7, %v1872_v26 }
 0xc9e   :  { %1814 = vrot.lane.b32.xlu1 %v1806_v17, %s4203_s30  ;;  %v1781_v52 = vpop.permute.xlu0 %1780 }
 0xc9f   :  { %1886 = vrot.lane.b32.xlu0 %v1878_v28, %s4203_s30  ;;  %v1789_v0 = vmul.f32 %v5133_v35, %v1781_v52 }
 0xcfc   :  { %v1811_v59 = vpop.permute.xlu1 %1810 }
 0xcfd   :  { %v1819_v10 = vadd.f32 %v1811_v59, %v1789_v0  ;;  %v5855_v59 = vld [vmem:[#allocation16_spill] sm:$0xff] }
 0xcfe   :  { %v1883_v2 = vpop.permute.xlu0 %1882 }
 0xcff   :  { %4061 = vtanh.f32 %v1819_v10  ;;  %v5153_v8 = vadd.f32 %v1883_v2, %v1861_v6  ;;  %v5856_v2 = vld [vmem:[#allocation10_spill] sm:$0xff] }
 0xd00   :  { %v1783_v53 = vpop.permute.xlu1 %1782 }
 0xd01   :  { %4063 = vtanh.f32 %v5153_v8  ;;  %v1790_v61 = vmul.f32 %v4054_v25, %v1783_v53 }
 0xd07   :  { %v1785_v11 = vpop.permute.xlu0 %1784 }
 0xd08   :  { %v1791_v16 = vmul.f32 %v4058_v60, %v1785_v11 }
 0xd0b   :  { %v1813_v58 = vpop.permute.xlu0 %1812 }
 0xd0c   :  { %v4062_v1 = vpop.eup %4061  ;;  %v1820_v48 = vadd.f32 %v1813_v58, %v1790_v61  ;;  %v1885_v5 = vpop.permute.xlu1 %1884 }
 0xd0d   :  { %v5156_v36 = vadd.f32 %v1885_v5, %v1862_v12  ;;  %1828 = vrot.lane.b32.xlu1 %v4062_v1, %s4202_s3  ;;  %v5857_v1 = vld [vmem:[#allocation17_spill] sm:$0xff] }
 0xd0e   :  { %4065 = vtanh.f32 %v1820_v48  ;;  %v4064_v63 = vpop.eup %4063 }
 0xd0f   :  { %4067 = vtanh.f32 %v5156_v36  ;;  %1900 = vrot.lane.b32.xlu0 %v4064_v63, %s4202_s3 }
 0xd10   :  { %v1815_v15 = vpop.permute.xlu1 %1814 }
 0xd11   :  { %v5161_v30 = vadd.f32 %v1815_v15, %v1791_v16  ;;  %v1887_v62 = vpop.permute.xlu0 %1886 }
 0xd12   :  { %v5163_v38 = vadd.f32 %v1887_v62, %v1863_v34 }
 0xd13   :  { %4069 = vtanh.f32 %v5161_v30 }
 0xd14   :  { %4071 = vtanh.f32 %v5163_v38 }
 0xd1b   :  { %v4066_v43 = vpop.eup %4065 }
 0xd1c   :  { %v4068_v46 = vpop.eup %4067  ;;  %1830 = vrot.lane.b32.xlu1 %v4066_v43, %s4202_s3 }
 0xd1d   :  { %1902 = vrot.lane.b32.xlu0 %v4068_v46, %s4202_s3 }
 0xd20   :  { %v4070_v39 = vpop.eup %4069 }
 0xd21   :  { %1832 = vrot.lane.b32.xlu1 %v4070_v39, %s4202_s3  ;;  %v4072_v3 = vpop.eup %4071 }
 0xd22   :  { %1904 = vrot.lane.b32.xlu0 %v4072_v3, %s4202_s3 }
 0xd7f   :  { %v1829_v44 = vpop.permute.xlu1 %1828 }
 0xd80   :  { %v1837_v13 = vmul.f32 %v5133_v35, %v1829_v44 }
 0xd81   :  { %v1901_v18 = vpop.permute.xlu0 %1900 }
 0xd82   :  { %1915 = vrot.lane.b32.xlu1 %v1837_v13, %s4203_s30  ;;  %v1909_v21 = vmul.f32 %v5136_v23, %v1901_v18 }
 0xd84   :  { %1927 = vrot.lane.b32.xlu0 %v1909_v21, %s4202_s3 }
 0xd8e   :  { %v1831_v22 = vpop.permute.xlu1 %1830 }
 0xd8f   :  { %v1903_v27 = vpop.permute.xlu0 %1902  ;;  %v1838_v4 = vmul.f32 %v4054_v25, %v1831_v22 }
 0xd90   :  { %v1910_v9 = vmul.f32 %v4056_v32, %v1903_v27 }
 0xd91   :  { %1917 = vrot.lane.b32.xlu1 %v1838_v4, %s4203_s30 }
 0xd92   :  { %1929 = vrot.lane.b32.xlu0 %v1910_v9, %s4202_s3 }
 0xd93   :  { %v1833_v40 = vpop.permute.xlu1 %1832 }
 0xd94   :  { %v1839_v20 = vmul.f32 %v4058_v60, %v1833_v40  ;;  %v1905_v47 = vpop.permute.xlu0 %1904  ;;  %v5853_v60 = vld [vmem:[#allocation15_spill] sm:$0xff] }
 0xd95   :  { %v1911_v55 = vmul.f32 %v4060_v7, %v1905_v47  ;;  %v297_v14 = vadd.f32 %v5853_v60, %v4610_v37  ;;  %v5854_v7 = vld [vmem:[#allocation9_spill] sm:$0xff] }
 0xd96   :  { %1919 = vrot.lane.b32.xlu1 %v1839_v20, %s4203_s30  ;;  %v209_v26 = vadd.f32 %v5854_v7, %v4615_v42 }
 0xd97   :  { %1931 = vrot.lane.b32.xlu0 %v1911_v55, %s4202_s3 }
 0xd9a   :  { %1945 = vrot.lane.b32.xlu1 %v1819_v10, %s4204_s15  ;;  %v303_v10 = vadd.f32 %v5855_v59, %v4610_v37 }
 0xd9b   :  { %1947 = vrot.lane.b32.xlu0 %v1820_v48, %s4204_s15  ;;  %v309_v48 = vadd.f32 %v5857_v1, %v4610_v37 }
 0xdf4   :  { %v1916_v35 = vpop.permute.xlu1 %1915 }
 0xdf6   :  { %v1928_v23 = vpop.permute.xlu0 %1927 }
 0xdf7   :  { %v1936_v54 = vsel %vm85_vm1, %v1916_v35, %v1928_v23 }
 0xdf8   :  { %1939 = vst.msk [vmem:[#allocation3] sm:$0xff] %vm365_vm0, %v1936_v54 }
 0xdff   :  { %v1960_v56 = vld [vmem:[#allocation3] sm:$0xff] }
 0xe00   :  { %3606 = vmatmul.mubr.msk.f32.vlgmr.msra.gmra.mxu1 %vm365_vm0, %v1960_v56 }
 0xe01   :  { %2045 = vmatprep.mubr.f32.mxu1 %v5849_v24 }
 0xe03   :  { %v1918_v29 = vpop.permute.xlu1 %1917 }
 0xe04   :  { %v1930_v49 = vpop.permute.xlu0 %1929 }
 0xe05   :  { %v1937_v57 = vsel %vm85_vm1, %v1918_v29, %v1930_v49 }
 0xe06   :  { %1940 = vst.msk [vmem:[#allocation3 + $0x8] sm:$0xff] %vm365_vm0, %v1937_v57 }
 0xe08   :  { %v1920_v19 = vpop.permute.xlu1 %1919 }
 0xe09   :  { %v1932_v50 = vpop.permute.xlu0 %1931 }
 0xe0a   :  { %v1938_v51 = vsel %vm85_vm1, %v1920_v19, %v1932_v50 }
 0xe0b   :  { %1941 = vst.msk [vmem:[#allocation3 + $0x10] sm:$0xff] %vm365_vm0, %v1938_v51 }
 0xe0c   :  { %v1946_v41 = vpop.permute.xlu1 %1945 }
 0xe0d   :  { %v1961_v25 = vld [vmem:[#allocation3 + $0x8] sm:$0xff]  ;;  %v1954_v32 = vsel %vm85_vm1, %v1946_v41, %v5153_v8  ;;  %v1948_v33 = vpop.permute.xlu0 %1947  ;;  %v215_v8 = vadd.f32 %v5856_v2, %v4615_v42 }
 0xe0e   :  { %3607 = vmatmul.mubr.msk.f32.gmra.mxu1 %vm365_vm0, %v1961_v25  ;;  %1957 = vst.msk [vmem:[#allocation4] sm:$0xff] %vm365_vm0, %v1954_v32  ;;  %v1955_v45 = vsel %vm85_vm1, %v1948_v33, %v5156_v36  ;;  %v5858_v36 = vld [vmem:[#allocation11_spill] sm:$0xff] }
 0xe0f   :  { %2051 = vmatprep.mubr.f32.mxu1 %v5849_v24  ;;  %1958 = vst.msk [vmem:[#allocation4 + $0x8] sm:$0xff] %vm365_vm0, %v1955_v45  ;;  %v221_v63 = vadd.f32 %v5858_v36, %v4615_v42 }
 0xe12   :  { %v1962_v31 = vld [vmem:[#allocation3 + $0x10] sm:$0xff] }
 0xe13   :  { %3608 = vmatmul.mubr.msk.f32.gmra.mxu1 %vm365_vm0, %v1962_v31 }
 0xe14   :  { %3729 = vmatprep.mubr.msk.f32.mxu1 %vm4205_vm2, %v5849_v24 }
 0xe15   :  { %v5218_v42 = vld [vmem:[#allocation4] sm:$0xff] }
 0xe16   :  { %v1964_v25 = vld [vmem:[#allocation4 + $0x8] sm:$0xff] }
 0xec0   :  { %v2041_v17 = vpop.f32.mrf.mxu1 }
 0xec1   :  { %v2061_v28 = vadd.f32 %v2041_v17, %v297_v14 }
 0xec2   :  { %v2043_v52 = vpop.f32.mrf.mxu1 }
 0xec3   :  { %4073 = vtanh.f32 %v2061_v28  ;;  %v2067_v0 = vadd.f32 %v2043_v52, %v209_v26 }
 0xec5   :  { %4075 = vtanh.f32 %v2067_v0  ;;  %v3612_v39 = vmul.f32 -1.442695, %v2067_v0 }
 0xece   :  { %v2047_v6 = vpop.f32.mrf.mxu1 }
 0xecf   :  { %v2062_v53 = vadd.f32 %v2047_v6, %v303_v10 }
 0xed0   :  { %v2049_v11 = vpop.f32.mrf.mxu1  ;;  %v4074_v61 = vpop.eup %4073 }
 0xed1   :  { %4077 = vtanh.f32 %v2062_v53  ;;  %v2068_v58 = vadd.f32 %v2049_v11, %v215_v8  ;;  %2109 = vrot.lane.b32.xlu1 %v4074_v61, %s4202_s3  ;;  %v3610_v3 = vmul.f32 -1.442695, %v2062_v53 }
 0xed2   :  { %v4076_v12 = vpop.eup %4075 }
 0xed3   :  { %4079 = vtanh.f32 %v2068_v58  ;;  %v2053_v5 = vpop.f32.mrf.mxu1  ;;  %2181 = vrot.lane.b32.xlu0 %v4076_v12, %s4202_s3  ;;  %v3613_v44 = vmul.f32 -1.442695, %v2068_v58 }
 0xed4   :  { %v2063_v16 = vadd.f32 %v2053_v5, %v309_v48 }
 0xed5   :  { %1949 = vrot.lane.b32.xlu1 %v5161_v30, %s4204_s15  ;;  %v2055_v15 = vpop.f32.mrf.mxu1  ;;  %v3609_v30 = vmul.f32 -1.442695, %v2061_v28 }
 0xed6   :  { %v2069_v34 = vadd.f32 %v2055_v15, %v221_v63  ;;  %4081 = vtanh.f32 %v2063_v16  ;;  %v3611_v22 = vmul.f32 -1.442695, %v2063_v16 }
 0xed8   :  { %4083 = vtanh.f32 %v2069_v34  ;;  %v3614_v4 = vmul.f32 -1.442695, %v2069_v34 }
 0xed9   :  { %4085 = vpow2.f32 %v3609_v30  ;;  %v2284_v30 = vld [vmem:[%s5827_s5 + $0x38] sm:$0xff] }
 0xeda   :  { %4087 = vpow2.f32 %v3612_v39  ;;  %v2283_v39 = vld [vmem:[%s5827_s5 + $0x30] sm:$0xff]  ;;  %3701 = vmatpush3.msra.mxu0 %v2284_v30 }
 0xedb   :  { %4089 = vpow2.f32 %v3610_v3  ;;  %3702 = vmatprep.subr.mxu0 %v5849_v24 }
 0xedc   :  { %4091 = vpow2.f32 %v3613_v44  ;;  %3703 = vmatpush3.msra.mxu0 %v2283_v39 }
 0xedd   :  { %3704 = vmatprep.subr.mxu0 %v5849_v24 }
 0xede   :  { %v4078_v62 = vpop.eup %4077 }
 0xedf   :  { %2111 = vrot.lane.b32.xlu0 %v4078_v62, %s4202_s3 }
 0xee0   :  { %v4080_v43 = vpop.eup %4079 }
 0xee1   :  { %2183 = vrot.lane.b32.xlu1 %v4080_v43, %s4202_s3 }
 0xee3   :  { %v4082_v37 = vpop.eup %4081 }
 0xee4   :  { %2113 = vrot.lane.b32.xlu0 %v4082_v37, %s4202_s3 }
 0xee5   :  { %v4084_v46 = vpop.eup %4083 }
 0xee6   :  { %2185 = vrot.lane.b32.xlu1 %v4084_v46, %s4202_s3  ;;  %v4086_v13 = vpop.eup %4085 }
 0xee7   :  { %v4088_v18 = vpop.eup %4087  ;;  %v2079_v21 = vadd.f32 1.0, %v4086_v13 }
 0xee8   :  { %2094 = vrot.lane.b32.xlu0 %v5218_v42, %s4203_s30  ;;  %v2163_v27 = vadd.f32 1.0, %v4088_v18  ;;  %v4090_v9 = vpop.eup %4089 }
 0xee9   :  { %4093 = vrcp.f32 %v2079_v21  ;;  %v4092_v40 = vpop.eup %4091  ;;  %v2080_v20 = vadd.f32 1.0, %v4090_v9  ;;  %v2282_v21 = vld [vmem:[%s5827_s5 + $0x28] sm:$0xff] }
 0xeea   :  { %4095 = vpow2.f32 %v3611_v22  ;;  %v2164_v47 = vadd.f32 1.0, %v4092_v40  ;;  %3705 = vmatpush3.msra.mxu0 %v2282_v21  ;;  %v2281_v22 = vld [vmem:[%s5827_s5 + $0x20] sm:$0xff]  ;;  %v2278_v9 = vld [vmem:[%s5827_s5 + $0x8] sm:$0xff] }
 0xeeb   :  { %4097 = vrcp.f32 %v2163_v27  ;;  %3706 = vmatprep.subr.mxu0 %v5849_v24  ;;  %v2280_v27 = vld [vmem:[%s5827_s5 + $0x18] sm:$0xff] }
 0xeec   :  { %4099 = vpow2.f32 %v3614_v4  ;;  %3707 = vmatpush3.msra.mxu0 %v2281_v22  ;;  %v2279_v4 = vld [vmem:[%s5827_s5 + $0x10] sm:$0xff] }
 0xeed   :  { %4101 = vrcp.f32 %v2080_v20  ;;  %3708 = vmatprep.subr.mxu0 %v5849_v24  ;;  %v2277_v20 = vld [vmem:[%s5827_s5] sm:$0xff] }
 0xeee   :  { %4103 = vrcp.f32 %v2164_v47  ;;  %3709 = vmatpush3.msra.mxu0 %v2280_v27  ;;  %v5499_v27 = vld [vmem:[%s5832_s8] ss:$0 sm:$0xff] }
 0xeef   :  { %3710 = vmatprep.subr.mxu0 %v5849_v24 }
 0xef0   :  { %3711 = vmatpush3.msra.mxu0 %v2279_v4 }
 0xef1   :  { %3712 = vmatprep.subr.mxu0 %v5849_v24 }
 0xef2   :  { %3713 = vmatpush3.msra.mxu0 %v2278_v9 }
 0xef3   :  { %3714 = vmatprep.subr.mxu0 %v5849_v24 }
 0xef4   :  { %3715 = vmatpush3.msra.mxu0 %v2277_v20 }
 0xef6   :  { %v5222_v55 = vpop.eup %4093 }
 0xef7   :  { %v4096_v23 = vpop.eup %4095 }
 0xef8   :  { %v5225_v56 = vpop.eup %4097  ;;  %v2081_v57 = vadd.f32 1.0, %v4096_v23 }
 0xef9   :  { %v4100_v29 = vpop.eup %4099  ;;  %v2175_v8 = vmul.f32 %v5225_v56, %v5218_v42 }
 0xefa   :  { %v2165_v41 = vadd.f32 1.0, %v4100_v29  ;;  %4105 = vrcp.f32 %v2081_v57  ;;  %v5235_v45 = vpop.eup %4101 }
 0xefb   :  { %v5237_v31 = vpop.eup %4103 }
 0xefc   :  { %4107 = vrcp.f32 %v2165_v41  ;;  %v2176_v48 = vmul.f32 %v5237_v31, %v1964_v25 }
 0xf07   :  { %v5243_v17 = vpop.eup %4105 }
 0xf09   :  { %v5246_v28 = vpop.eup %4107 }
 0xf43   :  { %v2110_v35 = vpop.permute.xlu1 %2109 }
 0xf44   :  { %v2118_v54 = vmul.f32 %v5222_v55, %v2110_v35 }
 0xf45   :  { %v2182_v49 = vpop.permute.xlu0 %2181 }
 0xf46   :  { %2124 = vrot.lane.b32.xlu1 %v2118_v54, %s4203_s30  ;;  %v2190_v19 = vmul.f32 %v5225_v56, %v2182_v49  ;;  %v5324_v54 = vld [vmem:[%s5828_s9 + $0x78] sm:$0xff] }
 0xf47   :  { %v1950_v50 = vpop.permute.xlu1 %1949  ;;  %2548 = vmatprep.subr.mxu0 %v5324_v54 }
 0xf48   :  { %v1956_v51 = vsel %vm85_vm1, %v1950_v50, %v5163_v38  ;;  %2196 = vrot.lane.b32.xlu0 %v2190_v19, %s4203_s30 }
 0xf49   :  { %1959 = vst.msk [vmem:[#allocation4 + $0x10] sm:$0xff] %vm365_vm0, %v1956_v51 }
 0xf4a   :  { %2096 = vrot.lane.b32.xlu1 %v1964_v25, %s4203_s30  ;;  %v2384_v25 = vld [vmem:[%s5830_s4] sm:$0xff] }
 0xf50   :  { %v1965_v33 = vld [vmem:[#allocation4 + $0x10] sm:$0xff] }
 0xf51   :  { %v2112_v32 = vpop.permute.xlu0 %2111  ;;  %2098 = vrot.lane.b32.xlu0 %v1965_v33, %s4203_s30  ;;  %v2177_v43 = vmul.f32 %v5246_v28, %v1965_v33  ;;  %v5348_v33 = vld [vmem:[%s5828_s9 + $0x70] sm:$0xff] }
 0xf52   :  { %v2119_v38 = vmul.f32 %v5235_v45, %v2112_v32 }
 0xf53   :  { %v2184_v60 = vpop.permute.xlu1 %2183 }
 0xf54   :  { %v2191_v14 = vmul.f32 %v5237_v31, %v2184_v60  ;;  %v5375_v60 = vld [vmem:[%s5828_s9 + $0x50] sm:$0xff] }
 0xf55   :  { %2126 = vrot.lane.b32.xlu0 %v2119_v38, %s4203_s30  ;;  %v5369_v38 = vld [vmem:[%s5828_s9 + $0x58] sm:$0xff] }
 0xf56   :  { %2198 = vrot.lane.b32.xlu1 %v2191_v14, %s4203_s30  ;;  %v2114_v7 = vpop.permute.xlu0 %2113  ;;  %v5381_v14 = vld [vmem:[%s5828_s9 + $0x48] sm:$0xff] }
 0xf57   :  { %v2120_v26 = vmul.f32 %v5243_v17, %v2114_v7  ;;  %v5393_v7 = vld [vmem:[%s5828_s9 + $0x38] sm:$0xff] }
 0xf58   :  { %v2186_v52 = vpop.permute.xlu1 %2185 }
 0xf59   :  { %v2192_v0 = vmul.f32 %v5246_v28, %v2186_v52  ;;  %v5411_v52 = vld [vmem:[%s5828_s9 + $0x20] sm:$0xff] }
 0xf5a   :  { %2128 = vrot.lane.b32.xlu1 %v2120_v26, %s4203_s30  ;;  %v2095_v59 = vpop.permute.xlu0 %2094  ;;  %v5399_v26 = vld [vmem:[%s5828_s9 + $0x30] sm:$0xff] }
 0xf5b   :  { %2200 = vrot.lane.b32.xlu0 %v2192_v0, %s4203_s30  ;;  %v2103_v10 = vmul.f32 %v5222_v55, %v2095_v59  ;;  %v5417_v0 = vld [vmem:[%s5828_s9 + $0x18] sm:$0xff]  ;;  %v5423_v59 = vld [vmem:[%s5828_s9 + $0x10] sm:$0xff] }
 0xfb8   :  { %v2125_v6 = vpop.permute.xlu1 %2124 }
 0xfb9   :  { %v5252_v2 = vadd.f32 %v2125_v6, %v2103_v10  ;;  %v5429_v10 = vld [vmem:[%s5828_s9 + $0x8] sm:$0xff]  ;;  %v5435_v6 = vld [vmem:[%s5828_s9] sm:$0xff] }
 0xfba   :  { %v2197_v53 = vpop.permute.xlu0 %2196 }
 0xfbb   :  { %4109 = vtanh.f32 %v5252_v2  ;;  %v5257_v11 = vadd.f32 %v2197_v53, %v2175_v8 }
 0xfbc   :  { %v2097_v61 = vpop.permute.xlu1 %2096 }
 0xfbd   :  { %4111 = vtanh.f32 %v5257_v11  ;;  %v2104_v12 = vmul.f32 %v5235_v45, %v2097_v61 }
 0xfc3   :  { %v2099_v58 = vpop.permute.xlu0 %2098 }
 0xfc4   :  { %v2105_v34 = vmul.f32 %v5243_v17, %v2099_v58 }
 0xfc7   :  { %v2127_v1 = vpop.permute.xlu0 %2126 }
 0xfc8   :  { %v4110_v5 = vpop.eup %4109  ;;  %v5262_v36 = vadd.f32 %v2127_v1, %v2104_v12  ;;  %v2199_v63 = vpop.permute.xlu1 %2198 }
 0xfc9   :  { %v5264_v16 = vadd.f32 %v2199_v63, %v2176_v48  ;;  %2142 = vrot.lane.b32.xlu1 %v4110_v5, %s4202_s3 }
 0xfca   :  { %4113 = vtanh.f32 %v5262_v36  ;;  %v4112_v15 = vpop.eup %4111 }
 0xfcb   :  { %4115 = vtanh.f32 %v5264_v16  ;;  %2214 = vrot.lane.b32.xlu0 %v4112_v15, %s4202_s3 }
 0xfcc   :  { %v2129_v62 = vpop.permute.xlu1 %2128 }
 0xfcd   :  { %v5272_v37 = vadd.f32 %v2129_v62, %v2105_v34  ;;  %v2201_v46 = vpop.permute.xlu0 %2200 }
 0xfce   :  { %v5274_v42 = vadd.f32 %v2201_v46, %v2177_v43  ;;  %v2527_v43 = vld [vmem:[#allocation7] sm:$0xff] }
 0xfcf   :  { %4117 = vtanh.f32 %v5272_v37 }
 0xfd0   :  { %4119 = vtanh.f32 %v5274_v42 }
 0xfd7   :  { %v4114_v3 = vpop.eup %4113 }
 0xfd8   :  { %v4116_v44 = vpop.eup %4115  ;;  %2144 = vrot.lane.b32.xlu1 %v4114_v3, %s4202_s3 }
 0xfd9   :  { %2216 = vrot.lane.b32.xlu0 %v4116_v44, %s4202_s3  ;;  %v3615_v44 = vld [vmem:[%s5831_s6] ss:$0 sm:$0xff] }
 0xfdc   :  { %v4118_v13 = vpop.eup %4117 }
 0xfdd   :  { %2146 = vrot.lane.b32.xlu1 %v4118_v13, %s4202_s3  ;;  %v4120_v18 = vpop.eup %4119 }
 0xfde   :  { %2218 = vrot.lane.b32.xlu0 %v4120_v18, %s4202_s3 }
0x103b   :  { %v2143_v40 = vpop.permute.xlu1 %2142 }
0x103c   :  { %v2151_v47 = vmul.f32 %v5222_v55, %v2143_v40  ;;  %v2390_v55 = vld [vmem:[%s5829_s7 + $0x8] sm:$0xff] }
0x103d   :  { %v2215_v35 = vpop.permute.xlu0 %2214  ;;  %3726 = vmatpush3.msra.mxu1 %v2390_v55  ;;  %v2528_v55 = vld [vmem:[#allocation8] sm:$0xff] }
0x103e   :  { %2229 = vrot.lane.b32.xlu1 %v2151_v47, %s4203_s30  ;;  %v2223_v23 = vmul.f32 %v5225_v56, %v2215_v35  ;;  %v2389_v56 = vld [vmem:[%s5829_s7] sm:$0xff]  ;;  %3727 = vmatprep.subr.mxu1 %v5849_v24 }
0x103f   :  { %3728 = vmatpush3.msra.mxu1 %v2389_v56 }
0x1040   :  { %2241 = vrot.lane.b32.xlu0 %v2223_v23, %s4202_s3  ;;  %2696 = vmatprep.subr.mxu1 %v5324_v54 }
0x1041   :  { %3730 = vmatmul.mubr.msk.f32.vlgmr.msra.gmra.mxu1 %vm2398_vm3, %v2384_v25 }
0x1042   :  { %2697 = vmatpush1.msra.mxu1 %v5348_v33  ;;  %3732 = vmatprep.mubr.msk.f32.mxu1 %vm4205_vm2, %v5849_v24 }
0x104a   :  { %v2145_v29 = vpop.permute.xlu1 %2144 }
0x104b   :  { %v2217_v49 = vpop.permute.xlu0 %2216  ;;  %v2152_v57 = vmul.f32 %v5235_v45, %v2145_v29  ;;  %v5354_v45 = vld [vmem:[%s5828_s9 + $0x68] sm:$0xff] }
0x104c   :  { %v2224_v19 = vmul.f32 %v5237_v31, %v2217_v49  ;;  %v5363_v31 = vld [vmem:[%s5828_s9 + $0x60] sm:$0xff]  ;;  %2698 = vmatprep.subr.mxu1 %v5354_v45 }
0x104d   :  { %2231 = vrot.lane.b32.xlu1 %v2152_v57, %s4203_s30  ;;  %2699 = vmatpush1.msra.mxu1 %v5363_v31 }
0x104e   :  { %2243 = vrot.lane.b32.xlu0 %v2224_v19, %s4202_s3  ;;  %2700 = vmatprep.subr.mxu1 %v5369_v38 }
0x104f   :  { %v2147_v50 = vpop.permute.xlu1 %2146  ;;  %2701 = vmatpush1.msra.mxu1 %v5375_v60 }
0x1050   :  { %v2153_v51 = vmul.f32 %v5243_v17, %v2147_v50  ;;  %v2219_v41 = vpop.permute.xlu0 %2218  ;;  %v5387_v17 = vld [vmem:[%s5828_s9 + $0x40] sm:$0xff]  ;;  %2702 = vmatprep.subr.mxu1 %v5381_v14 }
0x1051   :  { %v2225_v32 = vmul.f32 %v5246_v28, %v2219_v41  ;;  %2703 = vmatpush1.msra.mxu1 %v5387_v17  ;;  %v5405_v28 = vld [vmem:[%s5828_s9 + $0x28] sm:$0xff] }
0x1052   :  { %2233 = vrot.lane.b32.xlu1 %v2153_v51, %s4203_s30  ;;  %2704 = vmatprep.subr.mxu1 %v5393_v7 }
0x1053   :  { %2245 = vrot.lane.b32.xlu0 %v2225_v32, %s4202_s3  ;;  %2705 = vmatpush1.msra.mxu1 %v5399_v26 }
0x1054   :  { %2706 = vmatprep.subr.mxu1 %v5405_v28 }
0x1055   :  { %2707 = vmatpush1.msra.mxu1 %v5411_v52 }
0x1056   :  { %2708 = vmatprep.subr.mxu1 %v5417_v0 }
0x1057   :  { %2709 = vmatpush1.msra.mxu1 %v5423_v59 }
0x1058   :  { %2710 = vmatprep.subr.mxu1 %v5429_v10 }
0x1059   :  { %2711 = vmatpush1.msra.mxu1 %v5435_v6 }
0x105a   :  { %2996 = vmatprep.subr.mxu1 %v5324_v54 }
0x10b0   :  { %v2230_v8 = vpop.permute.xlu1 %2229 }
0x10b2   :  { %v2242_v53 = vpop.permute.xlu0 %2241 }
0x10b3   :  { %v2250_v61 = vsel %vm85_vm1, %v2230_v8, %v2242_v53 }
0x10b4   :  { %2253 = vst.msk [vmem:[#allocation3] sm:$0xff] %vm365_vm0, %v2250_v61 }
0x10bb   :  { %v2274_v58 = vld [vmem:[#allocation3] sm:$0xff] }
0x10bc   :  { %3717 = vmatmul.mubr.msk.f32.vlgmr.msra.gmra.mxu0 %vm365_vm0, %v2274_v58 }
0x10bd   :  { %2549 = vmatpush1.msra.mxu0 %v5348_v33  ;;  %3719 = vmatprep.mubr.msk.f32.mxu0 %vm4205_vm2, %v5849_v24 }
0x10be   :  { %2550 = vmatprep.subr.mxu0 %v5354_v45 }
0x10bf   :  { %v2232_v12 = vpop.permute.xlu1 %2231  ;;  %2551 = vmatpush1.msra.mxu0 %v5363_v31 }
0x10c0   :  { %v2244_v1 = vpop.permute.xlu0 %2243  ;;  %2552 = vmatprep.subr.mxu0 %v5369_v38 }
0x10c1   :  { %v2251_v48 = vsel %vm85_vm1, %v2232_v12, %v2244_v1  ;;  %2553 = vmatpush1.msra.mxu0 %v5375_v60 }
0x10c2   :  { %2254 = vst.msk [vmem:[#allocation3 + $0x8] sm:$0xff] %vm365_vm0, %v2251_v48  ;;  %2554 = vmatprep.subr.mxu0 %v5381_v14 }
0x10c3   :  { %2555 = vmatpush1.msra.mxu0 %v5387_v17 }
0x10c4   :  { %v2234_v5 = vpop.permute.xlu1 %2233  ;;  %2556 = vmatprep.subr.mxu0 %v5393_v7 }
0x10c5   :  { %2557 = vmatpush1.msra.mxu0 %v5399_v26  ;;  %v2246_v63 = vpop.permute.xlu0 %2245 }
0x10c6   :  { %2558 = vmatprep.subr.mxu0 %v5405_v28  ;;  %v2252_v15 = vsel %vm85_vm1, %v2234_v5, %v2246_v63 }
0x10c7   :  { %2559 = vmatpush1.msra.mxu0 %v5411_v52  ;;  %2255 = vst.msk [vmem:[#allocation3 + $0x10] sm:$0xff] %vm365_vm0, %v2252_v15 }
0x10c8   :  { %2560 = vmatprep.subr.mxu0 %v5417_v0 }
0x10c9   :  { %v2275_v34 = vld [vmem:[#allocation3 + $0x8] sm:$0xff]  ;;  %2561 = vmatpush1.msra.mxu0 %v5423_v59 }
0x10ca   :  { %3720 = vmatmul.mubr.msk.f32.gmra.mxu0 %vm365_vm0, %v2275_v34  ;;  %2562 = vmatprep.subr.mxu0 %v5429_v10 }
0x10cb   :  { %3722 = vmatprep.mubr.msk.f32.mxu0 %vm4205_vm2, %v5849_v24  ;;  %2563 = vmatpush1.msra.mxu0 %v5435_v6 }
0x10cc   :  { %2846 = vmatprep.subr.mxu0 %v5324_v54 }
0x10ce   :  { %v5468_v62 = vld [vmem:[#allocation3 + $0x10] sm:$0xff] }
0x10cf   :  { %3723 = vmatmul.mubr.msk.f32.gmra.mxu0 %vm365_vm0, %v5468_v62 }
0x10d0   :  { %2596 = vmatprep.mubr.f32.mxu0 %v5849_v24 }
0x10d3   :  { %3625 = vmatmul.mubr.msk.f32.vlgmr.msra.gmra.mxu0 %vm365_vm0, %v2527_v43  ;;  %v2385_v43 = vld [vmem:[%s5830_s4 + $0x8] sm:$0xff] }
0x10d4   :  { %2847 = vmatpush1.msra.mxu0 %v5348_v33  ;;  %2894 = vmatprep.mubr.f32.mxu0 %v5849_v24 }
0x10d5   :  { %2848 = vmatprep.subr.mxu0 %v5354_v45  ;;  %3733 = vmatmul.mubr.msk.f32.gmra.mxu1 %vm2398_vm3, %v2385_v43 }
0x10d6   :  { %2849 = vmatpush1.msra.mxu0 %v5363_v31  ;;  %3735 = vmatprep.mubr.msk.f32.mxu1 %vm4205_vm2, %v5849_v24 }
0x10d7   :  { %2850 = vmatprep.subr.mxu0 %v5369_v38 }
0x10d8   :  { %2851 = vmatpush1.msra.mxu0 %v5375_v60 }
0x10d9   :  { %2852 = vmatprep.subr.mxu0 %v5381_v14 }
0x10da   :  { %2853 = vmatpush1.msra.mxu0 %v5387_v17 }
0x10db   :  { %2854 = vmatprep.subr.mxu0 %v5393_v7 }
0x10dc   :  { %2855 = vmatpush1.msra.mxu0 %v5399_v26 }
0x10dd   :  { %2856 = vmatprep.subr.mxu0 %v5405_v28 }
0x10de   :  { %2857 = vmatpush1.msra.mxu0 %v5411_v52 }
0x10df   :  { %2858 = vmatprep.subr.mxu0 %v5417_v0 }
0x10e0   :  { %2859 = vmatpush1.msra.mxu0 %v5423_v59 }
0x10e1   :  { %2860 = vmatprep.subr.mxu0 %v5429_v10 }
0x10e2   :  { %2861 = vmatpush1.msra.mxu0 %v5435_v6 }
0x10e3   :  { %3106 = vmatprep.subr.mxu0 %v5324_v54 }
0x1101   :  { %v2480_v46 = vpop.f32.mrf.mxu1 }
0x1102   :  { %v2481_v20 = vadd.f32 %v5499_v27, %v2480_v46  ;;  %v2386_v46 = vld [vmem:[%s5830_s4 + $0x10] sm:$0xff] }
0x1103   :  { %v3731_v30 = vpop.f32.mrf.mxu1  ;;  %3736 = vmatmul.mubr.msk.f32.gmra.mxu1 %vm2398_vm3, %v2386_v46 }
0x1104   :  { %3738 = vmatprep.mubr.msk.f32.mxu1 %vm4205_vm2, %v5849_v24 }
0x117c   :  { %v2367_v39 = vpop.f32.mrf.mxu0 }
0x117d   :  { %v2368_v40 = vadd.f32 %v3615_v44, %v2367_v39 }
0x117e   :  { %v3718_v3 = vpop.f32.mrf.mxu0 }
0x117f   :  { %v2387_v3 = vld [vmem:[%s5830_s4 + $0x18] sm:$0xff] }
0x1180   :  { %3739 = vmatmul.mubr.msk.f32.gmra.mxu1 %vm2398_vm3, %v2387_v3 }
0x1181   :  { %3741 = vmatprep.mubr.msk.f32.mxu1 %vm4205_vm2, %v5849_v24 }
0x118a   :  { %v2372_v13 = vpop.f32.mrf.mxu0 }
0x118b   :  { %v5494_v18 = vadd.f32 %v3615_v44, %v2372_v13 }
0x118c   :  { %v3721_v21 = vpop.f32.mrf.mxu0 }
0x118f   :  { %v2377_v22 = vpop.f32.mrf.mxu0 }
0x1190   :  { %v5501_v4 = vadd.f32 %v3615_v44, %v2377_v22  ;;  %v2388_v44 = vld [vmem:[%s5830_s4 + $0x20] sm:$0xff] }
0x1191   :  { %v3724_v9 = vpop.f32.mrf.mxu0  ;;  %3742 = vmatmul.mubr.msk.f32.gmra.mxu1 %vm2398_vm3, %v2388_v44 }
0x1192   :  { %2744 = vmatprep.mubr.f32.mxu1 %v5849_v24 }
0x1193   :  { %v2598_v47 = vpop.f32.mrf.mxu0 }
0x1194   :  { %v2604_v35 = vadd.f32 %v2598_v47, %v2368_v40 }
0x1195   :  { %v2600_v23 = vpop.f32.mrf.mxu0  ;;  %v2485_v40 = vpop.f32.mrf.mxu1 }
0x1196   :  { %4121 = vtanh.f32 %v2604_v35  ;;  %v2606_v54 = vadd.f32 %v2600_v23, %v2481_v20  ;;  %v3626_v57 = vmul.f32 -1.442695, %v2604_v35 }
0x1197   :  { %v3734_v20 = vpop.f32.mrf.mxu1 }
0x1198   :  { %4123 = vtanh.f32 %v2606_v54  ;;  %v3627_v56 = vmul.f32 -1.442695, %v2606_v54 }
0x1199   :  { %4125 = vpow2.f32 %v3626_v57 }
0x119a   :  { %4127 = vpow2.f32 %v3627_v56 }
0x11a3   :  { %v4122_v29 = vpop.eup %4121 }
0x11a4   :  { %2620 = vrot.lane.b32.xlu1 %v4122_v29, %s4202_s3 }
0x11a5   :  { %v4124_v49 = vpop.eup %4123 }
0x11a6   :  { %2644 = vrot.lane.b32.xlu0 %v4124_v49, %s4202_s3  ;;  %v4126_v19 = vpop.eup %4125 }
0x11a7   :  { %v4128_v50 = vpop.eup %4127  ;;  %v2610_v51 = vadd.f32 1.0, %v4126_v19 }
0x11a8   :  { %2615 = vrot.lane.b32.xlu1 %v2528_v55, %s4203_s30  ;;  %v2638_v41 = vadd.f32 1.0, %v4128_v50 }
0x11a9   :  { %4129 = vrcp.f32 %v2610_v51 }
0x11aa   :  { %4131 = vrcp.f32 %v2638_v41 }
0x11b6   :  { %v4130_v25 = vpop.eup %4129 }
0x11b7   :  { %v4132_v53 = vpop.eup %4131 }
0x11b8   :  { %v2642_v63 = vmul.f32 %v4132_v53, %v2528_v55 }
0x11c3   :  { %v5537_v47 = vpop.f32.mrf.mxu1 }
0x11c5   :  { %v3737_v35 = vpop.f32.mrf.mxu1 }
0x1216   :  { %v2621_v32 = vpop.permute.xlu1 %2620 }
0x1217   :  { %v2623_v8 = vmul.f32 %v4130_v25, %v2621_v32 }
0x1218   :  { %v2645_v61 = vpop.permute.xlu0 %2644 }
0x1219   :  { %2625 = vrot.lane.b32.xlu0 %v2623_v8, %s4203_s30  ;;  %v2647_v58 = vmul.f32 %v4132_v53, %v2645_v61 }
0x121a   :  { %v2616_v12 = vpop.permute.xlu1 %2615 }
0x121b   :  { %2649 = vrot.lane.b32.xlu1 %v2647_v58, %s4203_s30  ;;  %v2618_v1 = vmul.f32 %v4130_v25, %v2616_v12 }
0x1240   :  { %v5561_v56 = vpop.f32.mrf.mxu1 }
0x1242   :  { %v3740_v19 = vpop.f32.mrf.mxu1 }
0x1251   :  { %v5563_v50 = vpop.f32.mrf.mxu1 }
0x1253   :  { %v3743_v51 = vpop.f32.mrf.mxu1 }
0x128b   :  { %v2626_v48 = vpop.permute.xlu0 %2625 }
0x128c   :  { %v2628_v5 = vadd.f32 %v2626_v48, %v2618_v1 }
0x128d   :  { %v2650_v15 = vpop.permute.xlu1 %2649 }
0x128e   :  { %4133 = vtanh.f32 %v2628_v5  ;;  %v2652_v34 = vadd.f32 %v2650_v15, %v2642_v63 }
0x1290   :  { %4135 = vtanh.f32 %v2652_v34 }
0x129b   :  { %v4134_v30 = vpop.eup %4133 }
0x129c   :  { %2631 = vrot.lane.b32.xlu0 %v4134_v30, %s4202_s3 }
0x129d   :  { %v4136_v39 = vpop.eup %4135 }
0x129e   :  { %2655 = vrot.lane.b32.xlu1 %v4136_v39, %s4202_s3 }
0x130e   :  { %v2632_v13 = vpop.permute.xlu0 %2631 }
0x130f   :  { %v2634_v21 = vmul.f32 %v4130_v25, %v2632_v13  ;;  %v2486_v25 = vadd.f32 %v5499_v27, %v2485_v40 }
0x1310   :  { %v2656_v22 = vpop.permute.xlu1 %2655 }
0x1311   :  { %2660 = vrot.lane.b32.xlu0 %v2634_v21, %s4203_s30  ;;  %v2658_v9 = vmul.f32 %v4132_v53, %v2656_v22 }
0x1313   :  { %2664 = vrot.lane.b32.xlu1 %v2658_v9, %s4202_s3 }
0x1315   :  { %2670 = vrot.lane.b32.xlu0 %v2628_v5, %s4204_s15 }
0x1383   :  { %v2661_v23 = vpop.permute.xlu0 %2660 }
0x1385   :  { %v2665_v54 = vpop.permute.xlu1 %2664 }
0x1386   :  { %v2667_v29 = vsel %vm85_vm1, %v2661_v23, %v2665_v54 }
0x1387   :  { %v2671_v55 = vpop.permute.xlu0 %2670  ;;  %2668 = vst.msk [vmem:[#allocation7] sm:$0xff] %vm365_vm0, %v2667_v29 }
0x1388   :  { %v2673_v49 = vsel %vm85_vm1, %v2671_v55, %v2652_v34 }
0x1389   :  { %2674 = vst.msk [vmem:[#allocation8] sm:$0xff] %vm365_vm0, %v2673_v49 }
0x138e   :  { %v2675_v57 = vld [vmem:[#allocation7] sm:$0xff] }
0x138f   :  { %3628 = vmatmul.mubr.msk.f32.vlgmr.msra.gmra.mxu1 %vm365_vm0, %v2675_v57 }
0x1390   :  { %2997 = vmatpush1.msra.mxu1 %v5348_v33  ;;  %3044 = vmatprep.mubr.f32.mxu1 %v5849_v24  ;;  %v2676_v12 = vld [vmem:[#allocation8] sm:$0xff] }
0x1391   :  { %2998 = vmatprep.subr.mxu1 %v5354_v45 }
0x1392   :  { %2999 = vmatpush1.msra.mxu1 %v5363_v31 }
0x1393   :  { %3000 = vmatprep.subr.mxu1 %v5369_v38 }
0x1394   :  { %3001 = vmatpush1.msra.mxu1 %v5375_v60 }
0x1395   :  { %3002 = vmatprep.subr.mxu1 %v5381_v14 }
0x1396   :  { %3003 = vmatpush1.msra.mxu1 %v5387_v17 }
0x1397   :  { %3004 = vmatprep.subr.mxu1 %v5393_v7 }
0x1398   :  { %3005 = vmatpush1.msra.mxu1 %v5399_v26 }
0x1399   :  { %3006 = vmatprep.subr.mxu1 %v5405_v28 }
0x139a   :  { %3007 = vmatpush1.msra.mxu1 %v5411_v52 }
0x139b   :  { %3008 = vmatprep.subr.mxu1 %v5417_v0 }
0x139c   :  { %3009 = vmatpush1.msra.mxu1 %v5423_v59 }
0x139d   :  { %3010 = vmatprep.subr.mxu1 %v5429_v10 }
0x139e   :  { %3011 = vmatpush1.msra.mxu1 %v5435_v6 }
0x139f   :  { %3744 = vmatprep.subr.mxu1 %v5849_v24 }
0x144f   :  { %v2746_v41 = vpop.f32.mrf.mxu1 }
0x1450   :  { %v2753_v32 = vadd.f32 %v2746_v41, %v5494_v18 }
0x1451   :  { %v2748_v8 = vpop.f32.mrf.mxu1 }
0x1452   :  { %4137 = vtanh.f32 %v2753_v32  ;;  %v2756_v53 = vadd.f32 %v2748_v8, %v2486_v25  ;;  %v3629_v1 = vmul.f32 -1.442695, %v2753_v32 }
0x1454   :  { %4139 = vtanh.f32 %v2756_v53  ;;  %v3630_v48 = vmul.f32 -1.442695, %v2756_v53 }
0x1455   :  { %4141 = vpow2.f32 %v3629_v1 }
0x1456   :  { %4143 = vpow2.f32 %v3630_v48 }
0x145f   :  { %v4138_v61 = vpop.eup %4137 }
0x1460   :  { %2770 = vrot.lane.b32.xlu1 %v4138_v61, %s4202_s3 }
0x1461   :  { %v4140_v58 = vpop.eup %4139 }
0x1462   :  { %2794 = vrot.lane.b32.xlu0 %v4140_v58, %s4202_s3  ;;  %v4142_v5 = vpop.eup %4141 }
0x1463   :  { %v4144_v63 = vpop.eup %4143  ;;  %v2760_v18 = vadd.f32 1.0, %v4142_v5 }
0x1464   :  { %2765 = vrot.lane.b32.xlu1 %v2676_v12, %s4203_s30  ;;  %v2788_v15 = vadd.f32 1.0, %v4144_v63 }
0x1465   :  { %4145 = vrcp.f32 %v2760_v18 }
0x1466   :  { %4147 = vrcp.f32 %v2788_v15 }
0x1472   :  { %v4146_v34 = vpop.eup %4145 }
0x1473   :  { %v4148_v30 = vpop.eup %4147 }
0x1474   :  { %v2792_v9 = vmul.f32 %v4148_v30, %v2676_v12 }
0x14d2   :  { %v2771_v43 = vpop.permute.xlu1 %2770 }
0x14d3   :  { %v2773_v46 = vmul.f32 %v4146_v34, %v2771_v43 }
0x14d4   :  { %v2795_v39 = vpop.permute.xlu0 %2794 }
0x14d5   :  { %2775 = vrot.lane.b32.xlu0 %v2773_v46, %s4203_s30  ;;  %v2797_v3 = vmul.f32 %v4148_v30, %v2795_v39 }
0x14d6   :  { %v2766_v44 = vpop.permute.xlu1 %2765 }
0x14d7   :  { %2799 = vrot.lane.b32.xlu1 %v2797_v3, %s4203_s30  ;;  %v2768_v13 = vmul.f32 %v4146_v34, %v2766_v44 }
0x1547   :  { %v2776_v21 = vpop.permute.xlu0 %2775 }
0x1548   :  { %v2778_v22 = vadd.f32 %v2776_v21, %v2768_v13 }
0x1549   :  { %v2800_v40 = vpop.permute.xlu1 %2799 }
0x154a   :  { %4149 = vtanh.f32 %v2778_v22  ;;  %v2802_v20 = vadd.f32 %v2800_v40, %v2792_v9 }
0x154c   :  { %4151 = vtanh.f32 %v2802_v20 }
0x1557   :  { %v4150_v35 = vpop.eup %4149 }
0x1558   :  { %2781 = vrot.lane.b32.xlu0 %v4150_v35, %s4202_s3 }
0x1559   :  { %v4152_v23 = vpop.eup %4151 }
0x155a   :  { %2805 = vrot.lane.b32.xlu1 %v4152_v23, %s4202_s3 }
0x15ca   :  { %v2782_v54 = vpop.permute.xlu0 %2781 }
0x15cb   :  { %v2784_v29 = vmul.f32 %v4146_v34, %v2782_v54 }
0x15cc   :  { %v2806_v55 = vpop.permute.xlu1 %2805 }
0x15cd   :  { %2810 = vrot.lane.b32.xlu0 %v2784_v29, %s4203_s30  ;;  %v2808_v49 = vmul.f32 %v4148_v30, %v2806_v55 }
0x15cf   :  { %2814 = vrot.lane.b32.xlu1 %v2808_v49, %s4202_s3 }
0x15d1   :  { %2820 = vrot.lane.b32.xlu0 %v2778_v22, %s4204_s15 }
0x163f   :  { %v2811_v57 = vpop.permute.xlu0 %2810 }
0x1641   :  { %v2815_v19 = vpop.permute.xlu1 %2814 }
0x1642   :  { %v2817_v51 = vsel %vm85_vm1, %v2811_v57, %v2815_v19 }
0x1643   :  { %v2821_v41 = vpop.permute.xlu0 %2820  ;;  %2818 = vst.msk [vmem:[#allocation7] sm:$0xff] %vm365_vm0, %v2817_v51 }
0x1644   :  { %v2823_v25 = vsel %vm85_vm1, %v2821_v41, %v2802_v20  ;;  %v2496_v20 = vadd.f32 %v5499_v27, %v5561_v56 }
0x1645   :  { %2824 = vst.msk [vmem:[#allocation8] sm:$0xff] %vm365_vm0, %v2823_v25 }
0x164a   :  { %v2825_v32 = vld [vmem:[#allocation7] sm:$0xff] }
0x164b   :  { %3631 = vmatmul.mubr.msk.f32.vlgmr.msra.gmra.mxu0 %vm365_vm0, %v2825_v32 }
0x164c   :  { %3107 = vmatpush1.msra.mxu0 %v5348_v33  ;;  %3154 = vmatprep.mubr.f32.mxu0 %v5849_v24 }
0x164d   :  { %3108 = vmatprep.subr.mxu0 %v5354_v45  ;;  %v2491_v45 = vadd.f32 %v5499_v27, %v5537_v47 }
0x164e   :  { %3109 = vmatpush1.msra.mxu0 %v5363_v31 }
0x164f   :  { %3110 = vmatprep.subr.mxu0 %v5369_v38 }
0x1650   :  { %3111 = vmatpush1.msra.mxu0 %v5375_v60 }
0x1651   :  { %3112 = vmatprep.subr.mxu0 %v5381_v14 }
0x1652   :  { %3113 = vmatpush1.msra.mxu0 %v5387_v17 }
0x1653   :  { %3114 = vmatprep.subr.mxu0 %v5393_v7  ;;  %v2826_v7 = vld [vmem:[#allocation8] sm:$0xff] }
0x1654   :  { %3115 = vmatpush1.msra.mxu0 %v5399_v26 }
0x1655   :  { %3116 = vmatprep.subr.mxu0 %v5405_v28 }
0x1656   :  { %3117 = vmatpush1.msra.mxu0 %v5411_v52 }
0x1657   :  { %3118 = vmatprep.subr.mxu0 %v5417_v0 }
0x1658   :  { %3119 = vmatpush1.msra.mxu0 %v5423_v59 }
0x1659   :  { %3120 = vmatprep.subr.mxu0 %v5429_v10 }
0x165a   :  { %3121 = vmatpush1.msra.mxu0 %v5435_v6 }
0x165b   :  { %3763 = vmatprep.subr.mxu0 %v5849_v24 }
0x170b   :  { %v2896_v33 = vpop.f32.mrf.mxu0 }
0x170c   :  { %v2903_v31 = vadd.f32 %v2896_v33, %v5501_v4 }
0x170d   :  { %v2898_v38 = vpop.f32.mrf.mxu0 }
0x170e   :  { %4153 = vtanh.f32 %v2903_v31  ;;  %v2906_v60 = vadd.f32 %v2898_v38, %v2491_v45  ;;  %v3632_v26 = vmul.f32 -1.442695, %v2903_v31 }
0x1710   :  { %4155 = vtanh.f32 %v2906_v60  ;;  %v3633_v28 = vmul.f32 -1.442695, %v2906_v60 }
0x1711   :  { %4157 = vpow2.f32 %v3632_v26  ;;  %v3204_v26 = vld [vmem:[%s5833_s11 + $0x30] sm:$0xff] }
0x1712   :  { %4159 = vpow2.f32 %v3633_v28  ;;  %v3203_v28 = vld [vmem:[%s5833_s11 + $0x28] sm:$0xff] }
0x171b   :  { %v4154_v14 = vpop.eup %4153 }
0x171c   :  { %2920 = vrot.lane.b32.xlu1 %v4154_v14, %s4202_s3 }
0x171d   :  { %v4156_v17 = vpop.eup %4155 }
0x171e   :  { %2944 = vrot.lane.b32.xlu0 %v4156_v17, %s4202_s3  ;;  %v4158_v52 = vpop.eup %4157  ;;  %v3205_v17 = vld [vmem:[%s5833_s11 + $0x38] sm:$0xff] }
0x171f   :  { %v4160_v0 = vpop.eup %4159  ;;  %v2910_v59 = vadd.f32 1.0, %v4158_v52  ;;  %v3202_v52 = vld [vmem:[%s5833_s11 + $0x20] sm:$0xff] }
0x1720   :  { %2915 = vrot.lane.b32.xlu1 %v2826_v7, %s4203_s30  ;;  %v2938_v10 = vadd.f32 1.0, %v4160_v0  ;;  %v3201_v0 = vld [vmem:[%s5833_s11 + $0x18] sm:$0xff] }
0x1721   :  { %4161 = vrcp.f32 %v2910_v59  ;;  %v3200_v59 = vld [vmem:[%s5833_s11 + $0x10] sm:$0xff] }
0x1722   :  { %4163 = vrcp.f32 %v2938_v10  ;;  %v3199_v10 = vld [vmem:[%s5833_s11 + $0x8] sm:$0xff] }
0x172e   :  { %v4162_v6 = vpop.eup %4161 }
0x172f   :  { %v4164_v8 = vpop.eup %4163 }
0x1730   :  { %v2942_v5 = vmul.f32 %v4164_v8, %v2826_v7 }
0x178e   :  { %v2921_v4 = vpop.permute.xlu1 %2920 }
0x178f   :  { %v2923_v47 = vmul.f32 %v4162_v6, %v2921_v4 }
0x1790   :  { %v2945_v53 = vpop.permute.xlu0 %2944 }
0x1791   :  { %2925 = vrot.lane.b32.xlu0 %v2923_v47, %s4203_s30  ;;  %v2947_v61 = vmul.f32 %v4164_v8, %v2945_v53  ;;  %v2501_v47 = vadd.f32 %v5499_v27, %v5563_v50 }
0x1792   :  { %v2916_v58 = vpop.permute.xlu1 %2915 }
0x1793   :  { %2949 = vrot.lane.b32.xlu1 %v2947_v61, %s4203_s30  ;;  %v2918_v12 = vmul.f32 %v4162_v6, %v2916_v58 }
0x1803   :  { %v2926_v1 = vpop.permute.xlu0 %2925 }
0x1804   :  { %v2928_v48 = vadd.f32 %v2926_v1, %v2918_v12 }
0x1805   :  { %v2950_v63 = vpop.permute.xlu1 %2949 }
0x1806   :  { %4165 = vtanh.f32 %v2928_v48  ;;  %v2952_v18 = vadd.f32 %v2950_v63, %v2942_v5 }
0x1808   :  { %4167 = vtanh.f32 %v2952_v18 }
0x1813   :  { %v4166_v15 = vpop.eup %4165 }
0x1814   :  { %2931 = vrot.lane.b32.xlu0 %v4166_v15, %s4202_s3 }
0x1815   :  { %v4168_v34 = vpop.eup %4167 }
0x1816   :  { %2955 = vrot.lane.b32.xlu1 %v4168_v34, %s4202_s3 }
0x1886   :  { %v2932_v43 = vpop.permute.xlu0 %2931 }
0x1887   :  { %v2934_v46 = vmul.f32 %v4162_v6, %v2932_v43  ;;  %v3198_v6 = vld [vmem:[%s5833_s11] sm:$0xff] }
0x1888   :  { %v2956_v30 = vpop.permute.xlu1 %2955 }
0x1889   :  { %2960 = vrot.lane.b32.xlu0 %v2934_v46, %s4203_s30  ;;  %v2958_v39 = vmul.f32 %v4164_v8, %v2956_v30  ;;  %v3213_v46 = vld [vmem:[%s5833_s11 + $0x78] sm:$0xff]  ;;  %v3212_v30 = vld [vmem:[%s5833_s11 + $0x70] sm:$0xff] }
0x188b   :  { %2964 = vrot.lane.b32.xlu1 %v2958_v39, %s4202_s3  ;;  %v3211_v39 = vld [vmem:[%s5833_s11 + $0x68] sm:$0xff] }
0x188f   :  { %2970 = vrot.lane.b32.xlu1 %v2928_v48, %s4204_s15 }
0x18fb   :  { %v2961_v3 = vpop.permute.xlu0 %2960 }
0x18fd   :  { %v2965_v44 = vpop.permute.xlu1 %2964 }
0x18fe   :  { %v2967_v13 = vsel %vm85_vm1, %v2961_v3, %v2965_v44  ;;  %v3210_v44 = vld [vmem:[%s5833_s11 + $0x60] sm:$0xff] }
0x18ff   :  { %2968 = vst.msk [vmem:[#allocation7] sm:$0xff] %vm365_vm0, %v2967_v13  ;;  %v3209_v13 = vld [vmem:[%s5833_s11 + $0x58] sm:$0xff] }
0x1901   :  { %v2971_v21 = vpop.permute.xlu1 %2970 }
0x1902   :  { %v2973_v22 = vsel %vm85_vm1, %v2971_v21, %v2952_v18  ;;  %v3208_v21 = vld [vmem:[%s5833_s11 + $0x50] sm:$0xff] }
0x1903   :  { %2974 = vst.msk [vmem:[#allocation8] sm:$0xff] %vm365_vm0, %v2973_v22 }
0x1906   :  { %v2975_v9 = vld [vmem:[#allocation7] sm:$0xff] }
0x1907   :  { %3634 = vmatmul.mubr.msk.f32.vlgmr.msra.gmra.mxu1 %vm365_vm0, %v2975_v9 }
0x1908   :  { %3760 = vmatprep.mubr.msk.f32.mxu1 %vm4205_vm2, %v5849_v24  ;;  %3745 = vmatpush3.msra.mxu1 %v3213_v46 }
0x1909   :  { %3746 = vmatprep.subr.mxu1 %v5849_v24 }
0x190a   :  { %v2976_v41 = vld [vmem:[#allocation8] sm:$0xff]  ;;  %3747 = vmatpush3.msra.mxu1 %v3212_v30 }
0x190b   :  { %3748 = vmatprep.subr.mxu1 %v5849_v24 }
0x190c   :  { %3749 = vmatpush3.msra.mxu1 %v3211_v39 }
0x190d   :  { %3750 = vmatprep.subr.mxu1 %v5849_v24 }
0x190e   :  { %3751 = vmatpush3.msra.mxu1 %v3210_v44 }
0x190f   :  { %3752 = vmatprep.subr.mxu1 %v5849_v24 }
0x1910   :  { %3753 = vmatpush3.msra.mxu1 %v3209_v13 }
0x1911   :  { %3754 = vmatprep.subr.mxu1 %v5849_v24 }
0x1912   :  { %3755 = vmatpush3.msra.mxu1 %v3208_v21 }
0x1913   :  { %3756 = vmatprep.subr.mxu1 %v5849_v24 }
0x19c7   :  { %v3046_v40 = vpop.f32.mrf.mxu1 }
0x19c9   :  { %v3047_v35 = vpop.f32.mrf.mxu1 }
0x19ca   :  { %v3052_v23 = vadd.f32 %v3047_v35, %v2496_v20 }
0x19cc   :  { %4169 = vtanh.f32 %v3052_v23  ;;  %v3635_v29 = vmul.f32 -1.442695, %v3052_v23 }
0x19ce   :  { %4171 = vpow2.f32 %v3635_v29 }
0x19d9   :  { %v4170_v54 = vpop.eup %4169 }
0x19da   :  { %3062 = vrot.lane.b32.xlu0 %v4170_v54, %s4202_s3 }
0x19db   :  { %v4172_v55 = vpop.eup %4171 }
0x19dc   :  { %v3056_v49 = vadd.f32 1.0, %v4172_v55 }
0x19de   :  { %4173 = vrcp.f32 %v3056_v49 }
0x19eb   :  { %v4174_v57 = vpop.eup %4173 }
0x19ec   :  { %v3060_v25 = vmul.f32 %v4174_v57, %v2976_v41 }
0x1a4c   :  { %v3063_v19 = vpop.permute.xlu0 %3062 }
0x1a4d   :  { %v3065_v51 = vmul.f32 %v4174_v57, %v3063_v19  ;;  %v3197_v19 = vld [vmem:[%s5834_s10] sm:$0xff] }
0x1a4f   :  { %3067 = vrot.lane.b32.xlu0 %v3065_v51, %s4203_s30  ;;  %v3462_v51 = vld [vmem:[%s5835_s13 + $0x78] sm:$0xff] }
0x1ac1   :  { %v3068_v32 = vpop.permute.xlu0 %3067 }
0x1ac2   :  { %v3070_v56 = vadd.f32 %v3068_v32, %v3060_v25  ;;  %v3460_v25 = vld [vmem:[%s5835_s13 + $0x68] sm:$0xff]  ;;  %v3459_v32 = vld [vmem:[%s5835_s13 + $0x60] sm:$0xff] }
0x1ac4   :  { %4175 = vtanh.f32 %v3070_v56  ;;  %v3083_v33 = vsel %vm85_vm1, %v2976_v41, %v3070_v56  ;;  %v3461_v41 = vld [vmem:[%s5835_s13 + $0x70] sm:$0xff]  ;;  %v3458_v56 = vld [vmem:[%s5835_s13 + $0x58] sm:$0xff] }
0x1ac5   :  { %3084 = vst.msk [vmem:[#allocation8] sm:$0xff] %vm365_vm0, %v3083_v33  ;;  %v3457_v33 = vld [vmem:[%s5835_s13 + $0x50] sm:$0xff] }
0x1acc   :  { %v3086_v27 = vld [vmem:[#allocation8] sm:$0xff] }
0x1ad1   :  { %v4176_v45 = vpop.eup %4175 }
0x1ad2   :  { %3073 = vrot.lane.b32.xlu1 %v4176_v45, %s4202_s3  ;;  %v3456_v45 = vld [vmem:[%s5835_s13 + $0x48] sm:$0xff] }
0x1b44   :  { %v3074_v31 = vpop.permute.xlu1 %3073 }
0x1b45   :  { %v3076_v38 = vmul.f32 %v4174_v57, %v3074_v31  ;;  %v3360_v57 = vld [vmem:[%s5833_s11 + $0x80] sm:$0xff] }
0x1b46   :  { %v3455_v31 = vld [vmem:[%s5835_s13 + $0x40] sm:$0xff] }
0x1b47   :  { %3078 = vrot.lane.b32.xlu0 %v3076_v38, %s4202_s3  ;;  %v3454_v38 = vld [vmem:[%s5835_s13 + $0x38] sm:$0xff] }
0x1bb9   :  { %v3079_v60 = vpop.permute.xlu0 %3078 }
0x1bba   :  { %v3081_v14 = vsel %vm85_vm1, %v2975_v9, %v3079_v60  ;;  %v3453_v60 = vld [vmem:[%s5835_s13 + $0x30] sm:$0xff] }
0x1bbb   :  { %3082 = vst.msk [vmem:[#allocation7] sm:$0xff] %vm365_vm0, %v3081_v14  ;;  %v3452_v14 = vld [vmem:[%s5835_s13 + $0x28] sm:$0xff] }
0x1bc2   :  { %v5632_v7 = vld [vmem:[#allocation7] sm:$0xff] }
0x1bc3   :  { %3636 = vmatmul.mubr.msk.f32.vlgmr.msra.gmra.mxu0 %vm365_vm0, %v5632_v7 }
0x1bc4   :  { %3764 = vmatpush3.msra.mxu0 %v3205_v17  ;;  %3779 = vmatprep.mubr.msk.f32.mxu0 %vm4205_vm2, %v5849_v24  ;;  %v3451_v17 = vld [vmem:[%s5835_s13 + $0x20] sm:$0xff] }
0x1bc5   :  { %3765 = vmatprep.subr.mxu0 %v5849_v24 }
0x1bc6   :  { %3766 = vmatpush3.msra.mxu0 %v3204_v26  ;;  %v3449_v26 = vld [vmem:[%s5835_s13 + $0x10] sm:$0xff] }
0x1bc7   :  { %3767 = vmatprep.subr.mxu0 %v5849_v24 }
0x1bc8   :  { %3768 = vmatpush3.msra.mxu0 %v3203_v28  ;;  %v3448_v28 = vld [vmem:[%s5835_s13 + $0x8] sm:$0xff] }
0x1bc9   :  { %3769 = vmatprep.subr.mxu0 %v5849_v24 }
0x1bca   :  { %3770 = vmatpush3.msra.mxu0 %v3202_v52  ;;  %v3447_v52 = vld [vmem:[%s5835_s13] sm:$0xff] }
0x1bcb   :  { %3771 = vmatprep.subr.mxu0 %v5849_v24 }
0x1bcc   :  { %3772 = vmatpush3.msra.mxu0 %v3201_v0 }
0x1bcd   :  { %3773 = vmatprep.subr.mxu0 %v5849_v24 }
0x1bce   :  { %3774 = vmatpush3.msra.mxu0 %v3200_v59 }
0x1bcf   :  { %3775 = vmatprep.subr.mxu0 %v5849_v24 }
0x1bd0   :  { %3776 = vmatpush3.msra.mxu0 %v3199_v10 }
0x1bd1   :  { %3777 = vmatprep.subr.mxu0 %v5849_v24 }
0x1bd2   :  { %3778 = vmatpush3.msra.mxu0 %v3198_v6 }
0x1bd3   :  { %3780 = vmatmul.mubr.msk.f32.vlgmr.msra.gmra.mxu0 %vm365_vm0, %v5468_v62 }
0x1c83   :  { %v3156_v4 = vpop.f32.mrf.mxu0 }
0x1c84   :  { %v3641_v4 = vld [vmem:[%s5836_s12] ss:$0 sm:$0xff] }
0x1c85   :  { %v3157_v8 = vpop.f32.mrf.mxu0 }
0x1c86   :  { %v3162_v53 = vadd.f32 %v3157_v8, %v2501_v47 }
0x1c88   :  { %4177 = vtanh.f32 %v3162_v53  ;;  %v3637_v1 = vmul.f32 -1.442695, %v3162_v53 }
0x1c8a   :  { %4179 = vpow2.f32 %v3637_v1 }
0x1c93   :  { %v5670_v61 = vpop.f32.mrf.mxu0 }
0x1c95   :  { %v4178_v58 = vpop.eup %4177  ;;  %v3781_v12 = vpop.f32.mrf.mxu0 }
0x1c96   :  { %3172 = vrot.lane.b32.xlu1 %v4178_v58, %s4202_s3 }
0x1c97   :  { %v4180_v48 = vpop.eup %4179 }
0x1c98   :  { %v3166_v5 = vadd.f32 1.0, %v4180_v48 }
0x1c9a   :  { %4181 = vrcp.f32 %v3166_v5 }
0x1ca7   :  { %v4182_v63 = vpop.eup %4181 }
0x1ca8   :  { %v3170_v50 = vmul.f32 %v4182_v63, %v3086_v27 }
0x1d08   :  { %v3173_v62 = vpop.permute.xlu1 %3172 }
0x1d09   :  { %v3175_v18 = vmul.f32 %v4182_v63, %v3173_v62 }
0x1d0b   :  { %3177 = vrot.lane.b32.xlu0 %v3175_v18, %s4203_s30 }
0x1d7d   :  { %v3178_v15 = vpop.permute.xlu0 %3177 }
0x1d7e   :  { %v3180_v34 = vadd.f32 %v3178_v15, %v3170_v50 }
0x1d80   :  { %4183 = vtanh.f32 %v3180_v34  ;;  %v3193_v43 = vsel %vm85_vm1, %v3086_v27, %v3180_v34 }
0x1d81   :  { %3194 = vst.msk [vmem:[#allocation8] sm:$0xff] %vm365_vm0, %v3193_v43 }
0x1d8d   :  { %v4184_v3 = vpop.eup %4183 }
0x1d8e   :  { %3183 = vrot.lane.b32.xlu1 %v4184_v3, %s4202_s3 }
0x1d92   :  { %2259 = vrot.lane.b32.xlu1 %v5252_v2, %s4204_s15  ;;  %v3207_v2 = vld [vmem:[%s5833_s11 + $0x48] sm:$0xff] }
0x1d93   :  { %3757 = vmatpush3.msra.mxu1 %v3207_v2 }
0x1d94   :  { %3758 = vmatprep.subr.mxu1 %v5849_v24 }
0x1d96   :  { %2263 = vrot.lane.b32.xlu1 %v5272_v37, %s4204_s15  ;;  %v3206_v37 = vld [vmem:[%s5833_s11 + $0x40] sm:$0xff] }
0x1d97   :  { %3759 = vmatpush3.msra.mxu1 %v3206_v37 }
0x1d98   :  { %3782 = vmatprep.subr.mxu1 %v5849_v24 }
0x1e00   :  { %v3184_v22 = vpop.permute.xlu1 %3183 }
0x1e01   :  { %v3186_v9 = vmul.f32 %v4182_v63, %v3184_v22 }
0x1e03   :  { %3188 = vrot.lane.b32.xlu0 %v3186_v9, %s4202_s3 }
0x1e04   :  { %v2260_v40 = vpop.permute.xlu1 %2259 }
0x1e05   :  { %v2268_v20 = vsel %vm85_vm1, %v2260_v40, %v5257_v11 }
0x1e06   :  { %2271 = vst.msk [vmem:[#allocation4] sm:$0xff] %vm365_vm0, %v2268_v20 }
0x1e07   :  { %2261 = vrot.lane.b32.xlu0 %v5262_v36, %s4204_s15  ;;  %v3363_v36 = vld [vmem:[%s5833_s11 + $0x98] sm:$0xff] }
0x1e08   :  { %v2264_v35 = vpop.permute.xlu1 %2263 }
0x1e09   :  { %v2270_v23 = vsel %vm85_vm1, %v2264_v35, %v5274_v42  ;;  %v3362_v42 = vld [vmem:[%s5833_s11 + $0x90] sm:$0xff] }
0x1e0a   :  { %2273 = vst.msk [vmem:[#allocation4 + $0x10] sm:$0xff] %vm365_vm0, %v2270_v23 }
0x1e75   :  { %v3189_v54 = vpop.permute.xlu0 %3188 }
0x1e76   :  { %v3191_v29 = vsel %vm85_vm1, %v5632_v7, %v3189_v54  ;;  %v3450_v7 = vld [vmem:[%s5835_s13 + $0x18] sm:$0xff] }
0x1e77   :  { %3192 = vst.msk [vmem:[#allocation7] sm:$0xff] %vm365_vm0, %v3191_v29 }
0x1e79   :  { %v2262_v55 = vpop.permute.xlu0 %2261 }
0x1e7a   :  { %v2269_v11 = vsel %vm85_vm1, %v2262_v55, %v5264_v16  ;;  %v3361_v16 = vld [vmem:[%s5833_s11 + $0x88] sm:$0xff] }
0x1e7b   :  { %2272 = vst.msk [vmem:[#allocation4 + $0x8] sm:$0xff] %vm365_vm0, %v2269_v11 }
0x1e7e   :  { %v3196_v49 = vld [vmem:[#allocation7] sm:$0xff] }
0x1e7f   :  { %3761 = vmatmul.mubr.msk.f32.vlgmr.msra.gmra.mxu1 %vm365_vm0, %v3196_v49 }
0x1e80   :  { %3783 = vmatpush3.msra.mxu1 %v3363_v36  ;;  %3790 = vmatprep.mubr.msk.f32.mxu1 %vm4205_vm2, %v5849_v24 }
0x1e81   :  { %3784 = vmatprep.subr.mxu1 %v5849_v24 }
0x1e82   :  { %3785 = vmatpush3.msra.mxu1 %v3362_v42 }
0x1e83   :  { %3786 = vmatprep.subr.mxu1 %v5849_v24 }
0x1e84   :  { %3787 = vmatpush3.msra.mxu1 %v3361_v16 }
0x1e85   :  { %3788 = vmatprep.subr.mxu1 %v5849_v24 }
0x1e86   :  { %3789 = vmatpush3.msra.mxu1 %v3360_v57 }
0x1e87   :  { %3791 = vmatmul.mubr.msk.f32.vlgmr.msra.gmra.mxu1 %vm85_vm1, %v3197_v19  ;;  %3793 = vmatprep.subr.mxu1 %v5849_v24 }
0x1e88   :  { %3794 = vmatpush3.msra.mxu1 %v3462_v51  ;;  %3825 = vmatprep.mubr.msk.f32.mxu1 %vm4205_vm2, %v5849_v24 }
0x1e89   :  { %3795 = vmatprep.subr.mxu1 %v5849_v24 }
0x1e8a   :  { %3796 = vmatpush3.msra.mxu1 %v3461_v41 }
0x1e8b   :  { %3797 = vmatprep.subr.mxu1 %v5849_v24 }
0x1e8c   :  { %3798 = vmatpush3.msra.mxu1 %v3460_v25 }
0x1e8d   :  { %3799 = vmatprep.subr.mxu1 %v5849_v24 }
0x1e8e   :  { %3800 = vmatpush3.msra.mxu1 %v3459_v32 }
0x1e8f   :  { %3801 = vmatprep.subr.mxu1 %v5849_v24 }
0x1e90   :  { %3802 = vmatpush3.msra.mxu1 %v3458_v56 }
0x1e91   :  { %3803 = vmatprep.subr.mxu1 %v5849_v24 }
0x1e92   :  { %3804 = vmatpush3.msra.mxu1 %v3457_v33 }
0x1e93   :  { %3805 = vmatprep.subr.mxu1 %v5849_v24 }
0x1e94   :  { %3806 = vmatpush3.msra.mxu1 %v3456_v45 }
0x1e95   :  { %3807 = vmatprep.subr.mxu1 %v5849_v24 }
0x1e96   :  { %3808 = vmatpush3.msra.mxu1 %v3455_v31 }
0x1e97   :  { %3809 = vmatprep.subr.mxu1 %v5849_v24 }
0x1e98   :  { %3810 = vmatpush3.msra.mxu1 %v3454_v38 }
0x1e99   :  { %3811 = vmatprep.subr.mxu1 %v5849_v24 }
0x1e9a   :  { %3812 = vmatpush3.msra.mxu1 %v3453_v60 }
0x1e9b   :  { %3813 = vmatprep.subr.mxu1 %v5849_v24 }
0x1e9c   :  { %3814 = vmatpush3.msra.mxu1 %v3452_v14 }
0x1e9d   :  { %3815 = vmatprep.subr.mxu1 %v5849_v24 }
0x1e9e   :  { %3816 = vmatpush3.msra.mxu1 %v3451_v17 }
0x1e9f   :  { %3817 = vmatprep.subr.mxu1 %v5849_v24 }
0x1ea0   :  { %3818 = vmatpush3.msra.mxu1 %v3450_v7 }
0x1ea1   :  { %3819 = vmatprep.subr.mxu1 %v5849_v24 }
0x1ea2   :  { %3820 = vmatpush3.msra.mxu1 %v3449_v26 }
0x1ea3   :  { %3821 = vmatprep.subr.mxu1 %v5849_v24 }
0x1ea4   :  { %3822 = vmatpush3.msra.mxu1 %v3448_v28 }
0x1ea5   :  { %3823 = vmatprep.subr.mxu1 %v5849_v24 }
0x1ea6   :  { %3824 = vmatpush3.msra.mxu1 %v3447_v52 }
0x1f3f   :  { %v3283_v0 = vpop.f32.mrf.mxu1 }
0x1f40   :  { %v3357_v10 = vadd.f32 %v5670_v61, %v3283_v0 }
0x1f41   :  { %v3762_v59 = vpop.f32.mrf.mxu1 }
0x1f47   :  { %v3433_v6 = vpop.f32.mrf.mxu1 }
0x1f48   :  { %v3437_v47 = vadd.f32 %v3433_v6, %v3357_v10 }
0x1f49   :  { %v3792_v8 = vpop.f32.mrf.mxu1 }
0x1f4a   :  { %v3445_v53 = vadd.f32 %v3641_v4, %v3437_v47 }
0x1f4c   :  { %v3446_v58 = vmax.f32 %v3445_v53, 0.0 }
0x1f4e   :  { %3826 = vmatmul.mubr.f32.vlgmr.msra.gmra.mxu1 %v3446_v58 }
0x200e   :  { %v3529_v24 = vpop.f32.mrf.mxu1 }
0x200f   :  { %3533 = vst [vmem:[%s5837_s14] sm:$0xff] %v3529_v24 }
0x2010   :  { %v3827_v12 = vpop.f32.mrf.mxu1 }

</bundles_post_ra>
